<compile_context>
chip_gen: v5e
topology: v5e:2x2
jax: 0.10.0
libtpu: 0.0.40
codegen_flags: <defaults>
</compile_context>

<pallas_src>
import functools
import numpy as np

import jax
import jax.numpy as jnp
from jax.experimental import pallas as pl
from jax.experimental.pallas import tpu as pltpu


CP = 128          # all channel dims are zero-padded to one 128-lane register
TM_MAX = 256      # row tile for the matmul grid (multiple of 8)

_PAR1 = pltpu.CompilerParams(dimension_semantics=("parallel",))


# ----------------------------------------------------------------------------
# helpers (plain python / build-time)
# ----------------------------------------------------------------------------
def make_divisible(v, divisor=8, min_value=None):
    if min_value is None:
        min_value = divisor
    new_v = max(min_value, int(v + divisor / 2) // divisor * divisor)
    if new_v < 0.9 * v:
        new_v += divisor
    return new_v


def _round_up(x, m):
    return (x + m - 1) // m * m


def _pad_axis(a, size, axis):
    if a.shape[axis] >= size:
        return a
    widths = [(0, 0)] * a.ndim
    widths[axis] = (0, size - a.shape[axis])
    return jnp.pad(a, widths)


# ----------------------------------------------------------------------------
# Pallas kernels
# ----------------------------------------------------------------------------
def _matmul_bn_kernel(relu, x_ref, w_ref, s_ref, b_ref, o_ref):
    # conv-as-matmul: bf16 MXU inputs, f32 accumulation, folded BN, optional ReLU
    acc = jnp.dot(x_ref[...], w_ref[...], preferred_element_type=jnp.float32)
    y = acc * s_ref[...] + b_ref[...]
    if relu:
        y = jnp.maximum(y, 0.0)
    o_ref[...] = y.astype(o_ref.dtype)


def _matmul_bn_res_kernel(relu, x_ref, w_ref, s_ref, b_ref, r_ref, o_ref):
    # same as above, plus fused residual add before the activation
    acc = jnp.dot(x_ref[...], w_ref[...], preferred_element_type=jnp.float32)
    y = acc * s_ref[...] + b_ref[...] + r_ref[...].astype(jnp.float32)
    if relu:
        y = jnp.maximum(y, 0.0)
    o_ref[...] = y.astype(o_ref.dtype)


def _dw3x3_kernel(H, W, x_ref, w_ref, s_ref, b_ref, o_ref):
    # depthwise 3x3 (stride 1): 9 statically-shifted reads of the spatially
    # padded image block (no HBM im2col), per-channel MAC on the VPU,
    # folded BN + ReLU.  x_ref block: (1, H+2, W+2, C);  w_ref: (9, 1, 1, C)
    acc = None
    for dy in range(3):
        for dx in range(3):
            tap = x_ref[0, dy:dy + H, dx:dx + W, :].astype(jnp.float32)
            term = tap * w_ref[dy * 3 + dx]              # (1,1,C) broadcast
            acc = term if acc is None else acc + term
    y = acc * s_ref[...] + b_ref[...]
    y = jnp.maximum(y, 0.0)
    o_ref[0] = y.astype(o_ref.dtype)


def _mean_pool_kernel(x_ref, o_ref):
    # AdaptiveAvgPool2d((1,1)) over the flattened spatial axis, f32 accumulate
    o_ref[...] = jnp.mean(x_ref[...].astype(jnp.float32), axis=1, keepdims=True)


# ----------------------------------------------------------------------------
# Pallas wrappers
# ----------------------------------------------------------------------------
def matmul_bn_act(x, w, s2, b2, *, relu, residual=None, out_dtype=jnp.bfloat16):
    # x: (M, K) bf16   w: (K, N=CP) bf16   s2/b2: (1, N) f32   residual: (M, N) bf16
    M, K = x.shape
    N = w.shape[1]
    tm = min(TM_MAX, _round_up(M, 8))
    Mp = _round_up(M, tm)
    if Mp != M:
        x = jnp.pad(x, ((0, Mp - M), (0, 0)))
        if residual is not None:
            residual = jnp.pad(residual, ((0, Mp - M), (0, 0)))

    args = [x.astype(jnp.bfloat16), w, s2, b2]
    in_specs = [
        pl.BlockSpec((tm, K), lambda i: (i, 0)),      # M-tiled activations
        pl.BlockSpec((K, N), lambda i: (0, 0)),       # full weight (K kept whole)
        pl.BlockSpec((1, N), lambda i: (0, 0)),
        pl.BlockSpec((1, N), lambda i: (0, 0)),
    ]
    if residual is not None:
        args.append(residual.astype(jnp.bfloat16))
        in_specs.append(pl.BlockSpec((tm, N), lambda i: (i, 0)))
        kernel = functools.partial(_matmul_bn_res_kernel, relu)
    else:
        kernel = functools.partial(_matmul_bn_kernel, relu)

    y = pl.pallas_call(
        kernel,
        out_shape=jax.ShapeDtypeStruct((Mp, N), out_dtype),
        grid=(Mp // tm,),
        in_specs=in_specs,
        out_specs=pl.BlockSpec((tm, N), lambda i: (i, 0)),
        compiler_params=_PAR1,                         # M axis is independent
    )(*args)
    return y[:M] if Mp != M else y


def dwconv3x3_bn_relu(x, wk, s2, b2, stride):
    # x: (B, H, W, CP) bf16, wk: (9, 1, 1, CP) f32, s2/b2: (1, 1, CP) f32
    B, H, W, C = x.shape
    xp = jnp.pad(x, ((0, 0), (1, 1), (1, 1), (0, 0)))     # spatial zero-pad
    Hp, Wp = H + 2, W + 2
    y = pl.pallas_call(
        functools.partial(_dw3x3_kernel, H, W),
        out_shape=jax.ShapeDtypeStruct((B, H, W, C), jnp.bfloat16),
        grid=(B,),
        in_specs=[
            pl.BlockSpec((1, Hp, Wp, C), lambda b: (b, 0, 0, 0)),
            pl.BlockSpec((9, 1, 1, C), lambda b: (0, 0, 0, 0)),
            pl.BlockSpec((1, 1, C), lambda b: (0, 0, 0)),
            pl.BlockSpec((1, 1, C), lambda b: (0, 0, 0)),
        ],
        out_specs=pl.BlockSpec((1, H, W, C), lambda b: (b, 0, 0, 0)),
        compiler_params=_PAR1,
    )(xp, wk, s2, b2)
    if stride != (1, 1):
        # TODO(synk): stride>1 handled by computing the stride-1 output in-kernel
        # and subsampling here (avoids strided in-kernel loads); exact values.
        y = y[:, ::stride[0], ::stride[1], :]
    return y


def global_avg_pool(x):
    # x: (B, H, W, C) f32 -> (B, C) f32
    B, H, W, C = x.shape
    xm = x.reshape(B, H * W, C)
    y = pl.pallas_call(
        _mean_pool_kernel,
        out_shape=jax.ShapeDtypeStruct((B, 1, C), jnp.float32),
        grid=(B,),
        in_specs=[pl.BlockSpec((1, H * W, C), lambda b: (b, 0, 0))],
        out_specs=pl.BlockSpec((1, 1, C), lambda b: (b, 0, 0)),
        compiler_params=_PAR1,
    )(xm)
    return y.reshape(B, C)


# ----------------------------------------------------------------------------
# conv layers (glue: im2col / reshape only; compute in Pallas kernels)
# ----------------------------------------------------------------------------
def _extract_patches(x, ksize, stride, pad):
    # x: (B, H, W, C) -> (B, Ho, Wo, kh*kw, C)
    B, H, W, C = x.shape
    kh, kw = ksize
    sh, sw = stride
    xp = jnp.pad(x, ((0, 0), (pad, pad), (pad, pad), (0, 0)))
    Ho = (H + 2 * pad - kh) // sh + 1
    Wo = (W + 2 * pad - kw) // sw + 1
    taps = []
    for dy in range(kh):
        for dx in range(kw):
            taps.append(
                xp[:, dy:dy + (Ho - 1) * sh + 1:sh, dx:dx + (Wo - 1) * sw + 1:sw, :]
            )
    return jnp.stack(taps, axis=3), (Ho, Wo)


def conv3x3_bn_relu(x, wm, s2, b2, stride):
    # wm already in (9*Cin, CP) bf16 kernel layout (prepared once in build_params)
    B, H, W, Cx = x.shape
    assert wm.shape[0] == 9 * Cx
    patches, (Ho, Wo) = _extract_patches(x, (3, 3), stride, 1)   # (B,Ho,Wo,9,Cx)
    xm = patches.reshape(B * Ho * Wo, 9 * Cx).astype(jnp.bfloat16)
    y = matmul_bn_act(xm, wm, s2, b2, relu=True)
    return y.reshape(B, Ho, Wo, CP)


def conv1x1_bn(x, wm, s2, b2, *, relu, residual=None, out_dtype=jnp.bfloat16):
    B, H, W, C = x.shape
    xm = x.reshape(B * H * W, C)
    res = None if residual is None else residual.reshape(B * H * W, CP)
    y = matmul_bn_act(xm, wm, s2, b2, relu=relu, residual=res, out_dtype=out_dtype)
    return y.reshape(B, H, W, CP)


# ----------------------------------------------------------------------------
# parameter construction (deterministic, synthetic); kernel-layout weights,
# channel padding to CP lanes and bf16 casts are all hoisted here (done once).
# ----------------------------------------------------------------------------
def init_conv_bn(key, cout, cin, kh, kw):
    k1, k2, k3, k4, k5 = jax.random.split(key, 5)
    fan_in = cin * kh * kw
    w = jax.random.normal(k1, (cout, cin, kh, kw), jnp.float32) * (2.0 / fan_in) ** 0.5
    gamma = 1.0 + 0.1 * jax.random.normal(k2, (cout,), jnp.float32)
    beta = 0.1 * jax.random.normal(k3, (cout,), jnp.float32)
    mean = 0.1 * jax.random.normal(k4, (cout,), jnp.float32)
    var = jnp.abs(jax.random.normal(k5, (cout,), jnp.float32)) + 0.5
    eps = 1e-5
    scale = gamma / jnp.sqrt(var + eps)          # eval-mode BatchNorm folded
    bias = beta - mean * scale
    return {'w': w, 'scale': scale, 'bias': bias}


def _prep_sb(p, shape):
    s2 = _pad_axis(p['scale'], CP, 0).reshape(shape).astype(jnp.float32)
    b2 = _pad_axis(p['bias'], CP, 0).reshape(shape).astype(jnp.float32)
    return s2, b2


def _prep_conv3x3(p, cin_pad):
    wt = jnp.transpose(p['w'], (2, 3, 1, 0))                 # (3,3,Cin,Cout)
    wt = _pad_axis(_pad_axis(wt, cin_pad, 2), CP, 3)
    wm = wt.reshape(9 * cin_pad, CP).astype(jnp.bfloat16)    # (9*Cin_pad, CP)
    s2, b2 = _prep_sb(p, (1, CP))
    return {'wm': wm, 's2': s2, 'b2': b2}


def _prep_conv1x1(p):
    wm = jnp.transpose(p['w'][:, :, 0, 0], (1, 0))           # (Cin, Cout)
    wm = _pad_axis(_pad_axis(wm, CP, 0), CP, 1).astype(jnp.bfloat16)
    s2, b2 = _prep_sb(p, (1, CP))
    return {'wm': wm, 's2': s2, 'b2': b2}


def _prep_dw(p):
    wk = jnp.transpose(p['w'][:, 0], (1, 2, 0)).reshape(9, -1)   # (9, C)
    wk = _pad_axis(wk, CP, 1).reshape(9, 1, 1, CP).astype(jnp.float32)
    s2, b2 = _prep_sb(p, (1, 1, CP))
    return {'wk': wk, 's2': s2, 'b2': b2}


def build_params(key, config):
    n_classes = config['n_classes']
    in_channels = config['in_channels']
    base_channels = make_divisible(config['base_channels'], 8)
    cm = config['channels_multiplier']
    er = config['expansion_rate']
    n_blocks = config['n_blocks']
    strides = config['strides']
    n_stages = len(n_blocks)
    cps = [base_channels] + [make_divisible(base_channels * cm ** s, 8)
                             for s in range(n_stages)]
    keys = iter(jax.random.split(key, 128))

    params = {'n_classes': n_classes}
    # in_c: two Conv2dNormActivation (3x3, stride 2, BN, ReLU)
    c0 = init_conv_bn(next(keys), cps[0] // 4, in_channels, 3, 3)
    c1 = init_conv_bn(next(keys), cps[0], cps[0] // 4, 3, 3)
    params['in_c'] = [
        dict(c0, **_prep_conv3x3(c0, in_channels)),   # raw input: K = 9*in_channels
        dict(c1, **_prep_conv3x3(c1, CP)),            # padded activations: K = 9*CP
    ]

    # TODO(synk): `Block` is defined outside the given module; implemented here as
    # the standard CP-Mobile inverted-residual block (1x1 expand + dw3x3 + 1x1
    # project, shortcut when in==out & stride==(1,1), ReLU after the block).
    blocks = []
    total = 0
    for stage_id in range(n_stages):
        in_c = cps[stage_id]
        out_c = cps[stage_id + 1]
        for _ in range(n_blocks[stage_id]):
            total += 1
            stride = tuple(strides.get(f'b{total}', (1, 1)))
            exp_c = make_divisible(in_c * er, 8)
            pe = init_conv_bn(next(keys), exp_c, in_c, 1, 1)
            pd = init_conv_bn(next(keys), exp_c, 1, 3, 3)
            pp = init_conv_bn(next(keys), out_c, exp_c, 1, 1)
            blocks.append({
                'stride': stride,
                'use_shortcut': (in_c == out_c) and stride == (1, 1),
                'exp': dict(pe, **_prep_conv1x1(pe)),
                'dw': dict(pd, **_prep_dw(pd)),
                'proj': dict(pp, **_prep_conv1x1(pp)),
            })
            in_c = out_c
    params['blocks'] = blocks

    # feed_forward: 1x1 conv -> BatchNorm -> AdaptiveAvgPool2d((1,1))
    pf = init_conv_bn(next(keys), n_classes, cps[-1], 1, 1)
    params['ff'] = dict(pf, **_prep_conv1x1(pf))
    return params


# ----------------------------------------------------------------------------
# forward pass (Pallas path)
# ----------------------------------------------------------------------------
def network_forward(params, x_nchw):
    x = jnp.transpose(x_nchw, (0, 2, 3, 1))                      # NCHW -> NHWC

    # in_c
    p = params['in_c'][0]
    x = conv3x3_bn_relu(x, p['wm'], p['s2'], p['b2'], (2, 2))    # -> C padded to 128
    p = params['in_c'][1]
    x = conv3x3_bn_relu(x, p['wm'], p['s2'], p['b2'], (2, 2))

    # stages (each step: fused matmul+BN+ReLU(+residual) kernels + in-kernel dw taps)
    # TODO(synk): full single-kernel fusion of the inverted-residual block (expand +
    # dw + project with the expanded activation resident in VMEM scratch) is left
    # out; partial fusion here keeps BN/act/residual inside the matmul kernels and
    # the depthwise taps in-kernel, with bf16 activations between layers.
    for blk in params['blocks']:
        inp = x
        p = blk['exp']
        y = conv1x1_bn(x, p['wm'], p['s2'], p['b2'], relu=True)
        p = blk['dw']
        y = dwconv3x3_bn_relu(y, p['wk'], p['s2'], p['b2'], blk['stride'])
        p = blk['proj']
        if blk['use_shortcut']:
            y = conv1x1_bn(y, p['wm'], p['s2'], p['b2'], relu=True, residual=inp)
        else:
            y = conv1x1_bn(y, p['wm'], p['s2'], p['b2'], relu=True)
        x = y

    # feed_forward: 1x1 conv + BN (no activation), global avg pool, squeeze
    p = params['ff']
    x = conv1x1_bn(x, p['wm'], p['s2'], p['b2'], relu=False, out_dtype=jnp.float32)
    logits = global_avg_pool(x)                                  # == squeeze(2).squeeze(2)
    return logits[:, :params['n_classes']]                       # drop lane padding


# ----------------------------------------------------------------------------
# pure-JAX f32 reference (for a correctness check)
# ----------------------------------------------------------------------------
def _ref_conv_bn(x, p, stride, pad, groups=1, relu=True, residual=None):
    y = jax.lax.conv_general_dilated(
        x, jnp.transpose(p['w'], (2, 3, 1, 0)),
        window_strides=stride, padding=[(pad, pad), (pad, pad)],
        dimension_numbers=('NHWC', 'HWIO', 'NHWC'),
        feature_group_count=groups)
    y = y * p['scale'] + p['bias']
    if residual is not None:
        y = y + residual
    if relu:
        y = jnp.maximum(y, 0.0)
    return y


def reference_forward(params, x_nchw):
    x = jnp.transpose(x_nchw, (0, 2, 3, 1)).astype(jnp.float32)
    x = _ref_conv_bn(x, params['in_c'][0], (2, 2), 1)
    x = _ref_conv_bn(x, params['in_c'][1], (2, 2), 1)
    for blk in params['blocks']:
        inp = x
        y = _ref_conv_bn(x, blk['exp'], (1, 1), 0)
        c = y.shape[-1]
        y = _ref_conv_bn(y, blk['dw'], blk['stride'], 1, groups=c)
        y = _ref_conv_bn(y, blk['proj'], (1, 1), 0, relu=True,
                         residual=inp if blk['use_shortcut'] else None)
        x = y
    x = _ref_conv_bn(x, params['ff'], (1, 1), 0, relu=False)
    return jnp.mean(x, axis=(1, 2))


# ----------------------------------------------------------------------------
# main
# ----------------------------------------------------------------------------
if __name__ == "__main__":
    config = dict(
        n_classes=10,
        in_channels=1,
        base_channels=16,
        channels_multiplier=2.0,
        expansion_rate=2.0,
        n_blocks=(1, 1),
        strides={'b2': (2, 2)},
    )

    key = jax.random.PRNGKey(0)
    kp, kx = jax.random.split(key)
    params = build_params(kp, config)

    # small spectrogram-like input (B, C_in, H, W) — NCHW like PyTorch
    x = jax.random.normal(kx, (2, 1, 32, 32), jnp.float32)

    fwd = jax.jit(lambda inp: network_forward(params, inp))
    logits = jax.block_until_ready(fwd(x))

    assert logits.shape == (2, config['n_classes'])
    assert np.all(np.isfinite(np.asarray(logits)))

    # Pallas path runs bf16 weights/activations (f32 accumulation); compare to the
    # pure-f32 reference with a bf16-appropriate tolerance.
    ref = jax.block_until_ready(reference_forward(params, x))
    np.testing.assert_allclose(np.asarray(logits), np.asarray(ref),
                               rtol=2e-2, atol=2e-2)

    print("KERNEL_OK")
</pallas_src>

<mosaic_0001>
module attributes {stable_mosaic.version = 11 : i64} {
  func.func @_matmul_bn_kernel(%arg0: i32, %arg1: memref<256x9xbf16, #tpu.memory_space<vmem>>, %arg2: memref<9x128xbf16, #tpu.memory_space<vmem>>, %arg3: memref<1x128xf32, #tpu.memory_space<vmem>>, %arg4: memref<1x128xf32, #tpu.memory_space<vmem>>, %arg5: memref<256x128xbf16, #tpu.memory_space<vmem>>) attributes {dimension_semantics = [#tpu.dimension_semantics<parallel>], iteration_bounds = array<i64: 2>, scalar_prefetch = 0 : i64, scratch_operands = 0 : i64, tpu.core_type = #tpu.core_type<tc>, window_params = [{transform_indices = @transform_0, window_bounds = array<i64: 256, 9>}, {pipeline_mode = #tpu.pipeline_mode<synchronous>, transform_indices = @transform_1, window_bounds = array<i64: 9, 128>}, {pipeline_mode = #tpu.pipeline_mode<synchronous>, transform_indices = @transform_2, window_bounds = array<i64: 1, 128>}, {pipeline_mode = #tpu.pipeline_mode<synchronous>, transform_indices = @transform_3, window_bounds = array<i64: 1, 128>}, {transform_indices = @transform_4, window_bounds = array<i64: 256, 128>}]} {
    %c0 = arith.constant 0 : index
    %c0_0 = arith.constant 0 : index
    %0 = vector.load %arg1[%c0, %c0_0] : memref<256x9xbf16, #tpu.memory_space<vmem>>, vector<256x9xbf16>
    %c0_1 = arith.constant 0 : index
    %c0_2 = arith.constant 0 : index
    %1 = vector.load %arg2[%c0_1, %c0_2] : memref<9x128xbf16, #tpu.memory_space<vmem>>, vector<9x128xbf16>
    %cst = arith.constant dense<0.000000e+00> : vector<256x128xf32>
    %2 = tpu.matmul %0, %1, %cst {dimension_numbers = #tpu.dot_dimension_numbers<[1], [0], [0], [1], [0, 0, 1, 1], [], []>} : vector<256x9xbf16>, vector<9x128xbf16>, vector<256x128xf32> -> vector<256x128xf32>
    %c0_3 = arith.constant 0 : index
    %c0_4 = arith.constant 0 : index
    %3 = vector.load %arg3[%c0_3, %c0_4] : memref<1x128xf32, #tpu.memory_space<vmem>>, vector<1x128xf32>
    %4 = vector.broadcast %3 : vector<1x128xf32> to vector<256x128xf32>
    %5 = arith.mulf %2, %4 : vector<256x128xf32>
    %c0_5 = arith.constant 0 : index
    %c0_6 = arith.constant 0 : index
    %6 = vector.load %arg4[%c0_5, %c0_6] : memref<1x128xf32, #tpu.memory_space<vmem>>, vector<1x128xf32>
    %7 = vector.broadcast %6 : vector<1x128xf32> to vector<256x128xf32>
    %8 = arith.addf %5, %7 : vector<256x128xf32>
    %cst_7 = arith.constant 0.000000e+00 : f32
    %9 = vector.broadcast %cst_7 : f32 to vector<256x128xf32>
    %10 = arith.maximumf %8, %9 : vector<256x128xf32>
    %11 = arith.truncf %10 : vector<256x128xf32> to vector<256x128xbf16>
    %c0_8 = arith.constant 0 : index
    %c0_9 = arith.constant 0 : index
    %12 = vector.load %arg5[%c0_8, %c0_9] : memref<256x128xbf16, #tpu.memory_space<vmem>>, vector<256x128xbf16>
    tpu.vector_store %arg5[%c0_8, %c0_9], %11 {strides = array<i32>} : memref<256x128xbf16, #tpu.memory_space<vmem>>, vector<256x128xbf16>,
    return
  }
  func.func @transform_0(%arg0: i32) -> (i32, i32) {
    %c0_i32 = arith.constant 0 : i32
    %c0_i32_0 = arith.constant 0 : i32
    return %arg0, %c0_i32 : i32, i32
  }
  func.func @transform_1(%arg0: i32) -> (i32, i32) {
    %c0_i32 = arith.constant 0 : i32
    %c0_i32_0 = arith.constant 0 : i32
    %c0_i32_1 = arith.constant 0 : i32
    return %c0_i32, %c0_i32_0 : i32, i32
  }
  func.func @transform_2(%arg0: i32) -> (i32, i32) {
    %c0_i32 = arith.constant 0 : i32
    %c0_i32_0 = arith.constant 0 : i32
    %c0_i32_1 = arith.constant 0 : i32
    return %c0_i32, %c0_i32_0 : i32, i32
  }
  func.func @transform_3(%arg0: i32) -> (i32, i32) {
    %c0_i32 = arith.constant 0 : i32
    %c0_i32_0 = arith.constant 0 : i32
    %c0_i32_1 = arith.constant 0 : i32
    return %c0_i32, %c0_i32_0 : i32, i32
  }
  func.func @transform_4(%arg0: i32) -> (i32, i32) {
    %c0_i32 = arith.constant 0 : i32
    %c0_i32_0 = arith.constant 0 : i32
    return %arg0, %c0_i32 : i32, i32
  }
}

module attributes {stable_mosaic.version = 11 : i64} {
  func.func @_matmul_bn_kernel(%arg0: i32, %arg1: memref<128x128xbf16, #tpu.memory_space<vmem>>, %arg2: memref<128x128xbf16, #tpu.memory_space<vmem>>, %arg3: memref<1x128xf32, #tpu.memory_space<vmem>>, %arg4: memref<1x128xf32, #tpu.memory_space<vmem>>, %arg5: memref<128x128xbf16, #tpu.memory_space<vmem>>) attributes {dimension_semantics = [#tpu.dimension_semantics<parallel>], iteration_bounds = array<i64: 1>, scalar_prefetch = 0 : i64, scratch_operands = 0 : i64, tpu.core_type = #tpu.core_type<tc>, window_params = [{transform_indices = @transform_0, window_bounds = array<i64: 128, 128>}, {pipeline_mode = #tpu.pipeline_mode<synchronous>, transform_indices = @transform_1, window_bounds = array<i64: 128, 128>}, {pipeline_mode = #tpu.pipeline_mode<synchronous>, transform_indices = @transform_2, window_bounds = array<i64: 1, 128>}, {pipeline_mode = #tpu.pipeline_mode<synchronous>, transform_indices = @transform_3, window_bounds = array<i64: 1, 128>}, {transform_indices = @transform_4, window_bounds = array<i64: 128, 128>}]} {
    %c0 = arith.constant 0 : index
    %c0_0 = arith.constant 0 : index
    %0 = vector.load %arg1[%c0, %c0_0] : memref<128x128xbf16, #tpu.memory_space<vmem>>, vector<128x128xbf16>
    %c0_1 = arith.constant 0 : index
    %c0_2 = arith.constant 0 : index
    %1 = vector.load %arg2[%c0_1, %c0_2] : memref<128x128xbf16, #tpu.memory_space<vmem>>, vector<128x128xbf16>
    %cst = arith.constant dense<0.000000e+00> : vector<128x128xf32>
    %2 = tpu.matmul %0, %1, %cst {dimension_numbers = #tpu.dot_dimension_numbers<[1], [0], [0], [1], [0, 0, 1, 1], [], []>} : vector<128x128xbf16>, vector<128x128xbf16>, vector<128x128xf32> -> vector<128x128xf32>
    %c0_3 = arith.constant 0 : index
    %c0_4 = arith.constant 0 : index
    %3 = vector.load %arg3[%c0_3, %c0_4] : memref<1x128xf32, #tpu.memory_space<vmem>>, vector<1x128xf32>
    %4 = vector.broadcast %3 : vector<1x128xf32> to vector<128x128xf32>
    %5 = arith.mulf %2, %4 : vector<128x128xf32>
    %c0_5 = arith.constant 0 : index
    %c0_6 = arith.constant 0 : index
    %6 = vector.load %arg4[%c0_5, %c0_6] : memref<1x128xf32, #tpu.memory_space<vmem>>, vector<1x128xf32>
    %7 = vector.broadcast %6 : vector<1x128xf32> to vector<128x128xf32>
    %8 = arith.addf %5, %7 : vector<128x128xf32>
    %cst_7 = arith.constant 0.000000e+00 : f32
    %9 = vector.broadcast %cst_7 : f32 to vector<128x128xf32>
    %10 = arith.maximumf %8, %9 : vector<128x128xf32>
    %11 = arith.truncf %10 : vector<128x128xf32> to vector<128x128xbf16>
    %c0_8 = arith.constant 0 : index
    %c0_9 = arith.constant 0 : index
    %12 = vector.load %arg5[%c0_8, %c0_9] : memref<128x128xbf16, #tpu.memory_space<vmem>>, vector<128x128xbf16>
    tpu.vector_store %arg5[%c0_8, %c0_9], %11 {strides = array<i32>} : memref<128x128xbf16, #tpu.memory_space<vmem>>, vector<128x128xbf16>,
    return
  }
  func.func @transform_0(%arg0: i32) -> (i32, i32) {
    %c0_i32 = arith.constant 0 : i32
    %c0_i32_0 = arith.constant 0 : i32
    return %arg0, %c0_i32 : i32, i32
  }
  func.func @transform_1(%arg0: i32) -> (i32, i32) {
    %c0_i32 = arith.constant 0 : i32
    %c0_i32_0 = arith.constant 0 : i32
    %c0_i32_1 = arith.constant 0 : i32
    return %c0_i32, %c0_i32_0 : i32, i32
  }
  func.func @transform_2(%arg0: i32) -> (i32, i32) {
    %c0_i32 = arith.constant 0 : i32
    %c0_i32_0 = arith.constant 0 : i32
    %c0_i32_1 = arith.constant 0 : i32
    return %c0_i32, %c0_i32_0 : i32, i32
  }
  func.func @transform_3(%arg0: i32) -> (i32, i32) {
    %c0_i32 = arith.constant 0 : i32
    %c0_i32_0 = arith.constant 0 : i32
    %c0_i32_1 = arith.constant 0 : i32
    return %c0_i32, %c0_i32_0 : i32, i32
  }
  func.func @transform_4(%arg0: i32) -> (i32, i32) {
    %c0_i32 = arith.constant 0 : i32
    %c0_i32_0 = arith.constant 0 : i32
    return %arg0, %c0_i32 : i32, i32
  }
}

module attributes {stable_mosaic.version = 11 : i64} {
  func.func @_matmul_bn_kernel(%arg0: i32, %arg1: memref<128x1152xbf16, #tpu.memory_space<vmem>>, %arg2: memref<1152x128xbf16, #tpu.memory_space<vmem>>, %arg3: memref<1x128xf32, #tpu.memory_space<vmem>>, %arg4: memref<1x128xf32, #tpu.memory_space<vmem>>, %arg5: memref<128x128xbf16, #tpu.memory_space<vmem>>) attributes {dimension_semantics = [#tpu.dimension_semantics<parallel>], iteration_bounds = array<i64: 1>, scalar_prefetch = 0 : i64, scratch_operands = 0 : i64, tpu.core_type = #tpu.core_type<tc>, window_params = [{transform_indices = @transform_0, window_bounds = array<i64: 128, 1152>}, {pipeline_mode = #tpu.pipeline_mode<synchronous>, transform_indices = @transform_1, window_bounds = array<i64: 1152, 128>}, {pipeline_mode = #tpu.pipeline_mode<synchronous>, transform_indices = @transform_2, window_bounds = array<i64: 1, 128>}, {pipeline_mode = #tpu.pipeline_mode<synchronous>, transform_indices = @transform_3, window_bounds = array<i64: 1, 128>}, {transform_indices = @transform_4, window_bounds = array<i64: 128, 128>}]} {
    %c0 = arith.constant 0 : index
    %c0_0 = arith.constant 0 : index
    %0 = vector.load %arg1[%c0, %c0_0] : memref<128x1152xbf16, #tpu.memory_space<vmem>>, vector<128x1152xbf16>
    %c0_1 = arith.constant 0 : index
    %c0_2 = arith.constant 0 : index
    %1 = vector.load %arg2[%c0_1, %c0_2] : memref<1152x128xbf16, #tpu.memory_space<vmem>>, vector<1152x128xbf16>
    %cst = arith.constant dense<0.000000e+00> : vector<128x128xf32>
    %2 = tpu.matmul %0, %1, %cst {dimension_numbers = #tpu.dot_dimension_numbers<[1], [0], [0], [1], [0, 0, 1, 1], [], []>} : vector<128x1152xbf16>, vector<1152x128xbf16>, vector<128x128xf32> -> vector<128x128xf32>
    %c0_3 = arith.constant 0 : index
    %c0_4 = arith.constant 0 : index
    %3 = vector.load %arg3[%c0_3, %c0_4] : memref<1x128xf32, #tpu.memory_space<vmem>>, vector<1x128xf32>
    %4 = vector.broadcast %3 : vector<1x128xf32> to vector<128x128xf32>
    %5 = arith.mulf %2, %4 : vector<128x128xf32>
    %c0_5 = arith.constant 0 : index
    %c0_6 = arith.constant 0 : index
    %6 = vector.load %arg4[%c0_5, %c0_6] : memref<1x128xf32, #tpu.memory_space<vmem>>, vector<1x128xf32>
    %7 = vector.broadcast %6 : vector<1x128xf32> to vector<128x128xf32>
    %8 = arith.addf %5, %7 : vector<128x128xf32>
    %cst_7 = arith.constant 0.000000e+00 : f32
    %9 = vector.broadcast %cst_7 : f32 to vector<128x128xf32>
    %10 = arith.maximumf %8, %9 : vector<128x128xf32>
    %11 = arith.truncf %10 : vector<128x128xf32> to vector<128x128xbf16>
    %c0_8 = arith.constant 0 : index
    %c0_9 = arith.constant 0 : index
    %12 = vector.load %arg5[%c0_8, %c0_9] : memref<128x128xbf16, #tpu.memory_space<vmem>>, vector<128x128xbf16>
    tpu.vector_store %arg5[%c0_8, %c0_9], %11 {strides = array<i32>} : memref<128x128xbf16, #tpu.memory_space<vmem>>, vector<128x128xbf16>,
    return
  }
  func.func @transform_0(%arg0: i32) -> (i32, i32) {
    %c0_i32 = arith.constant 0 : i32
    %c0_i32_0 = arith.constant 0 : i32
    return %arg0, %c0_i32 : i32, i32
  }
  func.func @transform_1(%arg0: i32) -> (i32, i32) {
    %c0_i32 = arith.constant 0 : i32
    %c0_i32_0 = arith.constant 0 : i32
    %c0_i32_1 = arith.constant 0 : i32
    return %c0_i32, %c0_i32_0 : i32, i32
  }
  func.func @transform_2(%arg0: i32) -> (i32, i32) {
    %c0_i32 = arith.constant 0 : i32
    %c0_i32_0 = arith.constant 0 : i32
    %c0_i32_1 = arith.constant 0 : i32
    return %c0_i32, %c0_i32_0 : i32, i32
  }
  func.func @transform_3(%arg0: i32) -> (i32, i32) {
    %c0_i32 = arith.constant 0 : i32
    %c0_i32_0 = arith.constant 0 : i32
    %c0_i32_1 = arith.constant 0 : i32
    return %c0_i32, %c0_i32_0 : i32, i32
  }
  func.func @transform_4(%arg0: i32) -> (i32, i32) {
    %c0_i32 = arith.constant 0 : i32
    %c0_i32_0 = arith.constant 0 : i32
    return %arg0, %c0_i32 : i32, i32
  }
}

module attributes {stable_mosaic.version = 11 : i64} {
  func.func @_dw3x3_kernel(%arg0: i32, %arg1: memref<1x10x10x128xbf16, #tpu.memory_space<vmem>>, %arg2: memref<9x1x1x128xf32, #tpu.memory_space<vmem>>, %arg3: memref<1x1x128xf32, #tpu.memory_space<vmem>>, %arg4: memref<1x1x128xf32, #tpu.memory_space<vmem>>, %arg5: memref<1x8x8x128xbf16, #tpu.memory_space<vmem>>) attributes {dimension_semantics = [#tpu.dimension_semantics<parallel>], iteration_bounds = array<i64: 2>, scalar_prefetch = 0 : i64, scratch_operands = 0 : i64, tpu.core_type = #tpu.core_type<tc>, window_params = [{transform_indices = @transform_0, window_bounds = array<i64: 1, 10, 10, 128>}, {pipeline_mode = #tpu.pipeline_mode<synchronous>, transform_indices = @transform_1, window_bounds = array<i64: 9, 1, 1, 128>}, {pipeline_mode = #tpu.pipeline_mode<synchronous>, transform_indices = @transform_2, window_bounds = array<i64: 1, 1, 128>}, {pipeline_mode = #tpu.pipeline_mode<synchronous>, transform_indices = @transform_3, window_bounds = array<i64: 1, 1, 128>}, {transform_indices = @transform_4, window_bounds = array<i64: 1, 8, 8, 128>}]} {
    %c0 = arith.constant 0 : index
    %c0_0 = arith.constant 0 : index
    %c0_1 = arith.constant 0 : index
    %c0_2 = arith.constant 0 : index
    %0 = vector.load %arg1[%c0, %c0_0, %c0_1, %c0_2] : memref<1x10x10x128xbf16, #tpu.memory_space<vmem>>, vector<1x8x8x128xbf16>
    %1 = vector.shape_cast %0 : vector<1x8x8x128xbf16> to vector<8x8x128xbf16>
    %2 = arith.extf %1 : vector<8x8x128xbf16> to vector<8x8x128xf32>
    %c0_3 = arith.constant 0 : index
    %c0_4 = arith.constant 0 : index
    %c0_5 = arith.constant 0 : index
    %c0_6 = arith.constant 0 : index
    %3 = vector.load %arg2[%c0_3, %c0_4, %c0_5, %c0_6] : memref<9x1x1x128xf32, #tpu.memory_space<vmem>>, vector<1x1x1x128xf32>
    %4 = vector.shape_cast %3 : vector<1x1x1x128xf32> to vector<1x1x128xf32>
    %5 = vector.broadcast %4 : vector<1x1x128xf32> to vector<8x8x128xf32>
    %6 = arith.mulf %2, %5 : vector<8x8x128xf32>
    %c0_7 = arith.constant 0 : index
    %c0_8 = arith.constant 0 : index
    %c1 = arith.constant 1 : index
    %c0_9 = arith.constant 0 : index
    %7 = vector.load %arg1[%c0_7, %c0_8, %c1, %c0_9] : memref<1x10x10x128xbf16, #tpu.memory_space<vmem>>, vector<1x8x8x128xbf16>
    %8 = vector.shape_cast %7 : vector<1x8x8x128xbf16> to vector<8x8x128xbf16>
    %9 = arith.extf %8 : vector<8x8x128xbf16> to vector<8x8x128xf32>
    %c1_10 = arith.constant 1 : index
    %c0_11 = arith.constant 0 : index
    %c0_12 = arith.constant 0 : index
    %c0_13 = arith.constant 0 : index
    %10 = vector.load %arg2[%c1_10, %c0_11, %c0_12, %c0_13] : memref<9x1x1x128xf32, #tpu.memory_space<vmem>>, vector<1x1x1x128xf32>
    %11 = vector.shape_cast %10 : vector<1x1x1x128xf32> to vector<1x1x128xf32>
    %12 = vector.broadcast %11 : vector<1x1x128xf32> to vector<8x8x128xf32>
    %13 = arith.mulf %9, %12 : vector<8x8x128xf32>
    %14 = arith.addf %6, %13 : vector<8x8x128xf32>
    %c0_14 = arith.constant 0 : index
    %c0_15 = arith.constant 0 : index
    %c2 = arith.constant 2 : index
    %c0_16 = arith.constant 0 : index
    %15 = vector.load %arg1[%c0_14, %c0_15, %c2, %c0_16] : memref<1x10x10x128xbf16, #tpu.memory_space<vmem>>, vector<1x8x8x128xbf16>
    %16 = vector.shape_cast %15 : vector<1x8x8x128xbf16> to vector<8x8x128xbf16>
    %17 = arith.extf %16 : vector<8x8x128xbf16> to vector<8x8x128xf32>
    %c2_17 = arith.constant 2 : index
    %c0_18 = arith.constant 0 : index
    %c0_19 = arith.constant 0 : index
    %c0_20 = arith.constant 0 : index
    %18 = vector.load %arg2[%c2_17, %c0_18, %c0_19, %c0_20] : memref<9x1x1x128xf32, #tpu.memory_space<vmem>>, vector<1x1x1x128xf32>
    %19 = vector.shape_cast %18 : vector<1x1x1x128xf32> to vector<1x1x128xf32>
    %20 = vector.broadcast %19 : vector<1x1x128xf32> to vector<8x8x128xf32>
    %21 = arith.mulf %17, %20 : vector<8x8x128xf32>
    %22 = arith.addf %14, %21 : vector<8x8x128xf32>
    %c0_21 = arith.constant 0 : index
    %c1_22 = arith.constant 1 : index
    %c0_23 = arith.constant 0 : index
    %c0_24 = arith.constant 0 : index
    %23 = vector.load %arg1[%c0_21, %c1_22, %c0_23, %c0_24] : memref<1x10x10x128xbf16, #tpu.memory_space<vmem>>, vector<1x8x8x128xbf16>
    %24 = vector.shape_cast %23 : vector<1x8x8x128xbf16> to vector<8x8x128xbf16>
    %25 = arith.extf %24 : vector<8x8x128xbf16> to vector<8x8x128xf32>
    %c3 = arith.constant 3 : index
    %c0_25 = arith.constant 0 : index
    %c0_26 = arith.constant 0 : index
    %c0_27 = arith.constant 0 : index
    %26 = vector.load %arg2[%c3, %c0_25, %c0_26, %c0_27] : memref<9x1x1x128xf32, #tpu.memory_space<vmem>>, vector<1x1x1x128xf32>
    %27 = vector.shape_cast %26 : vector<1x1x1x128xf32> to vector<1x1x128xf32>
    %28 = vector.broadcast %27 : vector<1x1x128xf32> to vector<8x8x128xf32>
    %29 = arith.mulf %25, %28 : vector<8x8x128xf32>
    %30 = arith.addf %22, %29 : vector<8x8x128xf32>
    %c0_28 = arith.constant 0 : index
    %c1_29 = arith.constant 1 : index
    %c1_30 = arith.constant 1 : index
    %c0_31 = arith.constant 0 : index
    %31 = vector.load %arg1[%c0_28, %c1_29, %c1_30, %c0_31] : memref<1x10x10x128xbf16, #tpu.memory_space<vmem>>, vector<1x8x8x128xbf16>
    %32 = vector.shape_cast %31 : vector<1x8x8x128xbf16> to vector<8x8x128xbf16>
    %33 = arith.extf %32 : vector<8x8x128xbf16> to vector<8x8x128xf32>
    %c4 = arith.constant 4 : index
    %c0_32 = arith.constant 0 : index
    %c0_33 = arith.constant 0 : index
    %c0_34 = arith.constant 0 : index
    %34 = vector.load %arg2[%c4, %c0_32, %c0_33, %c0_34] : memref<9x1x1x128xf32, #tpu.memory_space<vmem>>, vector<1x1x1x128xf32>
    %35 = vector.shape_cast %34 : vector<1x1x1x128xf32> to vector<1x1x128xf32>
    %36 = vector.broadcast %35 : vector<1x1x128xf32> to vector<8x8x128xf32>
    %37 = arith.mulf %33, %36 : vector<8x8x128xf32>
    %38 = arith.addf %30, %37 : vector<8x8x128xf32>
    %c0_35 = arith.constant 0 : index
    %c1_36 = arith.constant 1 : index
    %c2_37 = arith.constant 2 : index
    %c0_38 = arith.constant 0 : index
    %39 = vector.load %arg1[%c0_35, %c1_36, %c2_37, %c0_38] : memref<1x10x10x128xbf16, #tpu.memory_space<vmem>>, vector<1x8x8x128xbf16>
    %40 = vector.shape_cast %39 : vector<1x8x8x128xbf16> to vector<8x8x128xbf16>
    %41 = arith.extf %40 : vector<8x8x128xbf16> to vector<8x8x128xf32>
    %c5 = arith.constant 5 : index
    %c0_39 = arith.constant 0 : index
    %c0_40 = arith.constant 0 : index
    %c0_41 = arith.constant 0 : index
    %42 = vector.load %arg2[%c5, %c0_39, %c0_40, %c0_41] : memref<9x1x1x128xf32, #tpu.memory_space<vmem>>, vector<1x1x1x128xf32>
    %43 = vector.shape_cast %42 : vector<1x1x1x128xf32> to vector<1x1x128xf32>
    %44 = vector.broadcast %43 : vector<1x1x128xf32> to vector<8x8x128xf32>
    %45 = arith.mulf %41, %44 : vector<8x8x128xf32>
    %46 = arith.addf %38, %45 : vector<8x8x128xf32>
    %c0_42 = arith.constant 0 : index
    %c2_43 = arith.constant 2 : index
    %c0_44 = arith.constant 0 : index
    %c0_45 = arith.constant 0 : index
    %47 = vector.load %arg1[%c0_42, %c2_43, %c0_44, %c0_45] : memref<1x10x10x128xbf16, #tpu.memory_space<vmem>>, vector<1x8x8x128xbf16>
    %48 = vector.shape_cast %47 : vector<1x8x8x128xbf16> to vector<8x8x128xbf16>
    %49 = arith.extf %48 : vector<8x8x128xbf16> to vector<8x8x128xf32>
    %c6 = arith.constant 6 : index
    %c0_46 = arith.constant 0 : index
    %c0_47 = arith.constant 0 : index
    %c0_48 = arith.constant 0 : index
    %50 = vector.load %arg2[%c6, %c0_46, %c0_47, %c0_48] : memref<9x1x1x128xf32, #tpu.memory_space<vmem>>, vector<1x1x1x128xf32>
    %51 = vector.shape_cast %50 : vector<1x1x1x128xf32> to vector<1x1x128xf32>
    %52 = vector.broadcast %51 : vector<1x1x128xf32> to vector<8x8x128xf32>
    %53 = arith.mulf %49, %52 : vector<8x8x128xf32>
    %54 = arith.addf %46, %53 : vector<8x8x128xf32>
    %c0_49 = arith.constant 0 : index
    %c2_50 = arith.constant 2 : index
    %c1_51 = arith.constant 1 : index
    %c0_52 = arith.constant 0 : index
    %55 = vector.load %arg1[%c0_49, %c2_50, %c1_51, %c0_52] : memref<1x10x10x128xbf16, #tpu.memory_space<vmem>>, vector<1x8x8x128xbf16>
    %56 = vector.shape_cast %55 : vector<1x8x8x128xbf16> to vector<8x8x128xbf16>
    %57 = arith.extf %56 : vector<8x8x128xbf16> to vector<8x8x128xf32>
    %c7 = arith.constant 7 : index
    %c0_53 = arith.constant 0 : index
    %c0_54 = arith.constant 0 : index
    %c0_55 = arith.constant 0 : index
    %58 = vector.load %arg2[%c7, %c0_53, %c0_54, %c0_55] : memref<9x1x1x128xf32, #tpu.memory_space<vmem>>, vector<1x1x1x128xf32>
    %59 = vector.shape_cast %58 : vector<1x1x1x128xf32> to vector<1x1x128xf32>
    %60 = vector.broadcast %59 : vector<1x1x128xf32> to vector<8x8x128xf32>
    %61 = arith.mulf %57, %60 : vector<8x8x128xf32>
    %62 = arith.addf %54, %61 : vector<8x8x128xf32>
    %c0_56 = arith.constant 0 : index
    %c2_57 = arith.constant 2 : index
    %c2_58 = arith.constant 2 : index
    %c0_59 = arith.constant 0 : index
    %63 = vector.load %arg1[%c0_56, %c2_57, %c2_58, %c0_59] : memref<1x10x10x128xbf16, #tpu.memory_space<vmem>>, vector<1x8x8x128xbf16>
    %64 = vector.shape_cast %63 : vector<1x8x8x128xbf16> to vector<8x8x128xbf16>
    %65 = arith.extf %64 : vector<8x8x128xbf16> to vector<8x8x128xf32>
    %c8 = arith.constant 8 : index
    %c0_60 = arith.constant 0 : index
    %c0_61 = arith.constant 0 : index
    %c0_62 = arith.constant 0 : index
    %66 = vector.load %arg2[%c8, %c0_60, %c0_61, %c0_62] : memref<9x1x1x128xf32, #tpu.memory_space<vmem>>, vector<1x1x1x128xf32>
    %67 = vector.shape_cast %66 : vector<1x1x1x128xf32> to vector<1x1x128xf32>
    %68 = vector.broadcast %67 : vector<1x1x128xf32> to vector<8x8x128xf32>
    %69 = arith.mulf %65, %68 : vector<8x8x128xf32>
    %70 = arith.addf %62, %69 : vector<8x8x128xf32>
    %c0_63 = arith.constant 0 : index
    %c0_64 = arith.constant 0 : index
    %c0_65 = arith.constant 0 : index
    %71 = vector.load %arg3[%c0_63, %c0_64, %c0_65] : memref<1x1x128xf32, #tpu.memory_space<vmem>>, vector<1x1x128xf32>
    %72 = vector.broadcast %71 : vector<1x1x128xf32> to vector<8x8x128xf32>
    %73 = arith.mulf %70, %72 : vector<8x8x128xf32>
    %c0_66 = arith.constant 0 : index
    %c0_67 = arith.constant 0 : index
    %c0_68 = arith.constant 0 : index
    %74 = vector.load %arg4[%c0_66, %c0_67, %c0_68] : memref<1x1x128xf32, #tpu.memory_space<vmem>>, vector<1x1x128xf32>
    %75 = vector.broadcast %74 : vector<1x1x128xf32> to vector<8x8x128xf32>
    %76 = arith.addf %73, %75 : vector<8x8x128xf32>
    %cst = arith.constant 0.000000e+00 : f32
    %77 = vector.broadcast %cst : f32 to vector<8x8x128xf32>
    %78 = arith.maximumf %76, %77 : vector<8x8x128xf32>
    %79 = arith.truncf %78 : vector<8x8x128xf32> to vector<8x8x128xbf16>
    %c0_69 = arith.constant 0 : index
    %c0_70 = arith.constant 0 : index
    %c0_71 = arith.constant 0 : index
    %c0_72 = arith.constant 0 : index
    %80 = vector.load %arg5[%c0_69, %c0_70, %c0_71, %c0_72] : memref<1x8x8x128xbf16, #tpu.memory_space<vmem>>, vector<1x8x8x128xbf16>
    %81 = vector.shape_cast %80 : vector<1x8x8x128xbf16> to vector<8x8x128xbf16>
    %82 = vector.shape_cast %79 : vector<8x8x128xbf16> to vector<1x8x8x128xbf16>
    tpu.vector_store %arg5[%c0_69, %c0_70, %c0_71, %c0_72], %82 {strides = array<i32>} : memref<1x8x8x128xbf16, #tpu.memory_space<vmem>>, vector<1x8x8x128xbf16>,
    return
  }
  func.func @transform_0(%arg0: i32) -> (i32, i32, i32, i32) {
    %c0_i32 = arith.constant 0 : i32
    %c0_i32_0 = arith.constant 0 : i32
    %c0_i32_1 = arith.constant 0 : i32
    %c0_i32_2 = arith.constant 0 : i32
    return %arg0, %c0_i32, %c0_i32_0, %c0_i32_1 : i32, i32, i32, i32
  }
  func.func @transform_1(%arg0: i32) -> (i32, i32, i32, i32) {
    %c0_i32 = arith.constant 0 : i32
    %c0_i32_0 = arith.constant 0 : i32
    %c0_i32_1 = arith.constant 0 : i32
    %c0_i32_2 = arith.constant 0 : i32
    %c0_i32_3 = arith.constant 0 : i32
    return %c0_i32, %c0_i32_0, %c0_i32_1, %c0_i32_2 : i32, i32, i32, i32
  }
  func.func @transform_2(%arg0: i32) -> (i32, i32, i32) {
    %c0_i32 = arith.constant 0 : i32
    %c0_i32_0 = arith.constant 0 : i32
    %c0_i32_1 = arith.constant 0 : i32
    %c0_i32_2 = arith.constant 0 : i32
    return %c0_i32, %c0_i32_0, %c0_i32_1 : i32, i32, i32
  }
  func.func @transform_3(%arg0: i32) -> (i32, i32, i32) {
    %c0_i32 = arith.constant 0 : i32
    %c0_i32_0 = arith.constant 0 : i32
    %c0_i32_1 = arith.constant 0 : i32
    %c0_i32_2 = arith.constant 0 : i32
    return %c0_i32, %c0_i32_0, %c0_i32_1 : i32, i32, i32
  }
  func.func @transform_4(%arg0: i32) -> (i32, i32, i32, i32) {
    %c0_i32 = arith.constant 0 : i32
    %c0_i32_0 = arith.constant 0 : i32
    %c0_i32_1 = arith.constant 0 : i32
    %c0_i32_2 = arith.constant 0 : i32
    return %arg0, %c0_i32, %c0_i32_0, %c0_i32_1 : i32, i32, i32, i32
  }
}

module attributes {stable_mosaic.version = 11 : i64} {
  func.func @_matmul_bn_res_kernel(%arg0: i32, %arg1: memref<128x128xbf16, #tpu.memory_space<vmem>>, %arg2: memref<128x128xbf16, #tpu.memory_space<vmem>>, %arg3: memref<1x128xf32, #tpu.memory_space<vmem>>, %arg4: memref<1x128xf32, #tpu.memory_space<vmem>>, %arg5: memref<128x128xbf16, #tpu.memory_space<vmem>>, %arg6: memref<128x128xbf16, #tpu.memory_space<vmem>>) attributes {dimension_semantics = [#tpu.dimension_semantics<parallel>], iteration_bounds = array<i64: 1>, scalar_prefetch = 0 : i64, scratch_operands = 0 : i64, tpu.core_type = #tpu.core_type<tc>, window_params = [{transform_indices = @transform_0, window_bounds = array<i64: 128, 128>}, {pipeline_mode = #tpu.pipeline_mode<synchronous>, transform_indices = @transform_1, window_bounds = array<i64: 128, 128>}, {pipeline_mode = #tpu.pipeline_mode<synchronous>, transform_indices = @transform_2, window_bounds = array<i64: 1, 128>}, {pipeline_mode = #tpu.pipeline_mode<synchronous>, transform_indices = @transform_3, window_bounds = array<i64: 1, 128>}, {transform_indices = @transform_4, window_bounds = array<i64: 128, 128>}, {transform_indices = @transform_5, window_bounds = array<i64: 128, 128>}]} {
    %c0 = arith.constant 0 : index
    %c0_0 = arith.constant 0 : index
    %0 = vector.load %arg1[%c0, %c0_0] : memref<128x128xbf16, #tpu.memory_space<vmem>>, vector<128x128xbf16>
    %c0_1 = arith.constant 0 : index
    %c0_2 = arith.constant 0 : index
    %1 = vector.load %arg2[%c0_1, %c0_2] : memref<128x128xbf16, #tpu.memory_space<vmem>>, vector<128x128xbf16>
    %cst = arith.constant dense<0.000000e+00> : vector<128x128xf32>
    %2 = tpu.matmul %0, %1, %cst {dimension_numbers = #tpu.dot_dimension_numbers<[1], [0], [0], [1], [0, 0, 1, 1], [], []>} : vector<128x128xbf16>, vector<128x128xbf16>, vector<128x128xf32> -> vector<128x128xf32>
    %c0_3 = arith.constant 0 : index
    %c0_4 = arith.constant 0 : index
    %3 = vector.load %arg3[%c0_3, %c0_4] : memref<1x128xf32, #tpu.memory_space<vmem>>, vector<1x128xf32>
    %4 = vector.broadcast %3 : vector<1x128xf32> to vector<128x128xf32>
    %5 = arith.mulf %2, %4 : vector<128x128xf32>
    %c0_5 = arith.constant 0 : index
    %c0_6 = arith.constant 0 : index
    %6 = vector.load %arg4[%c0_5, %c0_6] : memref<1x128xf32, #tpu.memory_space<vmem>>, vector<1x128xf32>
    %7 = vector.broadcast %6 : vector<1x128xf32> to vector<128x128xf32>
    %8 = arith.addf %5, %7 : vector<128x128xf32>
    %c0_7 = arith.constant 0 : index
    %c0_8 = arith.constant 0 : index
    %9 = vector.load %arg5[%c0_7, %c0_8] : memref<128x128xbf16, #tpu.memory_space<vmem>>, vector<128x128xbf16>
    %10 = arith.extf %9 : vector<128x128xbf16> to vector<128x128xf32>
    %11 = arith.addf %8, %10 : vector<128x128xf32>
    %cst_9 = arith.constant 0.000000e+00 : f32
    %12 = vector.broadcast %cst_9 : f32 to vector<128x128xf32>
    %13 = arith.maximumf %11, %12 : vector<128x128xf32>
    %14 = arith.truncf %13 : vector<128x128xf32> to vector<128x128xbf16>
    %c0_10 = arith.constant 0 : index
    %c0_11 = arith.constant 0 : index
    %15 = vector.load %arg6[%c0_10, %c0_11] : memref<128x128xbf16, #tpu.memory_space<vmem>>, vector<128x128xbf16>
    tpu.vector_store %arg6[%c0_10, %c0_11], %14 {strides = array<i32>} : memref<128x128xbf16, #tpu.memory_space<vmem>>, vector<128x128xbf16>,
    return
  }
  func.func @transform_0(%arg0: i32) -> (i32, i32) {
    %c0_i32 = arith.constant 0 : i32
    %c0_i32_0 = arith.constant 0 : i32
    return %arg0, %c0_i32 : i32, i32
  }
  func.func @transform_1(%arg0: i32) -> (i32, i32) {
    %c0_i32 = arith.constant 0 : i32
    %c0_i32_0 = arith.constant 0 : i32
    %c0_i32_1 = arith.constant 0 : i32
    return %c0_i32, %c0_i32_0 : i32, i32
  }
  func.func @transform_2(%arg0: i32) -> (i32, i32) {
    %c0_i32 = arith.constant 0 : i32
    %c0_i32_0 = arith.constant 0 : i32
    %c0_i32_1 = arith.constant 0 : i32
    return %c0_i32, %c0_i32_0 : i32, i32
  }
  func.func @transform_3(%arg0: i32) -> (i32, i32) {
    %c0_i32 = arith.constant 0 : i32
    %c0_i32_0 = arith.constant 0 : i32
    %c0_i32_1 = arith.constant 0 : i32
    return %c0_i32, %c0_i32_0 : i32, i32
  }
  func.func @transform_4(%arg0: i32) -> (i32, i32) {
    %c0_i32 = arith.constant 0 : i32
    %c0_i32_0 = arith.constant 0 : i32
    return %arg0, %c0_i32 : i32, i32
  }
  func.func @transform_5(%arg0: i32) -> (i32, i32) {
    %c0_i32 = arith.constant 0 : i32
    %c0_i32_0 = arith.constant 0 : i32
    return %arg0, %c0_i32 : i32, i32
  }
}

module attributes {stable_mosaic.version = 11 : i64} {
  func.func @_matmul_bn_kernel(%arg0: i32, %arg1: memref<32x128xbf16, #tpu.memory_space<vmem>>, %arg2: memref<128x128xbf16, #tpu.memory_space<vmem>>, %arg3: memref<1x128xf32, #tpu.memory_space<vmem>>, %arg4: memref<1x128xf32, #tpu.memory_space<vmem>>, %arg5: memref<32x128xbf16, #tpu.memory_space<vmem>>) attributes {dimension_semantics = [#tpu.dimension_semantics<parallel>], iteration_bounds = array<i64: 1>, scalar_prefetch = 0 : i64, scratch_operands = 0 : i64, tpu.core_type = #tpu.core_type<tc>, window_params = [{transform_indices = @transform_0, window_bounds = array<i64: 32, 128>}, {pipeline_mode = #tpu.pipeline_mode<synchronous>, transform_indices = @transform_1, window_bounds = array<i64: 128, 128>}, {pipeline_mode = #tpu.pipeline_mode<synchronous>, transform_indices = @transform_2, window_bounds = array<i64: 1, 128>}, {pipeline_mode = #tpu.pipeline_mode<synchronous>, transform_indices = @transform_3, window_bounds = array<i64: 1, 128>}, {transform_indices = @transform_4, window_bounds = array<i64: 32, 128>}]} {
    %c0 = arith.constant 0 : index
    %c0_0 = arith.constant 0 : index
    %0 = vector.load %arg1[%c0, %c0_0] : memref<32x128xbf16, #tpu.memory_space<vmem>>, vector<32x128xbf16>
    %c0_1 = arith.constant 0 : index
    %c0_2 = arith.constant 0 : index
    %1 = vector.load %arg2[%c0_1, %c0_2] : memref<128x128xbf16, #tpu.memory_space<vmem>>, vector<128x128xbf16>
    %cst = arith.constant dense<0.000000e+00> : vector<32x128xf32>
    %2 = tpu.matmul %0, %1, %cst {dimension_numbers = #tpu.dot_dimension_numbers<[1], [0], [0], [1], [0, 0, 1, 1], [], []>} : vector<32x128xbf16>, vector<128x128xbf16>, vector<32x128xf32> -> vector<32x128xf32>
    %c0_3 = arith.constant 0 : index
    %c0_4 = arith.constant 0 : index
    %3 = vector.load %arg3[%c0_3, %c0_4] : memref<1x128xf32, #tpu.memory_space<vmem>>, vector<1x128xf32>
    %4 = vector.broadcast %3 : vector<1x128xf32> to vector<32x128xf32>
    %5 = arith.mulf %2, %4 : vector<32x128xf32>
    %c0_5 = arith.constant 0 : index
    %c0_6 = arith.constant 0 : index
    %6 = vector.load %arg4[%c0_5, %c0_6] : memref<1x128xf32, #tpu.memory_space<vmem>>, vector<1x128xf32>
    %7 = vector.broadcast %6 : vector<1x128xf32> to vector<32x128xf32>
    %8 = arith.addf %5, %7 : vector<32x128xf32>
    %cst_7 = arith.constant 0.000000e+00 : f32
    %9 = vector.broadcast %cst_7 : f32 to vector<32x128xf32>
    %10 = arith.maximumf %8, %9 : vector<32x128xf32>
    %11 = arith.truncf %10 : vector<32x128xf32> to vector<32x128xbf16>
    %c0_8 = arith.constant 0 : index
    %c0_9 = arith.constant 0 : index
    %12 = vector.load %arg5[%c0_8, %c0_9] : memref<32x128xbf16, #tpu.memory_space<vmem>>, vector<32x128xbf16>
    tpu.vector_store %arg5[%c0_8, %c0_9], %11 {strides = array<i32>} : memref<32x128xbf16, #tpu.memory_space<vmem>>, vector<32x128xbf16>,
    return
  }
  func.func @transform_0(%arg0: i32) -> (i32, i32) {
    %c0_i32 = arith.constant 0 : i32
    %c0_i32_0 = arith.constant 0 : i32
    return %arg0, %c0_i32 : i32, i32
  }
  func.func @transform_1(%arg0: i32) -> (i32, i32) {
    %c0_i32 = arith.constant 0 : i32
    %c0_i32_0 = arith.constant 0 : i32
    %c0_i32_1 = arith.constant 0 : i32
    return %c0_i32, %c0_i32_0 : i32, i32
  }
  func.func @transform_2(%arg0: i32) -> (i32, i32) {
    %c0_i32 = arith.constant 0 : i32
    %c0_i32_0 = arith.constant 0 : i32
    %c0_i32_1 = arith.constant 0 : i32
    return %c0_i32, %c0_i32_0 : i32, i32
  }
  func.func @transform_3(%arg0: i32) -> (i32, i32) {
    %c0_i32 = arith.constant 0 : i32
    %c0_i32_0 = arith.constant 0 : i32
    %c0_i32_1 = arith.constant 0 : i32
    return %c0_i32, %c0_i32_0 : i32, i32
  }
  func.func @transform_4(%arg0: i32) -> (i32, i32) {
    %c0_i32 = arith.constant 0 : i32
    %c0_i32_0 = arith.constant 0 : i32
    return %arg0, %c0_i32 : i32, i32
  }
}

module attributes {stable_mosaic.version = 11 : i64} {
  func.func @_matmul_bn_kernel(%arg0: i32, %arg1: memref<32x128xbf16, #tpu.memory_space<vmem>>, %arg2: memref<128x128xbf16, #tpu.memory_space<vmem>>, %arg3: memref<1x128xf32, #tpu.memory_space<vmem>>, %arg4: memref<1x128xf32, #tpu.memory_space<vmem>>, %arg5: memref<32x128xf32, #tpu.memory_space<vmem>>) attributes {dimension_semantics = [#tpu.dimension_semantics<parallel>], iteration_bounds = array<i64: 1>, scalar_prefetch = 0 : i64, scratch_operands = 0 : i64, tpu.core_type = #tpu.core_type<tc>, window_params = [{transform_indices = @transform_0, window_bounds = array<i64: 32, 128>}, {pipeline_mode = #tpu.pipeline_mode<synchronous>, transform_indices = @transform_1, window_bounds = array<i64: 128, 128>}, {pipeline_mode = #tpu.pipeline_mode<synchronous>, transform_indices = @transform_2, window_bounds = array<i64: 1, 128>}, {pipeline_mode = #tpu.pipeline_mode<synchronous>, transform_indices = @transform_3, window_bounds = array<i64: 1, 128>}, {transform_indices = @transform_4, window_bounds = array<i64: 32, 128>}]} {
    %c0 = arith.constant 0 : index
    %c0_0 = arith.constant 0 : index
    %0 = vector.load %arg1[%c0, %c0_0] : memref<32x128xbf16, #tpu.memory_space<vmem>>, vector<32x128xbf16>
    %c0_1 = arith.constant 0 : index
    %c0_2 = arith.constant 0 : index
    %1 = vector.load %arg2[%c0_1, %c0_2] : memref<128x128xbf16, #tpu.memory_space<vmem>>, vector<128x128xbf16>
    %cst = arith.constant dense<0.000000e+00> : vector<32x128xf32>
    %2 = tpu.matmul %0, %1, %cst {dimension_numbers = #tpu.dot_dimension_numbers<[1], [0], [0], [1], [0, 0, 1, 1], [], []>} : vector<32x128xbf16>, vector<128x128xbf16>, vector<32x128xf32> -> vector<32x128xf32>
    %c0_3 = arith.constant 0 : index
    %c0_4 = arith.constant 0 : index
    %3 = vector.load %arg3[%c0_3, %c0_4] : memref<1x128xf32, #tpu.memory_space<vmem>>, vector<1x128xf32>
    %4 = vector.broadcast %3 : vector<1x128xf32> to vector<32x128xf32>
    %5 = arith.mulf %2, %4 : vector<32x128xf32>
    %c0_5 = arith.constant 0 : index
    %c0_6 = arith.constant 0 : index
    %6 = vector.load %arg4[%c0_5, %c0_6] : memref<1x128xf32, #tpu.memory_space<vmem>>, vector<1x128xf32>
    %7 = vector.broadcast %6 : vector<1x128xf32> to vector<32x128xf32>
    %8 = arith.addf %5, %7 : vector<32x128xf32>
    %c0_7 = arith.constant 0 : index
    %c0_8 = arith.constant 0 : index
    %9 = vector.load %arg5[%c0_7, %c0_8] : memref<32x128xf32, #tpu.memory_space<vmem>>, vector<32x128xf32>
    tpu.vector_store %arg5[%c0_7, %c0_8], %8 {strides = array<i32>} : memref<32x128xf32, #tpu.memory_space<vmem>>, vector<32x128xf32>,
    return
  }
  func.func @transform_0(%arg0: i32) -> (i32, i32) {
    %c0_i32 = arith.constant 0 : i32
    %c0_i32_0 = arith.constant 0 : i32
    return %arg0, %c0_i32 : i32, i32
  }
  func.func @transform_1(%arg0: i32) -> (i32, i32) {
    %c0_i32 = arith.constant 0 : i32
    %c0_i32_0 = arith.constant 0 : i32
    %c0_i32_1 = arith.constant 0 : i32
    return %c0_i32, %c0_i32_0 : i32, i32
  }
  func.func @transform_2(%arg0: i32) -> (i32, i32) {
    %c0_i32 = arith.constant 0 : i32
    %c0_i32_0 = arith.constant 0 : i32
    %c0_i32_1 = arith.constant 0 : i32
    return %c0_i32, %c0_i32_0 : i32, i32
  }
  func.func @transform_3(%arg0: i32) -> (i32, i32) {
    %c0_i32 = arith.constant 0 : i32
    %c0_i32_0 = arith.constant 0 : i32
    %c0_i32_1 = arith.constant 0 : i32
    return %c0_i32, %c0_i32_0 : i32, i32
  }
  func.func @transform_4(%arg0: i32) -> (i32, i32) {
    %c0_i32 = arith.constant 0 : i32
    %c0_i32_0 = arith.constant 0 : i32
    return %arg0, %c0_i32 : i32, i32
  }
}

module attributes {stable_mosaic.version = 11 : i64} {
  func.func @_mean_pool_kernel(%arg0: i32, %arg1: memref<1x16x128xf32, #tpu.memory_space<vmem>>, %arg2: memref<1x1x128xf32, #tpu.memory_space<vmem>>) attributes {dimension_semantics = [#tpu.dimension_semantics<parallel>], iteration_bounds = array<i64: 2>, scalar_prefetch = 0 : i64, scratch_operands = 0 : i64, tpu.core_type = #tpu.core_type<tc>, window_params = [{transform_indices = @transform_0, window_bounds = array<i64: 1, 16, 128>}, {transform_indices = @transform_1, window_bounds = array<i64: 1, 1, 128>}]} {
    %c0 = arith.constant 0 : index
    %c0_0 = arith.constant 0 : index
    %c0_1 = arith.constant 0 : index
    %0 = vector.load %arg1[%c0, %c0_0, %c0_1] : memref<1x16x128xf32, #tpu.memory_space<vmem>>, vector<1x16x128xf32>
    %cst = arith.constant dense<0.000000e+00> : vector<1x128xf32>
    %1 = vector.multi_reduction <add>, %0, %cst [1] : vector<1x16x128xf32> to vector<1x128xf32>
    %2 = vector.shape_cast %1 : vector<1x128xf32> to vector<1x1x128xf32>
    %cst_2 = arith.constant 1.600000e+01 : f32
    %3 = vector.broadcast %cst_2 : f32 to vector<1x1x128xf32>
    %4 = arith.divf %2, %3 : vector<1x1x128xf32>
    %c0_3 = arith.constant 0 : index
    %c0_4 = arith.constant 0 : index
    %c0_5 = arith.constant 0 : index
    %5 = vector.load %arg2[%c0_3, %c0_4, %c0_5] : memref<1x1x128xf32, #tpu.memory_space<vmem>>, vector<1x1x128xf32>
    tpu.vector_store %arg2[%c0_3, %c0_4, %c0_5], %4 {strides = array<i32>} : memref<1x1x128xf32, #tpu.memory_space<vmem>>, vector<1x1x128xf32>,
    return
  }
  func.func @transform_0(%arg0: i32) -> (i32, i32, i32) {
    %c0_i32 = arith.constant 0 : i32
    %c0_i32_0 = arith.constant 0 : i32
    %c0_i32_1 = arith.constant 0 : i32
    return %arg0, %c0_i32, %c0_i32_0 : i32, i32, i32
  }
  func.func @transform_1(%arg0: i32) -> (i32, i32, i32) {
    %c0_i32 = arith.constant 0 : i32
    %c0_i32_0 = arith.constant 0 : i32
    %c0_i32_1 = arith.constant 0 : i32
    return %arg0, %c0_i32, %c0_i32_0 : i32, i32, i32
  }
}

</mosaic_0001>

<bundles_post_ra>
// kernel: _lambda_.10
= control target key start
LH: loop header
LB: loop body
LE: loop exit
PB: predicated region body
PF: predicated region fallthrough
CT: control target
= control target key end

     0   :  { %s945_s15 = smov 0   ;;  %s1083_s0 = inlined_call_operand.vmem [shape: bf16[512,9], index: 0, kind: input, shape index: {}]   ;;  %s1084_s1 = inlined_call_operand.vmem [shape: bf16[9,128], index: 1, kind: input, shape index: {}]   ;;  %s1085_s2 = inlined_call_operand.vmem [shape: f32[1,128], index: 2, kind: input, shape index: {}]   ;;  %s1086_s3 = inlined_call_operand.vmem [shape: f32[1,128], index: 3, kind: input, shape index: {}]   ;;  %s1087_s4 = inlined_call_operand.vmem [shape: bf16[512,128], index: 4, kind: output, shape index: {}]  }
   0x1 LB: > { %s690_s16 = sadd.s32 4294967295, %s917_s15   ;;  %p694_p0 = scmp.ge.s32.totalorder %s917_s15, 1  ;;  %s917_s15 = sphi %s945_s15, %s14_s15  }
   0x2   : > { %p163_p1 = scmp.lt.s32.totalorder %s917_s15, 3 }
   0x4   : > { %p164_p2 = pnand %p694_p0, %p163_p1 }
   0x5   : > { %s695_s21 = sshll.u32 (!%p164_p2), %s690_s16, 5 }
   0x6   : > { %167 = sbr.rel (%p164_p2) target bundleno = 219 (0xdb), region = 36  ;;  %p190_p3 = scmp.lt.s32.totalorder (!%p164_p2), %s695_s21, 63 }
   0xb   : > { %v765_v0 = vld [vmem:[%s1084_s1] sm:$0xf]  ;;  %v801_v1 = vld [vmem:[%s1084_s1] sm:$0x10]  ;;  %vm370_vm0 = vcmask 1043456   ;;  %vm371_vm1 = vcmask 1044480  }
   0xc   : > { %v766_v2 = vor.u32 %v801_v1, %v765_v0  ;;  %v919_v3 = vmov 65535   ;;  %s1089_s21 = smov (!%p190_p3, %s695_s21), 63  ;;  %vm321_vm2 = vcmask 72704   ;;  %v986_v25 = vld [vmem:[%s1085_s2] ss:$0 sm:$0xff] }
   0xd   : > { %v372_v4 = vsel %vm370_vm0, 4294967295, %v919_v3  ;;  %s696_s22 = sshll.u32 %s1089_s21, 2  ;;  %v992_v27 = vld [vmem:[%s1086_s3] ss:$0 sm:$0xff] }
   0xe   : > { %v373_v5 = vsel %vm371_vm1, %v372_v4, 0  ;;  %s193_s25 = scalar_lea.vmem %s1083_s0, %s696_s22  ;;  %s1008_s6 = scalar_lea.vmem %s1087_s4, %s696_s22 }
   0xf   : > { %v375_v6 = vand.u32 %v766_v2, %v373_v5  ;;  %v785_v7 = vld [vmem:[%s193_s25] sm:$0xff]  ;;  %v786_v11 = vld [vmem:[%s193_s25 + $0x8] sm:$0xff]  ;;  %v787_v15 = vld [vmem:[%s193_s25 + $0x10] sm:$0xff] }
  0x10   : > { %v789_v8 = vld [vmem:[%s193_s25 + $0x20] sm:$0xff]  ;;  %v790_v12 = vld [vmem:[%s193_s25 + $0x28] sm:$0xff]  ;;  %v791_v16 = vld [vmem:[%s193_s25 + $0x30] sm:$0xff] }
  0x11   : > { %384 = vmatpush.bf16.msra.mxu0 %v375_v6  ;;  %897 = vmatpush.bf16.msra.mxu1 %v375_v6  ;;  %v793_v9 = vld [vmem:[%s193_s25 + $0x40] sm:$0xff]  ;;  %v794_v13 = vld [vmem:[%s193_s25 + $0x48] sm:$0xff]  ;;  %v795_v17 = vld [vmem:[%s193_s25 + $0x50] sm:$0xff] }
  0x12   : > { %898 = vmatpush.bf16.msra.mxu2 %v375_v6  ;;  %899 = vmatpush.bf16.msra.mxu3 %v375_v6  ;;  %v797_v10 = vld [vmem:[%s193_s25 + $0x60] sm:$0xff]  ;;  %v798_v14 = vld [vmem:[%s193_s25 + $0x68] sm:$0xff]  ;;  %v799_v18 = vld [vmem:[%s193_s25 + $0x70] sm:$0xff] }
  0x13   : > { %v788_v19 = vld [vmem:[%s193_s25 + $0x18] sm:$0xff] }
  0x14   : > { %767 = vmatmul.msk.bf16.vlgmr.msra.gmra.mxu0 %vm321_vm2, %v785_v7  ;;  %771 = vmatmul.msk.bf16.vlgmr.msra.gmra.mxu1 %vm321_vm2, %v789_v8  ;;  %v792_v20 = vld [vmem:[%s193_s25 + $0x38] sm:$0xff] }
  0x15   : > { %775 = vmatmul.msk.bf16.vlgmr.msra.gmra.mxu2 %vm321_vm2, %v793_v9  ;;  %779 = vmatmul.msk.bf16.vlgmr.msra.gmra.mxu3 %vm321_vm2, %v797_v10  ;;  %v796_v21 = vld [vmem:[%s193_s25 + $0x58] sm:$0xff] }
  0x16   : > { %v800_v22 = vld [vmem:[%s193_s25 + $0x78] sm:$0xff] }
  0x24   : > { %768 = vmatmul.msk.bf16.gmra.mxu0 %vm321_vm2, %v786_v11  ;;  %772 = vmatmul.msk.bf16.gmra.mxu1 %vm321_vm2, %v790_v12 }
  0x25   : > { %776 = vmatmul.msk.bf16.gmra.mxu2 %vm321_vm2, %v794_v13  ;;  %780 = vmatmul.msk.bf16.gmra.mxu3 %vm321_vm2, %v798_v14 }
  0x34   : > { %769 = vmatmul.msk.bf16.gmra.mxu0 %vm321_vm2, %v787_v15  ;;  %773 = vmatmul.msk.bf16.gmra.mxu1 %vm321_vm2, %v791_v16 }
  0x35   : > { %777 = vmatmul.msk.bf16.gmra.mxu2 %vm321_vm2, %v795_v17  ;;  %781 = vmatmul.msk.bf16.gmra.mxu3 %vm321_vm2, %v799_v18 }
  0x44   : > { %770 = vmatmul.msk.bf16.gmra.mxu0 %vm321_vm2, %v788_v19  ;;  %774 = vmatmul.msk.bf16.gmra.mxu1 %vm321_vm2, %v792_v20 }
  0x45   : > { %778 = vmatmul.msk.bf16.gmra.mxu2 %vm321_vm2, %v796_v21  ;;  %782 = vmatmul.msk.bf16.gmra.mxu3 %vm321_vm2, %v800_v22 }
  0x91   : > { %v386_v23 = vpop.f32.mrf.mxu0  ;;  %v406_v24 = vpop.f32.mrf.mxu1 }
  0x92   : > { %v470_v26 = vmul.f32 %v986_v25, %v386_v23  ;;  %v478_v28 = vmul.f32 %v986_v25, %v406_v24 }
  0x94   : > { %v506_v33 = vadd.f32 %v992_v27, %v470_v26  ;;  %v514_v34 = vadd.f32 %v992_v27, %v478_v28 }
  0x96   : > { %v538_v41 = vmax.f32 %v506_v33, 0.0  ;;  %v546_v42 = vmax.f32 %v514_v34, 0.0 }
  0x98   : > { %v426_v29 = vpop.f32.mrf.mxu2  ;;  %v446_v30 = vpop.f32.mrf.mxu3 }
  0x99   : > { %v388_v31 = vpop.f32.mrf.mxu0  ;;  %v408_v32 = vpop.f32.mrf.mxu1  ;;  %v486_v39 = vmul.f32 %v986_v25, %v426_v29  ;;  %v494_v40 = vmul.f32 %v986_v25, %v446_v30 }
  0x9a   : > { %v471_v35 = vmul.f32 %v986_v25, %v388_v31  ;;  %v479_v36 = vmul.f32 %v986_v25, %v408_v32 }
  0x9b   : > { %v522_v49 = vadd.f32 %v992_v27, %v486_v39  ;;  %v530_v50 = vadd.f32 %v992_v27, %v494_v40 }
  0x9c   : > { %v507_v37 = vadd.f32 %v992_v27, %v471_v35  ;;  %v515_v38 = vadd.f32 %v992_v27, %v479_v36 }
  0x9d   : > { %v554_v57 = vmax.f32 %v522_v49, 0.0  ;;  %v562_v58 = vmax.f32 %v530_v50, 0.0 }
  0x9e   : > { %v539_v43 = vmax.f32 %v507_v37, 0.0  ;;  %v547_v44 = vmax.f32 %v515_v38, 0.0 }
  0xa0   : > { %v805_v45 = vpack.c.bf16 %v539_v43, %v538_v41  ;;  %v825_v46 = vpack.c.bf16 %v547_v44, %v546_v42  ;;  %v428_v47 = vpop.f32.mrf.mxu2  ;;  %v448_v48 = vpop.f32.mrf.mxu3 }
  0xa1   : > { %v487_v51 = vmul.f32 %v986_v25, %v428_v47  ;;  %v495_v52 = vmul.f32 %v986_v25, %v448_v48  ;;  %v391_v53 = vpop.f32.mrf.mxu0  ;;  %v411_v54 = vpop.f32.mrf.mxu1 }
  0xa2   : > { %806 = vst [vmem:[%s1008_s6] sm:$0xff] %v805_v45   ;;  %v472_v61 = vmul.f32 %v986_v25, %v391_v53  ;;  %v480_v62 = vmul.f32 %v986_v25, %v411_v54 }
  0xa3   : > { %885 = vst [vmem:[%s1008_s6 + $0x20] sm:$0xff] %v825_v46   ;;  %v523_v55 = vadd.f32 %v992_v27, %v487_v51  ;;  %v531_v56 = vadd.f32 %v992_v27, %v495_v52 }
  0xa4   : > { %v508_v5 = vadd.f32 %v992_v27, %v472_v61  ;;  %v516_v6 = vadd.f32 %v992_v27, %v480_v62 }
  0xa5   : > { %v555_v59 = vmax.f32 %v523_v55, 0.0  ;;  %v563_v60 = vmax.f32 %v531_v56, 0.0 }
  0xa6   : > { %v540_v13 = vmax.f32 %v508_v5, 0.0  ;;  %v548_v14 = vmax.f32 %v516_v6, 0.0 }
  0xa7   : > { %v845_v63 = vpack.c.bf16 %v555_v59, %v554_v57  ;;  %v865_v0 = vpack.c.bf16 %v563_v60, %v562_v58 }
  0xa8   : > { %v431_v1 = vpop.f32.mrf.mxu2  ;;  %v451_v2 = vpop.f32.mrf.mxu3 }
  0xa9   : > { %889 = vst [vmem:[%s1008_s6 + $0x40] sm:$0xff] %v845_v63   ;;  %v393_v3 = vpop.f32.mrf.mxu0  ;;  %v413_v4 = vpop.f32.mrf.mxu1  ;;  %v488_v11 = vmul.f32 %v986_v25, %v431_v1  ;;  %v496_v12 = vmul.f32 %v986_v25, %v451_v2 }
  0xaa   : > { %893 = vst [vmem:[%s1008_s6 + $0x60] sm:$0xff] %v865_v0   ;;  %v473_v7 = vmul.f32 %v986_v25, %v393_v3  ;;  %v481_v8 = vmul.f32 %v986_v25, %v413_v4 }
  0xab   : > { %v524_v21 = vadd.f32 %v992_v27, %v488_v11  ;;  %v532_v22 = vadd.f32 %v992_v27, %v496_v12 }
  0xac   : > { %v509_v9 = vadd.f32 %v992_v27, %v473_v7  ;;  %v517_v10 = vadd.f32 %v992_v27, %v481_v8 }
  0xad   : > { %v556_v31 = vmax.f32 %v524_v21, 0.0  ;;  %v564_v32 = vmax.f32 %v532_v22, 0.0 }
  0xae   : > { %v541_v15 = vmax.f32 %v509_v9, 0.0  ;;  %v549_v16 = vmax.f32 %v517_v10, 0.0 }
  0xb0   : > { %v810_v17 = vpack.c.bf16 %v541_v15, %v540_v13  ;;  %v830_v18 = vpack.c.bf16 %v549_v16, %v548_v14  ;;  %v433_v19 = vpop.f32.mrf.mxu2  ;;  %v453_v20 = vpop.f32.mrf.mxu3 }
  0xb1   : > { %v489_v23 = vmul.f32 %v986_v25, %v433_v19  ;;  %v497_v24 = vmul.f32 %v986_v25, %v453_v20  ;;  %v396_v26 = vpop.f32.mrf.mxu0  ;;  %v416_v28 = vpop.f32.mrf.mxu1 }
  0xb2   : > { %882 = vst [vmem:[%s1008_s6 + $0x8] sm:$0xff] %v810_v17   ;;  %v474_v35 = vmul.f32 %v986_v25, %v396_v26  ;;  %v482_v36 = vmul.f32 %v986_v25, %v416_v28 }
  0xb3   : > { %886 = vst [vmem:[%s1008_s6 + $0x28] sm:$0xff] %v830_v18   ;;  %v525_v29 = vadd.f32 %v992_v27, %v489_v23  ;;  %v533_v30 = vadd.f32 %v992_v27, %v497_v24 }
  0xb4   : > { %v510_v43 = vadd.f32 %v992_v27, %v474_v35  ;;  %v518_v44 = vadd.f32 %v992_v27, %v482_v36 }
  0xb5   : > { %v557_v33 = vmax.f32 %v525_v29, 0.0  ;;  %v565_v34 = vmax.f32 %v533_v30, 0.0 }
  0xb6   : > { %v542_v51 = vmax.f32 %v510_v43, 0.0  ;;  %v550_v52 = vmax.f32 %v518_v44, 0.0 }
  0xb7   : > { %v850_v37 = vpack.c.bf16 %v557_v33, %v556_v31  ;;  %v870_v38 = vpack.c.bf16 %v565_v34, %v564_v32 }
  0xb8   : > { %v436_v39 = vpop.f32.mrf.mxu2  ;;  %v456_v40 = vpop.f32.mrf.mxu3 }
  0xb9   : > { %890 = vst [vmem:[%s1008_s6 + $0x48] sm:$0xff] %v850_v37   ;;  %v398_v41 = vpop.f32.mrf.mxu0  ;;  %v418_v42 = vpop.f32.mrf.mxu1  ;;  %v490_v49 = vmul.f32 %v986_v25, %v436_v39  ;;  %v498_v50 = vmul.f32 %v986_v25, %v456_v40 }
  0xba   : > { %894 = vst [vmem:[%s1008_s6 + $0x68] sm:$0xff] %v870_v38   ;;  %v475_v45 = vmul.f32 %v986_v25, %v398_v41  ;;  %v483_v46 = vmul.f32 %v986_v25, %v418_v42 }
  0xbb   : > { %v526_v59 = vadd.f32 %v992_v27, %v490_v49  ;;  %v534_v60 = vadd.f32 %v992_v27, %v498_v50 }
  0xbc   : > { %v511_v47 = vadd.f32 %v992_v27, %v475_v45  ;;  %v519_v48 = vadd.f32 %v992_v27, %v483_v46 }
  0xbd   : > { %v558_v3 = vmax.f32 %v526_v59, 0.0  ;;  %v566_v4 = vmax.f32 %v534_v60, 0.0 }
  0xbe   : > { %v543_v53 = vmax.f32 %v511_v47, 0.0  ;;  %v551_v54 = vmax.f32 %v519_v48, 0.0 }
  0xc0   : > { %v815_v55 = vpack.c.bf16 %v543_v53, %v542_v51  ;;  %v835_v56 = vpack.c.bf16 %v551_v54, %v550_v52  ;;  %v438_v57 = vpop.f32.mrf.mxu2  ;;  %v458_v58 = vpop.f32.mrf.mxu3 }
  0xc1   : > { %v491_v61 = vmul.f32 %v986_v25, %v438_v57  ;;  %v499_v62 = vmul.f32 %v986_v25, %v458_v58  ;;  %v401_v63 = vpop.f32.mrf.mxu0  ;;  %v421_v0 = vpop.f32.mrf.mxu1 }
  0xc2   : > { %883 = vst [vmem:[%s1008_s6 + $0x10] sm:$0xff] %v815_v55   ;;  %v476_v7 = vmul.f32 %v986_v25, %v401_v63  ;;  %v484_v8 = vmul.f32 %v986_v25, %v421_v0 }
  0xc3   : > { %887 = vst [vmem:[%s1008_s6 + $0x30] sm:$0xff] %v835_v56   ;;  %v527_v1 = vadd.f32 %v992_v27, %v491_v61  ;;  %v535_v2 = vadd.f32 %v992_v27, %v499_v62 }
  0xc4   : > { %v512_v15 = vadd.f32 %v992_v27, %v476_v7  ;;  %v520_v16 = vadd.f32 %v992_v27, %v484_v8 }
  0xc5   : > { %v559_v5 = vmax.f32 %v527_v1, 0.0  ;;  %v567_v6 = vmax.f32 %v535_v2, 0.0 }
  0xc6   : > { %v544_v23 = vmax.f32 %v512_v15, 0.0  ;;  %v552_v24 = vmax.f32 %v520_v16, 0.0 }
  0xc7   : > { %v855_v9 = vpack.c.bf16 %v559_v5, %v558_v3  ;;  %v875_v10 = vpack.c.bf16 %v567_v6, %v566_v4 }
  0xc8   : > { %v441_v11 = vpop.f32.mrf.mxu2  ;;  %v461_v12 = vpop.f32.mrf.mxu3 }
  0xc9   : > { %891 = vst [vmem:[%s1008_s6 + $0x50] sm:$0xff] %v855_v9   ;;  %v403_v13 = vpop.f32.mrf.mxu0  ;;  %v423_v14 = vpop.f32.mrf.mxu1  ;;  %v492_v21 = vmul.f32 %v986_v25, %v441_v11  ;;  %v500_v22 = vmul.f32 %v986_v25, %v461_v12 }
  0xca   : > { %895 = vst [vmem:[%s1008_s6 + $0x70] sm:$0xff] %v875_v10   ;;  %v477_v17 = vmul.f32 %v986_v25, %v403_v13  ;;  %v485_v18 = vmul.f32 %v986_v25, %v423_v14 }
  0xcb   : > { %v528_v33 = vadd.f32 %v992_v27, %v492_v21  ;;  %v536_v34 = vadd.f32 %v992_v27, %v500_v22 }
  0xcc   : > { %v513_v19 = vadd.f32 %v992_v27, %v477_v17  ;;  %v521_v20 = vadd.f32 %v992_v27, %v485_v18 }
  0xcd   : > { %v560_v39 = vmax.f32 %v528_v33, 0.0  ;;  %v568_v40 = vmax.f32 %v536_v34, 0.0 }
  0xce   : > { %v545_v26 = vmax.f32 %v513_v19, 0.0  ;;  %v553_v28 = vmax.f32 %v521_v20, 0.0 }
  0xd0   : > { %v820_v29 = vpack.c.bf16 %v545_v26, %v544_v23  ;;  %v840_v30 = vpack.c.bf16 %v553_v28, %v552_v24  ;;  %v443_v31 = vpop.f32.mrf.mxu2  ;;  %v463_v32 = vpop.f32.mrf.mxu3 }
  0xd1   : > { %v493_v35 = vmul.f32 %v986_v25, %v443_v31  ;;  %v501_v36 = vmul.f32 %v986_v25, %v463_v32 }
  0xd2   : > { %884 = vst [vmem:[%s1008_s6 + $0x18] sm:$0xff] %v820_v29  }
  0xd3   : > { %888 = vst [vmem:[%s1008_s6 + $0x38] sm:$0xff] %v840_v30   ;;  %v529_v37 = vadd.f32 %v992_v27, %v493_v35  ;;  %v537_v38 = vadd.f32 %v992_v27, %v501_v36 }
  0xd5   : > { %v561_v41 = vmax.f32 %v529_v37, 0.0  ;;  %v569_v42 = vmax.f32 %v537_v38, 0.0 }
  0xd7   : > { %v860_v43 = vpack.c.bf16 %v561_v41, %v560_v39  ;;  %v880_v44 = vpack.c.bf16 %v569_v42, %v568_v40 }
  0xd9   : > { %892 = vst [vmem:[%s1008_s6 + $0x58] sm:$0xff] %v860_v43  }
  0xda   : > { %896 = vst [vmem:[%s1008_s6 + $0x78] sm:$0xff] %v880_v44  }
  0xdb PF: > { %s14_s15 = sadd.s32 1, %s917_s15  }
  0xdc   : > { %p11_p4 = scmp.ge.s32.totalorder %s14_s15, 4  }
  0xde   :  { %13 = sbr.rel (!%p11_p4) target bundleno = 1 (0x1), region = 66 }

// kernel: _lambda_.12
= control target key start
LH: loop header
LB: loop body
LE: loop exit
PB: predicated region body
PF: predicated region fallthrough
CT: control target
= control target key end

     0   :  { %s578_s1 = inlined_call_operand.vmem [shape: bf16[128,128], index: 1, kind: input, shape index: {}]   ;;  %s579_s2 = inlined_call_operand.vmem [shape: f32[1,128], index: 2, kind: input, shape index: {}]   ;;  %s580_s3 = inlined_call_operand.vmem [shape: f32[1,128], index: 3, kind: input, shape index: {}]   ;;  %s581_s0 = inlined_call_operand.vmem [shape: bf16[128,128], index: 0, kind: input, shape index: {}]   ;;  %s582_s4 = inlined_call_operand.vmem [shape: bf16[128,128], index: 4, kind: output, shape index: {}]  }
   0x1   :  { %v365_v0 = vld [vmem:[%s578_s1 + $0x38] sm:$0xff]  ;;  %v364_v1 = vld [vmem:[%s578_s1 + $0x30] sm:$0xff]  ;;  %v363_v2 = vld [vmem:[%s578_s1 + $0x28] sm:$0xff] }
   0x2   :  { %145 = vmatpush.bf16.msra.mxu0 %v365_v0  ;;  %413 = vmatpush.bf16.msra.mxu1 %v365_v0  ;;  %v362_v3 = vld [vmem:[%s578_s1 + $0x20] sm:$0xff]  ;;  %v361_v4 = vld [vmem:[%s578_s1 + $0x18] sm:$0xff]  ;;  %v360_v5 = vld [vmem:[%s578_s1 + $0x10] sm:$0xff] }
   0x3   :  { %414 = vmatpush.bf16.msra.mxu2 %v365_v0  ;;  %415 = vmatpush.bf16.msra.mxu3 %v365_v0  ;;  %v359_v6 = vld [vmem:[%s578_s1 + $0x8] sm:$0xff]  ;;  %v358_v7 = vld [vmem:[%s578_s1] sm:$0xff]  ;;  %v352_v9 = vld [vmem:[%s581_s0 + $0x10] sm:$0xff] }
   0x4   :  { %v350_v8 = vld [vmem:[%s581_s0] sm:$0xff]  ;;  %v356_v11 = vld [vmem:[%s581_s0 + $0x30] sm:$0xff]  ;;  %v351_v12 = vld [vmem:[%s581_s0 + $0x8] sm:$0xff] }
   0x5   :  { %v354_v10 = vld [vmem:[%s581_s0 + $0x20] sm:$0xff]  ;;  %v353_v13 = vld [vmem:[%s581_s0 + $0x18] sm:$0xff]  ;;  %v355_v14 = vld [vmem:[%s581_s0 + $0x28] sm:$0xff] }
   0x6   :  { %146 = vmatpush.bf16.msra.mxu0 %v364_v1  ;;  %416 = vmatpush.bf16.msra.mxu1 %v364_v1  ;;  %v357_v15 = vld [vmem:[%s581_s0 + $0x38] sm:$0xff]  ;;  %v515_v18 = vld [vmem:[%s579_s2] ss:$0 sm:$0xff] }
   0x7   :  { %417 = vmatpush.bf16.msra.mxu2 %v364_v1  ;;  %418 = vmatpush.bf16.msra.mxu3 %v364_v1  ;;  %v521_v20 = vld [vmem:[%s580_s3] ss:$0 sm:$0xff] }
   0xa   :  { %147 = vmatpush.bf16.msra.mxu0 %v363_v2  ;;  %419 = vmatpush.bf16.msra.mxu1 %v363_v2 }
   0xb   :  { %420 = vmatpush.bf16.msra.mxu2 %v363_v2  ;;  %421 = vmatpush.bf16.msra.mxu3 %v363_v2 }
   0xe   :  { %148 = vmatpush.bf16.msra.mxu0 %v362_v3  ;;  %422 = vmatpush.bf16.msra.mxu1 %v362_v3 }
   0xf   :  { %423 = vmatpush.bf16.msra.mxu2 %v362_v3  ;;  %424 = vmatpush.bf16.msra.mxu3 %v362_v3 }
  0x12   :  { %149 = vmatpush.bf16.msra.mxu0 %v361_v4  ;;  %425 = vmatpush.bf16.msra.mxu1 %v361_v4 }
  0x13   :  { %426 = vmatpush.bf16.msra.mxu2 %v361_v4  ;;  %427 = vmatpush.bf16.msra.mxu3 %v361_v4 }
  0x16   :  { %150 = vmatpush.bf16.msra.mxu0 %v360_v5  ;;  %428 = vmatpush.bf16.msra.mxu1 %v360_v5 }
  0x17   :  { %429 = vmatpush.bf16.msra.mxu2 %v360_v5  ;;  %430 = vmatpush.bf16.msra.mxu3 %v360_v5 }
  0x1a   :  { %151 = vmatpush.bf16.msra.mxu0 %v359_v6  ;;  %431 = vmatpush.bf16.msra.mxu1 %v359_v6 }
  0x1b   :  { %432 = vmatpush.bf16.msra.mxu2 %v359_v6  ;;  %433 = vmatpush.bf16.msra.mxu3 %v359_v6 }
  0x1e   :  { %152 = vmatpush.bf16.msra.mxu0 %v358_v7  ;;  %434 = vmatpush.bf16.msra.mxu1 %v358_v7 }
  0x1f   :  { %435 = vmatpush.bf16.msra.mxu2 %v358_v7  ;;  %436 = vmatpush.bf16.msra.mxu3 %v358_v7 }
  0x21   :  { %153 = vmatmul.bf16.vlgmr.msra.gmra.mxu0 %v350_v8  ;;  %163 = vmatmul.bf16.vlgmr.msra.gmra.mxu1 %v352_v9 }
  0x22   :  { %173 = vmatmul.bf16.vlgmr.msra.gmra.mxu2 %v354_v10  ;;  %183 = vmatmul.bf16.vlgmr.msra.gmra.mxu3 %v356_v11 }
  0x31   :  { %158 = vmatmul.bf16.gmra.mxu0 %v351_v12  ;;  %168 = vmatmul.bf16.gmra.mxu1 %v353_v13 }
  0x32   :  { %178 = vmatmul.bf16.gmra.mxu2 %v355_v14  ;;  %188 = vmatmul.bf16.gmra.mxu3 %v357_v15 }
  0x9e   :  { %v154_v16 = vpop.f32.mrf.mxu0  ;;  %v164_v17 = vpop.f32.mrf.mxu1 }
  0x9f   :  { %v198_v19 = vmul.f32 %v515_v18, %v154_v16  ;;  %v202_v21 = vmul.f32 %v515_v18, %v164_v17 }
  0xa1   :  { %v218_v26 = vadd.f32 %v521_v20, %v198_v19  ;;  %v222_v27 = vadd.f32 %v521_v20, %v202_v21 }
  0xa3   :  { %v234_v34 = vmax.f32 %v218_v26, 0.0  ;;  %v238_v35 = vmax.f32 %v222_v27, 0.0 }
  0xa5   :  { %v174_v22 = vpop.f32.mrf.mxu2  ;;  %v184_v23 = vpop.f32.mrf.mxu3 }
  0xa6   :  { %v156_v24 = vpop.f32.mrf.mxu0  ;;  %v166_v25 = vpop.f32.mrf.mxu1  ;;  %v206_v32 = vmul.f32 %v515_v18, %v174_v22  ;;  %v210_v33 = vmul.f32 %v515_v18, %v184_v23 }
  0xa7   :  { %v199_v28 = vmul.f32 %v515_v18, %v156_v24  ;;  %v203_v29 = vmul.f32 %v515_v18, %v166_v25 }
  0xa8   :  { %v226_v42 = vadd.f32 %v521_v20, %v206_v32  ;;  %v230_v43 = vadd.f32 %v521_v20, %v210_v33 }
  0xa9   :  { %v219_v30 = vadd.f32 %v521_v20, %v199_v28  ;;  %v223_v31 = vadd.f32 %v521_v20, %v203_v29 }
  0xaa   :  { %v242_v50 = vmax.f32 %v226_v42, 0.0  ;;  %v246_v51 = vmax.f32 %v230_v43, 0.0 }
  0xab   :  { %v235_v36 = vmax.f32 %v219_v30, 0.0  ;;  %v239_v37 = vmax.f32 %v223_v31, 0.0 }
  0xad   :  { %v369_v38 = vpack.c.bf16 %v235_v36, %v234_v34  ;;  %v379_v39 = vpack.c.bf16 %v239_v37, %v238_v35  ;;  %v176_v40 = vpop.f32.mrf.mxu2  ;;  %v186_v41 = vpop.f32.mrf.mxu3 }
  0xae   :  { %v207_v44 = vmul.f32 %v515_v18, %v176_v40  ;;  %v211_v45 = vmul.f32 %v515_v18, %v186_v41  ;;  %v159_v46 = vpop.f32.mrf.mxu0  ;;  %v169_v47 = vpop.f32.mrf.mxu1 }
  0xaf   :  { %370 = vst [vmem:[%s582_s4] sm:$0xff] %v369_v38   ;;  %v200_v54 = vmul.f32 %v515_v18, %v159_v46  ;;  %v204_v55 = vmul.f32 %v515_v18, %v169_v47 }
  0xb0   :  { %407 = vst [vmem:[%s582_s4 + $0x10] sm:$0xff] %v379_v39   ;;  %v227_v48 = vadd.f32 %v521_v20, %v207_v44  ;;  %v231_v49 = vadd.f32 %v521_v20, %v211_v45 }
  0xb1   :  { %v220_v62 = vadd.f32 %v521_v20, %v200_v54  ;;  %v224_v63 = vadd.f32 %v521_v20, %v204_v55 }
  0xb2   :  { %v243_v52 = vmax.f32 %v227_v48, 0.0  ;;  %v247_v53 = vmax.f32 %v231_v49, 0.0 }
  0xb3   :  { %v236_v6 = vmax.f32 %v220_v62, 0.0  ;;  %v240_v7 = vmax.f32 %v224_v63, 0.0 }
  0xb4   :  { %v389_v56 = vpack.c.bf16 %v243_v52, %v242_v50  ;;  %v399_v57 = vpack.c.bf16 %v247_v53, %v246_v51 }
  0xb5   :  { %v179_v58 = vpop.f32.mrf.mxu2  ;;  %v189_v59 = vpop.f32.mrf.mxu3 }
  0xb6   :  { %409 = vst [vmem:[%s582_s4 + $0x20] sm:$0xff] %v389_v56   ;;  %v161_v60 = vpop.f32.mrf.mxu0  ;;  %v171_v61 = vpop.f32.mrf.mxu1  ;;  %v208_v4 = vmul.f32 %v515_v18, %v179_v58  ;;  %v212_v5 = vmul.f32 %v515_v18, %v189_v59 }
  0xb7   :  { %411 = vst [vmem:[%s582_s4 + $0x30] sm:$0xff] %v399_v57   ;;  %v201_v0 = vmul.f32 %v515_v18, %v161_v60  ;;  %v205_v1 = vmul.f32 %v515_v18, %v171_v61 }
  0xb8   :  { %v228_v14 = vadd.f32 %v521_v20, %v208_v4  ;;  %v232_v15 = vadd.f32 %v521_v20, %v212_v5 }
  0xb9   :  { %v221_v2 = vadd.f32 %v521_v20, %v201_v0  ;;  %v225_v3 = vadd.f32 %v521_v20, %v205_v1 }
  0xba   :  { %v244_v22 = vmax.f32 %v228_v14, 0.0  ;;  %v248_v23 = vmax.f32 %v232_v15, 0.0 }
  0xbb   :  { %v237_v8 = vmax.f32 %v221_v2, 0.0  ;;  %v241_v9 = vmax.f32 %v225_v3, 0.0 }
  0xbd   :  { %v374_v10 = vpack.c.bf16 %v237_v8, %v236_v6  ;;  %v384_v11 = vpack.c.bf16 %v241_v9, %v240_v7  ;;  %v181_v12 = vpop.f32.mrf.mxu2  ;;  %v191_v13 = vpop.f32.mrf.mxu3 }
  0xbe   :  { %v209_v16 = vmul.f32 %v515_v18, %v181_v12  ;;  %v213_v17 = vmul.f32 %v515_v18, %v191_v13 }
  0xbf   :  { %406 = vst [vmem:[%s582_s4 + $0x8] sm:$0xff] %v374_v10  }
  0xc0   :  { %408 = vst [vmem:[%s582_s4 + $0x18] sm:$0xff] %v384_v11   ;;  %v229_v19 = vadd.f32 %v521_v20, %v209_v16  ;;  %v233_v21 = vadd.f32 %v521_v20, %v213_v17 }
  0xc2   :  { %v245_v24 = vmax.f32 %v229_v19, 0.0  ;;  %v249_v25 = vmax.f32 %v233_v21, 0.0 }
  0xc4   :  { %v394_v26 = vpack.c.bf16 %v245_v24, %v244_v22  ;;  %v404_v27 = vpack.c.bf16 %v249_v25, %v248_v23 }
  0xc6   :  { %410 = vst [vmem:[%s582_s4 + $0x28] sm:$0xff] %v394_v26  }
  0xc7   :  { %412 = vst [vmem:[%s582_s4 + $0x38] sm:$0xff] %v404_v27  }

// kernel: _lambda_.14
= control target key start
LH: loop header
LB: loop body
LE: loop exit
PB: predicated region body
PF: predicated region fallthrough
CT: control target
= control target key end

     0   :  { %s697_s1 = inlined_call_operand.vmem [shape: bf16[128,128], index: 1, kind: input, shape index: {}]   ;;  %s698_s2 = inlined_call_operand.vmem [shape: f32[1,128], index: 2, kind: input, shape index: {}]   ;;  %s699_s3 = inlined_call_operand.vmem [shape: f32[1,128], index: 3, kind: input, shape index: {}]   ;;  %s700_s0 = inlined_call_operand.vmem [shape: bf16[128,128], index: 0, kind: input, shape index: {}]   ;;  %s701_s4 = inlined_call_operand.vmem [shape: bf16[128,128], index: 4, kind: input, shape index: {}]   ;;  %s702_s5 = inlined_call_operand.vmem [shape: bf16[128,128], index: 5, kind: output, shape index: {}]  }
   0x1   :  { %v416_v0 = vld [vmem:[%s697_s1 + $0x38] sm:$0xff]  ;;  %v415_v1 = vld [vmem:[%s697_s1 + $0x30] sm:$0xff]  ;;  %v414_v2 = vld [vmem:[%s697_s1 + $0x28] sm:$0xff] }
   0x2   :  { %148 = vmatpush.bf16.msra.mxu0 %v416_v0  ;;  %503 = vmatpush.bf16.msra.mxu1 %v416_v0  ;;  %v413_v3 = vld [vmem:[%s697_s1 + $0x20] sm:$0xff]  ;;  %v412_v4 = vld [vmem:[%s697_s1 + $0x18] sm:$0xff]  ;;  %v411_v5 = vld [vmem:[%s697_s1 + $0x10] sm:$0xff] }
   0x3   :  { %504 = vmatpush.bf16.msra.mxu2 %v416_v0  ;;  %505 = vmatpush.bf16.msra.mxu3 %v416_v0  ;;  %v410_v6 = vld [vmem:[%s697_s1 + $0x8] sm:$0xff]  ;;  %v409_v7 = vld [vmem:[%s697_s1] sm:$0xff]  ;;  %v403_v9 = vld [vmem:[%s700_s0 + $0x10] sm:$0xff] }
   0x4   :  { %v401_v8 = vld [vmem:[%s700_s0] sm:$0xff]  ;;  %v407_v11 = vld [vmem:[%s700_s0 + $0x30] sm:$0xff]  ;;  %v402_v12 = vld [vmem:[%s700_s0 + $0x8] sm:$0xff] }
   0x5   :  { %v405_v10 = vld [vmem:[%s700_s0 + $0x20] sm:$0xff]  ;;  %v404_v13 = vld [vmem:[%s700_s0 + $0x18] sm:$0xff]  ;;  %v406_v14 = vld [vmem:[%s700_s0 + $0x28] sm:$0xff] }
   0x6   :  { %149 = vmatpush.bf16.msra.mxu0 %v415_v1  ;;  %506 = vmatpush.bf16.msra.mxu1 %v415_v1  ;;  %v408_v15 = vld [vmem:[%s700_s0 + $0x38] sm:$0xff]  ;;  %v610_v16 = vld [vmem:[%s698_s2] ss:$0 sm:$0xff]  ;;  %v490_v23 = vld [vmem:[%s701_s4 + $0x10] sm:$0xff]  }
   0x7   :  { %507 = vmatpush.bf16.msra.mxu2 %v415_v1  ;;  %508 = vmatpush.bf16.msra.mxu3 %v415_v1  ;;  %v616_v20 = vld [vmem:[%s699_s3] ss:$0 sm:$0xff]  ;;  %v427_v27 = vunpack.c.l.bf16 %v490_v23  ;;  %v428_v35 = vunpack.c.h.bf16 %v490_v23  ;;  %v494_v41 = vld [vmem:[%s701_s4 + $0x30] sm:$0xff]  }
   0x8   :  { %v418_v22 = vld [vmem:[%s701_s4] sm:$0xff]   ;;  %v443_v49 = vunpack.c.l.bf16 %v494_v41  ;;  %v444_v59 = vunpack.c.h.bf16 %v494_v41 }
   0x9   :  { %v419_v25 = vunpack.c.l.bf16 %v418_v22  ;;  %v420_v33 = vunpack.c.h.bf16 %v418_v22  ;;  %v492_v40 = vld [vmem:[%s701_s4 + $0x20] sm:$0xff]  }
   0xa   :  { %150 = vmatpush.bf16.msra.mxu0 %v414_v2  ;;  %509 = vmatpush.bf16.msra.mxu1 %v414_v2  ;;  %v435_v47 = vunpack.c.l.bf16 %v492_v40  ;;  %v436_v57 = vunpack.c.h.bf16 %v492_v40 }
   0xb   :  { %510 = vmatpush.bf16.msra.mxu2 %v414_v2  ;;  %511 = vmatpush.bf16.msra.mxu3 %v414_v2 }
   0xe   :  { %151 = vmatpush.bf16.msra.mxu0 %v413_v3  ;;  %512 = vmatpush.bf16.msra.mxu1 %v413_v3 }
   0xf   :  { %513 = vmatpush.bf16.msra.mxu2 %v413_v3  ;;  %514 = vmatpush.bf16.msra.mxu3 %v413_v3 }
  0x12   :  { %152 = vmatpush.bf16.msra.mxu0 %v412_v4  ;;  %515 = vmatpush.bf16.msra.mxu1 %v412_v4 }
  0x13   :  { %516 = vmatpush.bf16.msra.mxu2 %v412_v4  ;;  %517 = vmatpush.bf16.msra.mxu3 %v412_v4 }
  0x16   :  { %153 = vmatpush.bf16.msra.mxu0 %v411_v5  ;;  %518 = vmatpush.bf16.msra.mxu1 %v411_v5 }
  0x17   :  { %519 = vmatpush.bf16.msra.mxu2 %v411_v5  ;;  %520 = vmatpush.bf16.msra.mxu3 %v411_v5 }
  0x1a   :  { %154 = vmatpush.bf16.msra.mxu0 %v410_v6  ;;  %521 = vmatpush.bf16.msra.mxu1 %v410_v6 }
  0x1b   :  { %522 = vmatpush.bf16.msra.mxu2 %v410_v6  ;;  %523 = vmatpush.bf16.msra.mxu3 %v410_v6 }
  0x1e   :  { %155 = vmatpush.bf16.msra.mxu0 %v409_v7  ;;  %524 = vmatpush.bf16.msra.mxu1 %v409_v7 }
  0x1f   :  { %525 = vmatpush.bf16.msra.mxu2 %v409_v7  ;;  %526 = vmatpush.bf16.msra.mxu3 %v409_v7 }
  0x21   :  { %156 = vmatmul.bf16.vlgmr.msra.gmra.mxu0 %v401_v8  ;;  %166 = vmatmul.bf16.vlgmr.msra.gmra.mxu1 %v403_v9  ;;  %v489_v8 = vld [vmem:[%s701_s4 + $0x8] sm:$0xff]   ;;  %v491_v9 = vld [vmem:[%s701_s4 + $0x18] sm:$0xff]  }
  0x22   :  { %176 = vmatmul.bf16.vlgmr.msra.gmra.mxu2 %v405_v10  ;;  %186 = vmatmul.bf16.vlgmr.msra.gmra.mxu3 %v407_v11 }
  0x31   :  { %161 = vmatmul.bf16.gmra.mxu0 %v402_v12  ;;  %171 = vmatmul.bf16.gmra.mxu1 %v404_v13 }
  0x32   :  { %181 = vmatmul.bf16.gmra.mxu2 %v406_v14  ;;  %191 = vmatmul.bf16.gmra.mxu3 %v408_v15  ;;  %v423_v15 = vunpack.c.l.bf16 %v489_v8 }
  0x9e   :  { %v157_v17 = vpop.f32.mrf.mxu0  ;;  %v167_v18 = vpop.f32.mrf.mxu1 }
  0x9f   :  { %v201_v19 = vmul.f32 %v610_v16, %v157_v17  ;;  %v205_v21 = vmul.f32 %v610_v16, %v167_v18  ;;  %v431_v18 = vunpack.c.l.bf16 %v491_v9 }
  0xa1   :  { %v221_v24 = vadd.f32 %v616_v20, %v201_v19  ;;  %v225_v26 = vadd.f32 %v616_v20, %v205_v21 }
  0xa3   :  { %v269_v38 = vadd.f32 %v419_v25, %v221_v24  ;;  %v273_v39 = vadd.f32 %v427_v27, %v225_v26  ;;  %v424_v27 = vunpack.c.h.bf16 %v489_v8 }
  0xa5   :  { %v177_v28 = vpop.f32.mrf.mxu2  ;;  %v187_v29 = vpop.f32.mrf.mxu3  ;;  %v285_v50 = vmax.f32 %v269_v38, 0.0  ;;  %v289_v51 = vmax.f32 %v273_v39, 0.0 }
  0xa6   :  { %v159_v30 = vpop.f32.mrf.mxu0  ;;  %v169_v31 = vpop.f32.mrf.mxu1  ;;  %v209_v36 = vmul.f32 %v610_v16, %v177_v28  ;;  %v213_v37 = vmul.f32 %v610_v16, %v187_v29  ;;  %v432_v29 = vunpack.c.h.bf16 %v491_v9 }
  0xa7   :  { %v202_v32 = vmul.f32 %v610_v16, %v159_v30  ;;  %v206_v34 = vmul.f32 %v610_v16, %v169_v31 }
  0xa8   :  { %v229_v46 = vadd.f32 %v616_v20, %v209_v36  ;;  %v233_v48 = vadd.f32 %v616_v20, %v213_v37 }
  0xa9   :  { %v222_v42 = vadd.f32 %v616_v20, %v202_v32  ;;  %v226_v43 = vadd.f32 %v616_v20, %v206_v34  ;;  %v493_v34 = vld [vmem:[%s701_s4 + $0x28] sm:$0xff]  }
  0xaa   :  { %v277_v0 = vadd.f32 %v435_v47, %v229_v46  ;;  %v281_v1 = vadd.f32 %v443_v49, %v233_v48  ;;  %v439_v41 = vunpack.c.l.bf16 %v493_v34 }
  0xab   :  { %v270_v44 = vadd.f32 %v420_v33, %v222_v42  ;;  %v274_v45 = vadd.f32 %v428_v35, %v226_v43  ;;  %v495_v35 = vld [vmem:[%s701_s4 + $0x38] sm:$0xff]  }
  0xac   :  { %v293_v10 = vmax.f32 %v277_v0, 0.0  ;;  %v297_v11 = vmax.f32 %v281_v1, 0.0  ;;  %v447_v43 = vunpack.c.l.bf16 %v495_v35 }
  0xad   :  { %v286_v52 = vmax.f32 %v270_v44, 0.0  ;;  %v290_v53 = vmax.f32 %v274_v45, 0.0  ;;  %v179_v54 = vpop.f32.mrf.mxu2  ;;  %v189_v55 = vpop.f32.mrf.mxu3 }
  0xae   :  { %v210_v56 = vmul.f32 %v610_v16, %v179_v54  ;;  %v214_v58 = vmul.f32 %v610_v16, %v189_v55  ;;  %v162_v60 = vpop.f32.mrf.mxu0  ;;  %v172_v61 = vpop.f32.mrf.mxu1 }
  0xaf   :  { %v452_v62 = vpack.c.bf16 %v286_v52, %v285_v50  ;;  %v462_v63 = vpack.c.bf16 %v290_v53, %v289_v51  ;;  %v203_v4 = vmul.f32 %v610_v16, %v162_v60  ;;  %v207_v5 = vmul.f32 %v610_v16, %v172_v61 }
  0xb0   :  { %v230_v2 = vadd.f32 %v616_v20, %v210_v56  ;;  %v234_v3 = vadd.f32 %v616_v20, %v214_v58  ;;  %v440_v51 = vunpack.c.h.bf16 %v493_v34  ;;  %v448_v53 = vunpack.c.h.bf16 %v495_v35 }
  0xb1   :  { %453 = vst [vmem:[%s702_s5] sm:$0xff] %v452_v62   ;;  %v223_v14 = vadd.f32 %v616_v20, %v203_v4  ;;  %v227_v17 = vadd.f32 %v616_v20, %v207_v5 }
  0xb2   :  { %497 = vst [vmem:[%s702_s5 + $0x10] sm:$0xff] %v462_v63   ;;  %v278_v6 = vadd.f32 %v436_v57, %v230_v2  ;;  %v282_v7 = vadd.f32 %v444_v59, %v234_v3 }
  0xb3   :  { %v271_v32 = vadd.f32 %v423_v15, %v223_v14  ;;  %v275_v33 = vadd.f32 %v431_v18, %v227_v17 }
  0xb4   :  { %v294_v12 = vmax.f32 %v278_v6, 0.0  ;;  %v298_v13 = vmax.f32 %v282_v7, 0.0 }
  0xb5   :  { %v182_v19 = vpop.f32.mrf.mxu2  ;;  %v192_v21 = vpop.f32.mrf.mxu3  ;;  %v287_v44 = vmax.f32 %v271_v32, 0.0  ;;  %v291_v45 = vmax.f32 %v275_v33, 0.0 }
  0xb6   :  { %v472_v22 = vpack.c.bf16 %v294_v12, %v293_v10  ;;  %v482_v23 = vpack.c.bf16 %v298_v13, %v297_v11  ;;  %v164_v24 = vpop.f32.mrf.mxu0  ;;  %v174_v25 = vpop.f32.mrf.mxu1  ;;  %v211_v30 = vmul.f32 %v610_v16, %v182_v19  ;;  %v215_v31 = vmul.f32 %v610_v16, %v192_v21 }
  0xb7   :  { %v204_v26 = vmul.f32 %v610_v16, %v164_v24  ;;  %v208_v28 = vmul.f32 %v610_v16, %v174_v25 }
  0xb8   :  { %499 = vst [vmem:[%s702_s5 + $0x20] sm:$0xff] %v472_v22   ;;  %v231_v40 = vadd.f32 %v616_v20, %v211_v30  ;;  %v235_v42 = vadd.f32 %v616_v20, %v215_v31 }
  0xb9   :  { %501 = vst [vmem:[%s702_s5 + $0x30] sm:$0xff] %v482_v23   ;;  %v224_v36 = vadd.f32 %v616_v20, %v204_v26  ;;  %v228_v37 = vadd.f32 %v616_v20, %v208_v28 }
  0xba   :  { %v279_v56 = vadd.f32 %v439_v41, %v231_v40  ;;  %v283_v57 = vadd.f32 %v447_v43, %v235_v42 }
  0xbb   :  { %v272_v38 = vadd.f32 %v424_v27, %v224_v36  ;;  %v276_v39 = vadd.f32 %v432_v29, %v228_v37 }
  0xbc   :  { %v299_v62 = vmax.f32 %v283_v57, 0.0 }
  0xbd   :  { %v288_v46 = vmax.f32 %v272_v38, 0.0  ;;  %v292_v47 = vmax.f32 %v276_v39, 0.0  ;;  %v184_v48 = vpop.f32.mrf.mxu2  ;;  %v194_v49 = vpop.f32.mrf.mxu3 }
  0xbe   :  { %v212_v50 = vmul.f32 %v610_v16, %v184_v48  ;;  %v216_v52 = vmul.f32 %v610_v16, %v194_v49  ;;  %v295_v16 = vmax.f32 %v279_v56, 0.0 }
  0xbf   :  { %v457_v54 = vpack.c.bf16 %v288_v46, %v287_v44  ;;  %v467_v55 = vpack.c.bf16 %v292_v47, %v291_v45 }
  0xc0   :  { %v232_v58 = vadd.f32 %v616_v20, %v212_v50  ;;  %v236_v59 = vadd.f32 %v616_v20, %v216_v52 }
  0xc1   :  { %496 = vst [vmem:[%s702_s5 + $0x8] sm:$0xff] %v457_v54  }
  0xc2   :  { %498 = vst [vmem:[%s702_s5 + $0x18] sm:$0xff] %v467_v55   ;;  %v280_v60 = vadd.f32 %v440_v51, %v232_v58  ;;  %v284_v61 = vadd.f32 %v448_v53, %v236_v59 }
  0xc4   :  { %v296_v63 = vmax.f32 %v280_v60, 0.0  ;;  %v300_v0 = vmax.f32 %v284_v61, 0.0 }
  0xc6   :  { %v477_v1 = vpack.c.bf16 %v296_v63, %v295_v16  ;;  %v487_v2 = vpack.c.bf16 %v300_v0, %v299_v62 }
  0xc8   :  { %500 = vst [vmem:[%s702_s5 + $0x28] sm:$0xff] %v477_v1  }
  0xc9   :  { %502 = vst [vmem:[%s702_s5 + $0x38] sm:$0xff] %v487_v2  }

// kernel: _lambda_.13
= control target key start
LH: loop header
LB: loop body
LE: loop exit
PB: predicated region body
PF: predicated region fallthrough
CT: control target
= control target key end

     0   :  { %s1108_s15 = smov 0   ;;  %s1587_s0 = inlined_call_operand.vmem [shape: bf16[2,10,10,128], index: 0, kind: input, shape index: {}]   ;;  %s1588_s1 = inlined_call_operand.vmem [shape: f32[9,1,1,128], index: 1, kind: input, shape index: {}]   ;;  %s1589_s2 = inlined_call_operand.vmem [shape: f32[1,1,128], index: 2, kind: input, shape index: {}]   ;;  %s1590_s3 = inlined_call_operand.vmem [shape: f32[1,1,128], index: 3, kind: input, shape index: {}]   ;;  %s1591_s4 = inlined_call_operand.vmem [shape: bf16[2,8,8,128], index: 4, kind: output, shape index: {}]  }
   0x1 LB: > { %s965_s16 = sadd.s32 4294967295, %s1081_s15   ;;  %p969_p0 = scmp.ge.s32.totalorder %s1081_s15, 1  ;;  %s1081_s15 = sphi %s1108_s15, %s14_s15  }
   0x2   : > { %p162_p1 = scmp.lt.s32.totalorder %s1081_s15, 3 }
   0x4   : > { %p163_p2 = pnand %p969_p0, %p162_p1 }
   0x5   : > { %p188_p3 = scmp.lt.s32.totalorder (!%p163_p2), %s965_s16, 1 }
   0x6   : > { %166 = sbr.rel (%p163_p2) target bundleno = 128 (0x80), region = 36 }
   0xb   : > { %s1593_s16 = smov (!%p188_p3, %s965_s16), 1  ;;  %v1064_v0 = vld [vmem:[%s1588_s1] ss:$0 sm:$0xff]  ;;  %v1065_v9 = vld [vmem:[%s1588_s1 + $0x1] ss:$0 sm:$0xff]  ;;  %vm279_vm0 = vcmask 1046528  }
   0xc   : > { %s1055_s17 = smul.u32 80, %s1593_s16  ;;  %vm373_vm1 = vcmask 1045504   ;;  %s1031_s19 = sshll.u32 %s1593_s16, 5 }
   0xd   : > { %s197_s22 = scalar_lea.vmem %s1591_s4, %s1031_s19 }
   0xe   : > { %s1122_s20 = scalar_lea.vmem %s1587_s0, %s1055_s17 }
   0xf   : > { %v198_v1 = vld [vmem:[%s1122_s20] sm:$0xf]  ;;  %v199_v2 = vld [vmem:[%s1122_s20 + $0x8] sm:$0xf]  ;;  %v200_v3 = vld [vmem:[%s1122_s20 + $0x10] sm:$0xf] }
  0x10   : > { %v201_v4 = vld [vmem:[%s1122_s20 + $0x18] sm:$0xf]  ;;  %v202_v5 = vld [vmem:[%s1122_s20 + $0x20] sm:$0xf]  ;;  %v203_v6 = vld [vmem:[%s1122_s20 + $0x28] sm:$0xf]  ;;  %v206_v7 = vunpack.c.l.bf16 %v198_v1  ;;  %v207_v8 = vunpack.c.l.bf16 %v199_v2  ;;  %v208_v12 = vunpack.c.l.bf16 %v200_v3 }
  0x11   : > { %v204_v10 = vld [vmem:[%s1122_s20 + $0x30] sm:$0xf]  ;;  %v205_v11 = vld [vmem:[%s1122_s20 + $0x38] sm:$0xf]  ;;  %v209_v13 = vunpack.c.l.bf16 %v201_v4  ;;  %v210_v14 = vunpack.c.l.bf16 %v202_v5  ;;  %v211_v15 = vunpack.c.l.bf16 %v203_v6  ;;  %v1139_v16 = vld [vmem:[%s1122_s20 + $0x4] sm:$0x1] }
  0x12   : > { %v212_v17 = vunpack.c.l.bf16 %v204_v10  ;;  %v213_v18 = vunpack.c.l.bf16 %v205_v11  ;;  %v218_v19 = vmul.f32 %v1064_v0, %v206_v7  ;;  %v1141_v20 = vmul.f32 %v1064_v0, %v207_v8  ;;  %v1144_v21 = vld [vmem:[%s1122_s20 + $0xc] sm:$0x1]  ;;  %v1147_v22 = vld [vmem:[%s1122_s20 + $0x14] sm:$0x1]  ;;  %v1150_v23 = vld [vmem:[%s1122_s20 + $0x1c] sm:$0x1] }
  0x13   : > { %v1152_v24 = vmul.f32 %v1064_v0, %v208_v12  ;;  %v1154_v25 = vmul.f32 %v1064_v0, %v209_v13  ;;  %v1156_v26 = vmul.f32 %v1064_v0, %v210_v14  ;;  %v1158_v27 = vmul.f32 %v1064_v0, %v211_v15  ;;  %v1161_v28 = vld [vmem:[%s1122_s20 + $0x24] sm:$0x1]  ;;  %v1164_v29 = vld [vmem:[%s1122_s20 + $0x2c] sm:$0x1]  ;;  %v1167_v30 = vld [vmem:[%s1122_s20 + $0x34] sm:$0x1] }
  0x14   : > { %v1169_v31 = vmul.f32 %v1064_v0, %v212_v17  ;;  %v1171_v32 = vmul.f32 %v1064_v0, %v213_v18  ;;  %v1174_v33 = vld [vmem:[%s1122_s20 + $0x3c] sm:$0x1]  ;;  %v234_v34 = vunpack.c.l.bf16 %v1139_v16  ;;  %v235_v35 = vunpack.c.l.bf16 %v1144_v21 }
  0x15   : > { %v236_v36 = vunpack.c.l.bf16 %v1147_v22  ;;  %v237_v37 = vunpack.c.l.bf16 %v1150_v23  ;;  %v238_v38 = vunpack.c.l.bf16 %v1161_v28  ;;  %v239_v39 = vunpack.c.l.bf16 %v1164_v29 }
  0x16   : > { %v240_v40 = vunpack.c.l.bf16 %v1167_v30  ;;  %v241_v41 = vunpack.c.l.bf16 %v1174_v33  ;;  %v247_v42 = vmul.f32 %v1065_v9, %v206_v7  ;;  %v248_v43 = vmul.f32 %v1065_v9, %v234_v34 }
  0x17   : > { %v249_v44 = vmul.f32 %v1065_v9, %v207_v8  ;;  %v250_v45 = vmul.f32 %v1065_v9, %v235_v35  ;;  %v251_v46 = vmul.f32 %v1065_v9, %v208_v12  ;;  %v252_v47 = vmul.f32 %v1065_v9, %v236_v36  ;;  %v320_v12 = vld [vmem:[%s1122_s20] sm:$0xe] }
  0x18   : > { %v253_v48 = vmul.f32 %v1065_v9, %v209_v13  ;;  %v254_v49 = vmul.f32 %v1065_v9, %v237_v37  ;;  %v255_v50 = vmul.f32 %v1065_v9, %v210_v14  ;;  %v256_v51 = vmul.f32 %v1065_v9, %v238_v38  ;;  %v1066_v13 = vld [vmem:[%s1588_s1 + $0x2] ss:$0 sm:$0xff] }
  0x19   : > { %v257_v52 = vmul.f32 %v1065_v9, %v211_v15  ;;  %v258_v53 = vmul.f32 %v1065_v9, %v239_v39  ;;  %v259_v54 = vmul.f32 %v1065_v9, %v212_v17  ;;  %v260_v55 = vmul.f32 %v1065_v9, %v240_v40 }
  0x1a   : > { %v261_v56 = vmul.f32 %v1065_v9, %v213_v18  ;;  %v262_v57 = vmul.f32 %v1065_v9, %v241_v41  ;;  %v280_v58 = vrot.slane %v247_v42, 1  ;;  %v281_v59 = vrot.slane %v248_v43, 1  ;;  %v321_v42 = vld [vmem:[%s1122_s20 + $0x8] sm:$0xe]  ;;  %v322_v43 = vld [vmem:[%s1122_s20 + $0x10] sm:$0xe] }
  0x1b   : > { %v283_v60 = vrot.slane %v249_v44, 1  ;;  %v284_v61 = vrot.slane %v250_v45, 1  ;;  %v286_v62 = vrot.slane %v251_v46, 1  ;;  %v287_v63 = vrot.slane %v252_v47, 1 }
  0x1c   : > { %v282_v0 = vsel %vm279_vm0, %v280_v58, %v281_v59  ;;  %v289_v1 = vrot.slane %v253_v48, 1  ;;  %v290_v2 = vrot.slane %v254_v49, 1  ;;  %v292_v3 = vrot.slane %v255_v50, 1  ;;  %v323_v48 = vld [vmem:[%s1122_s20 + $0x18] sm:$0xe] }
  0x1d   : > { %v285_v4 = vsel %vm279_vm0, %v283_v60, %v284_v61  ;;  %v288_v5 = vsel %vm279_vm0, %v286_v62, %v287_v63  ;;  %v293_v6 = vrot.slane %v256_v51, 1  ;;  %v295_v7 = vrot.slane %v257_v52, 1  ;;  %v324_v49 = vld [vmem:[%s1122_s20 + $0x20] sm:$0xe]  ;;  %v325_v50 = vld [vmem:[%s1122_s20 + $0x28] sm:$0xe] }
  0x1e   : > { %v291_v8 = vsel %vm279_vm0, %v289_v1, %v290_v2  ;;  %v296_v9 = vrot.slane %v258_v53, 1  ;;  %v298_v10 = vrot.slane %v259_v54, 1  ;;  %v299_v11 = vrot.slane %v260_v55, 1  ;;  %v326_v54 = vld [vmem:[%s1122_s20 + $0x30] sm:$0xe] }
  0x1f   : > { %v294_v14 = vsel %vm279_vm0, %v292_v3, %v293_v6  ;;  %v301_v15 = vrot.slane %v261_v56, 1  ;;  %v302_v17 = vrot.slane %v262_v57, 1  ;;  %v1209_v18 = vadd.f32 %v282_v0, %v218_v19 }
  0x20   : > { %v297_v44 = vsel %vm279_vm0, %v295_v7, %v296_v9  ;;  %v300_v45 = vsel %vm279_vm0, %v298_v10, %v299_v11  ;;  %v1216_v46 = vadd.f32 %v285_v4, %v1141_v20  ;;  %v1219_v47 = vadd.f32 %v288_v5, %v1152_v24  ;;  %v327_v20 = vld [vmem:[%s1122_s20 + $0x38] sm:$0xe]  ;;  %v1262_v9 = vld [vmem:[%s1122_s20 + $0x8] sm:$0xf] }
  0x21   : > { %v303_v19 = vsel %vm279_vm0, %v301_v15, %v302_v17  ;;  %v1226_v51 = vadd.f32 %v291_v8, %v1154_v25  ;;  %v1229_v52 = vadd.f32 %v294_v14, %v1156_v26  ;;  %v1232_v53 = vadd.f32 %v297_v44, %v1158_v27  ;;  %v1266_v14 = vld [vmem:[%s1122_s20 + $0x10] sm:$0xf]  ;;  %v1271_v44 = vld [vmem:[%s1122_s20 + $0x18] sm:$0xf] }
  0x22   : > { %v1237_v55 = vadd.f32 %v300_v45, %v1169_v31  ;;  %v1240_v24 = vadd.f32 %v303_v19, %v1171_v32  ;;  %v328_v56 = vunpack.c.l.bf16 %v320_v12  ;;  %v329_v57 = vunpack.c.l.bf16 %v321_v42  ;;  %v1274_v45 = vld [vmem:[%s1122_s20 + $0x20] sm:$0xf] }
  0x23   : > { %v330_v58 = vunpack.c.l.bf16 %v322_v43  ;;  %v331_v59 = vunpack.c.l.bf16 %v323_v48  ;;  %v332_v25 = vunpack.c.l.bf16 %v324_v49  ;;  %v333_v60 = vunpack.c.l.bf16 %v325_v50 }
  0x24   : > { %v334_v61 = vunpack.c.l.bf16 %v326_v54  ;;  %v335_v26 = vunpack.c.l.bf16 %v327_v20  ;;  %v341_v62 = vmul.f32 %v1066_v13, %v328_v56  ;;  %v342_v27 = vmul.f32 %v1066_v13, %v234_v34  ;;  %v979_v54 = vld [vmem:[%s1122_s20 + $0x28] sm:$0xf]  ;;  %v980_v20 = vld [vmem:[%s1122_s20 + $0x30] sm:$0xf]  ;;  %v1067_v56 = vld [vmem:[%s1588_s1 + $0x3] ss:$0 sm:$0xff] }
  0x25   : > { %v343_v63 = vmul.f32 %v1066_v13, %v329_v57  ;;  %v344_v31 = vmul.f32 %v1066_v13, %v235_v35  ;;  %v345_v0 = vmul.f32 %v1066_v13, %v330_v58  ;;  %v346_v32 = vmul.f32 %v1066_v13, %v236_v36 }
  0x26   : > { %v347_v1 = vmul.f32 %v1066_v13, %v331_v59  ;;  %v348_v2 = vmul.f32 %v1066_v13, %v237_v37  ;;  %v349_v3 = vmul.f32 %v1066_v13, %v332_v25  ;;  %v350_v4 = vmul.f32 %v1066_v13, %v238_v38  ;;  %v981_v25 = vld [vmem:[%s1122_s20 + $0x38] sm:$0xf] }
  0x27   : > { %v351_v5 = vmul.f32 %v1066_v13, %v333_v60  ;;  %v352_v16 = vmul.f32 %v1066_v13, %v239_v39  ;;  %v353_v34 = vmul.f32 %v1066_v13, %v334_v61  ;;  %v354_v21 = vmul.f32 %v1066_v13, %v240_v40  ;;  %v982_v60 = vld [vmem:[%s1122_s20 + $0x40] sm:$0xf] }
  0x28   : > { %v355_v35 = vmul.f32 %v1066_v13, %v335_v26  ;;  %v356_v22 = vmul.f32 %v1066_v13, %v241_v41  ;;  %v374_v36 = vrot.slane %v341_v62, 2  ;;  %v375_v23 = vrot.slane %v342_v27, 2 }
  0x29   : > { %v377_v37 = vrot.slane %v343_v63, 2  ;;  %v378_v6 = vrot.slane %v344_v31, 2  ;;  %v380_v28 = vrot.slane %v345_v0, 2  ;;  %v381_v38 = vrot.slane %v346_v32, 2 }
  0x2a   : > { %v376_v7 = vsel %vm373_vm1, %v374_v36, %v375_v23  ;;  %v383_v29 = vrot.slane %v347_v1, 2  ;;  %v384_v39 = vrot.slane %v348_v2, 2  ;;  %v386_v8 = vrot.slane %v349_v3, 2  ;;  %v1301_v3 = vld [vmem:[%s1122_s20 + $0x14] sm:$0x1] }
  0x2b   : > { %v379_v30 = vsel %vm373_vm1, %v377_v37, %v378_v6  ;;  %v382_v33 = vsel %vm373_vm1, %v380_v28, %v381_v38  ;;  %v387_v40 = vrot.slane %v350_v4, 2  ;;  %v389_v41 = vrot.slane %v351_v5, 2  ;;  %v1304_v4 = vld [vmem:[%s1122_s20 + $0x1c] sm:$0x1]  ;;  %v1307_v5 = vld [vmem:[%s1122_s20 + $0x24] sm:$0x1] }
  0x2c   : > { %v385_v10 = vsel %vm373_vm1, %v383_v29, %v384_v39  ;;  %v390_v11 = vrot.slane %v352_v16, 2  ;;  %v392_v12 = vrot.slane %v353_v34, 2  ;;  %v393_v13 = vrot.slane %v354_v21, 2  ;;  %v1315_v36 = vld [vmem:[%s1122_s20 + $0x34] sm:$0x1] }
  0x2d   : > { %v388_v15 = vsel %vm373_vm1, %v386_v8, %v387_v40  ;;  %v395_v17 = vrot.slane %v355_v35, 2  ;;  %v396_v42 = vrot.slane %v356_v22, 2  ;;  %v406_v43 = vadd.f32 %v376_v7, %v1209_v18  ;;  %v1312_v22 = vld [vmem:[%s1122_s20 + $0x2c] sm:$0x1]  ;;  %v1068_v23 = vld [vmem:[%s1588_s1 + $0x4] ss:$0 sm:$0xff] }
  0x2e   : > { %v391_v48 = vsel %vm373_vm1, %v389_v41, %v390_v11  ;;  %v394_v49 = vsel %vm373_vm1, %v392_v12, %v393_v13  ;;  %v407_v50 = vadd.f32 %v379_v30, %v1216_v46  ;;  %v408_v19 = vadd.f32 %v382_v33, %v1219_v47  ;;  %v1327_v7 = vld [vmem:[%s1122_s20 + $0x3c] sm:$0x1]  ;;  %v1330_v29 = vld [vmem:[%s1122_s20 + $0x44] sm:$0x1] }
  0x2f   : > { %v397_v18 = vsel %vm373_vm1, %v395_v17, %v396_v42  ;;  %v409_v57 = vadd.f32 %v385_v10, %v1226_v51  ;;  %v410_v58 = vadd.f32 %v388_v15, %v1229_v52  ;;  %v411_v59 = vadd.f32 %v391_v48, %v1232_v53 }
  0x30   : > { %v412_v46 = vadd.f32 %v394_v49, %v1237_v55  ;;  %v413_v47 = vadd.f32 %v397_v18, %v1240_v24  ;;  %v423_v61 = vunpack.c.l.bf16 %v1262_v9  ;;  %v424_v26 = vunpack.c.l.bf16 %v1266_v14  ;;  %v1298_v24 = vld [vmem:[%s1122_s20 + $0xc] sm:$0x1] }
  0x31   : > { %v425_v51 = vunpack.c.l.bf16 %v1271_v44  ;;  %v426_v52 = vunpack.c.l.bf16 %v1274_v45  ;;  %v427_v62 = vunpack.c.l.bf16 %v979_v54  ;;  %v428_v27 = vunpack.c.l.bf16 %v980_v20 }
  0x32   : > { %v429_v53 = vunpack.c.l.bf16 %v981_v25  ;;  %v430_v63 = vunpack.c.l.bf16 %v982_v60  ;;  %v436_v55 = vmul.f32 %v1067_v56, %v423_v61  ;;  %v437_v31 = vmul.f32 %v1067_v56, %v424_v26 }
  0x33   : > { %v438_v0 = vmul.f32 %v1067_v56, %v425_v51  ;;  %v439_v32 = vmul.f32 %v1067_v56, %v426_v52  ;;  %v440_v1 = vmul.f32 %v1067_v56, %v427_v62  ;;  %v441_v2 = vmul.f32 %v1067_v56, %v428_v27 }
  0x34   : > { %v442_v16 = vmul.f32 %v1067_v56, %v429_v53  ;;  %v443_v34 = vmul.f32 %v1067_v56, %v430_v63  ;;  %v444_v21 = vadd.f32 %v436_v55, %v406_v43  ;;  %v1309_v35 = vadd.f32 %v437_v31, %v407_v50 }
  0x35   : > { %v446_v37 = vadd.f32 %v438_v0, %v408_v19  ;;  %v1320_v6 = vadd.f32 %v439_v32, %v409_v57  ;;  %v1322_v28 = vadd.f32 %v440_v1, %v410_v58  ;;  %v1324_v38 = vadd.f32 %v441_v2, %v411_v59  ;;  %v994_v1 = vld [vmem:[%s1122_s20 + $0x10] sm:$0xe] }
  0x36   : > { %v1332_v39 = vadd.f32 %v442_v16, %v412_v46  ;;  %v1334_v8 = vadd.f32 %v443_v34, %v413_v47  ;;  %v460_v30 = vunpack.c.l.bf16 %v1298_v24  ;;  %v461_v33 = vunpack.c.l.bf16 %v1301_v3 }
  0x37   : > { %v462_v40 = vunpack.c.l.bf16 %v1304_v4  ;;  %v463_v41 = vunpack.c.l.bf16 %v1307_v5  ;;  %v464_v9 = vunpack.c.l.bf16 %v1312_v22  ;;  %v465_v10 = vunpack.c.l.bf16 %v1315_v36 }
  0x38   : > { %v466_v11 = vunpack.c.l.bf16 %v1327_v7  ;;  %v467_v12 = vunpack.c.l.bf16 %v1330_v29  ;;  %v473_v13 = vmul.f32 %v1068_v23, %v423_v61  ;;  %v474_v14 = vmul.f32 %v1068_v23, %v460_v30 }
  0x39   : > { %v475_v15 = vmul.f32 %v1068_v23, %v424_v26  ;;  %v476_v17 = vmul.f32 %v1068_v23, %v461_v33  ;;  %v477_v42 = vmul.f32 %v1068_v23, %v425_v51  ;;  %v478_v43 = vmul.f32 %v1068_v23, %v462_v40 }
  0x3a   : > { %v479_v44 = vmul.f32 %v1068_v23, %v426_v52  ;;  %v480_v45 = vmul.f32 %v1068_v23, %v463_v41  ;;  %v481_v48 = vmul.f32 %v1068_v23, %v427_v62  ;;  %v482_v49 = vmul.f32 %v1068_v23, %v464_v9 }
  0x3b   : > { %v483_v50 = vmul.f32 %v1068_v23, %v428_v27  ;;  %v484_v19 = vmul.f32 %v1068_v23, %v465_v10  ;;  %v485_v54 = vmul.f32 %v1068_v23, %v429_v53  ;;  %v486_v20 = vmul.f32 %v1068_v23, %v466_v11 }
  0x3c   : > { %v487_v56 = vmul.f32 %v1068_v23, %v430_v63  ;;  %v488_v18 = vmul.f32 %v1068_v23, %v467_v12  ;;  %v505_v57 = vrot.slane %v473_v13, 1  ;;  %v506_v58 = vrot.slane %v474_v14, 1  ;;  %v993_v63 = vld [vmem:[%s1122_s20 + $0x8] sm:$0xe]  ;;  %v995_v13 = vld [vmem:[%s1122_s20 + $0x18] sm:$0xe] }
  0x3d   : > { %v508_v59 = vrot.slane %v475_v15, 1  ;;  %v509_v25 = vrot.slane %v476_v17, 1  ;;  %v511_v60 = vrot.slane %v477_v42, 1  ;;  %v512_v46 = vrot.slane %v478_v43, 1  ;;  %v996_v14 = vld [vmem:[%s1122_s20 + $0x20] sm:$0xe] }
  0x3e   : > { %v507_v47 = vsel %vm279_vm0, %v505_v57, %v506_v58  ;;  %v514_v61 = vrot.slane %v479_v44, 1  ;;  %v515_v26 = vrot.slane %v480_v45, 1  ;;  %v517_v51 = vrot.slane %v481_v48, 1  ;;  %v997_v44 = vld [vmem:[%s1122_s20 + $0x28] sm:$0xe] }
  0x3f   : > { %v510_v52 = vsel %vm279_vm0, %v508_v59, %v509_v25  ;;  %v513_v62 = vsel %vm279_vm0, %v511_v60, %v512_v46  ;;  %v518_v27 = vrot.slane %v482_v49, 1  ;;  %v520_v53 = vrot.slane %v483_v50, 1  ;;  %v998_v45 = vld [vmem:[%s1122_s20 + $0x30] sm:$0xe]  ;;  %v1069_v48 = vld [vmem:[%s1588_s1 + $0x5] ss:$0 sm:$0xff] }
  0x40   : > { %v516_v55 = vsel %vm279_vm0, %v514_v61, %v515_v26  ;;  %v521_v31 = vrot.slane %v484_v19, 1  ;;  %v523_v0 = vrot.slane %v485_v54, 1  ;;  %v524_v32 = vrot.slane %v486_v20, 1 }
  0x41   : > { %v519_v2 = vsel %vm279_vm0, %v517_v51, %v518_v27  ;;  %v526_v16 = vrot.slane %v487_v56, 1  ;;  %v527_v34 = vrot.slane %v488_v18, 1  ;;  %v1367_v23 = vadd.f32 %v507_v47, %v444_v21 }
  0x42   : > { %v522_v15 = vsel %vm279_vm0, %v520_v53, %v521_v31  ;;  %v525_v17 = vsel %vm279_vm0, %v523_v0, %v524_v32  ;;  %v1374_v42 = vadd.f32 %v510_v52, %v1309_v35  ;;  %v1376_v43 = vadd.f32 %v513_v62, %v446_v37  ;;  %v999_v35 = vld [vmem:[%s1122_s20 + $0x38] sm:$0xe]  ;;  %v1000_v37 = vld [vmem:[%s1122_s20 + $0x40] sm:$0xe] }
  0x43   : > { %v528_v21 = vsel %vm279_vm0, %v526_v16, %v527_v34  ;;  %v1385_v49 = vadd.f32 %v516_v55, %v1320_v6  ;;  %v1388_v50 = vadd.f32 %v519_v2, %v1322_v28  ;;  %v1391_v19 = vadd.f32 %v522_v15, %v1324_v38  ;;  %v1421_v55 = vld [vmem:[%s1122_s20 + $0x10] sm:$0xf]  ;;  %v1425_v2 = vld [vmem:[%s1122_s20 + $0x18] sm:$0xf]  ;;  %v1430_v15 = vld [vmem:[%s1122_s20 + $0x20] sm:$0xf] }
  0x44   : > { %v1396_v54 = vadd.f32 %v525_v17, %v1332_v39  ;;  %v1399_v20 = vadd.f32 %v528_v21, %v1334_v8  ;;  %v553_v56 = vunpack.c.l.bf16 %v993_v63  ;;  %v554_v18 = vunpack.c.l.bf16 %v994_v1  ;;  %v1433_v17 = vld [vmem:[%s1122_s20 + $0x28] sm:$0xf] }
  0x45   : > { %v555_v57 = vunpack.c.l.bf16 %v995_v13  ;;  %v556_v58 = vunpack.c.l.bf16 %v996_v14  ;;  %v557_v6 = vunpack.c.l.bf16 %v997_v44  ;;  %v558_v59 = vunpack.c.l.bf16 %v998_v45 }
  0x46   : > { %v559_v25 = vunpack.c.l.bf16 %v999_v35  ;;  %v560_v28 = vunpack.c.l.bf16 %v1000_v37  ;;  %v566_v60 = vmul.f32 %v1069_v48, %v553_v56  ;;  %v567_v38 = vmul.f32 %v1069_v48, %v460_v30  ;;  %v1006_v35 = vld [vmem:[%s1122_s20 + $0x30] sm:$0xf]  ;;  %v1007_v37 = vld [vmem:[%s1122_s20 + $0x38] sm:$0xf]  ;;  %v1070_v56 = vld [vmem:[%s1588_s1 + $0x6] ss:$0 sm:$0xff] }
  0x47   : > { %v568_v46 = vmul.f32 %v1069_v48, %v554_v18  ;;  %v569_v39 = vmul.f32 %v1069_v48, %v461_v33  ;;  %v570_v47 = vmul.f32 %v1069_v48, %v555_v57  ;;  %v571_v8 = vmul.f32 %v1069_v48, %v462_v40 }
  0x48   : > { %v572_v61 = vmul.f32 %v1069_v48, %v556_v58  ;;  %v573_v26 = vmul.f32 %v1069_v48, %v463_v41  ;;  %v574_v51 = vmul.f32 %v1069_v48, %v557_v6  ;;  %v575_v52 = vmul.f32 %v1069_v48, %v464_v9  ;;  %v1008_v6 = vld [vmem:[%s1122_s20 + $0x40] sm:$0xf] }
  0x49   : > { %v576_v62 = vmul.f32 %v1069_v48, %v558_v59  ;;  %v577_v24 = vmul.f32 %v1069_v48, %v465_v10  ;;  %v578_v30 = vmul.f32 %v1069_v48, %v559_v25  ;;  %v579_v3 = vmul.f32 %v1069_v48, %v466_v11  ;;  %v1009_v59 = vld [vmem:[%s1122_s20 + $0x48] sm:$0xf] }
  0x4a   : > { %v580_v33 = vmul.f32 %v1069_v48, %v560_v28  ;;  %v581_v4 = vmul.f32 %v1069_v48, %v467_v12  ;;  %v598_v40 = vrot.slane %v566_v60, 2  ;;  %v599_v5 = vrot.slane %v567_v38, 2 }
  0x4b   : > { %v601_v41 = vrot.slane %v568_v46, 2  ;;  %v602_v27 = vrot.slane %v569_v39, 2  ;;  %v604_v22 = vrot.slane %v570_v47, 2  ;;  %v605_v9 = vrot.slane %v571_v8, 2 }
  0x4c   : > { %v600_v53 = vsel %vm373_vm1, %v598_v40, %v599_v5  ;;  %v607_v36 = vrot.slane %v572_v61, 2  ;;  %v608_v10 = vrot.slane %v573_v26, 2  ;;  %v610_v63 = vrot.slane %v574_v51, 2  ;;  %v1460_v51 = vld [vmem:[%s1122_s20 + $0x1c] sm:$0x1] }
  0x4d   : > { %v603_v7 = vsel %vm373_vm1, %v601_v41, %v602_v27  ;;  %v606_v29 = vsel %vm373_vm1, %v604_v22, %v605_v9  ;;  %v611_v11 = vrot.slane %v575_v52, 2  ;;  %v613_v12 = vrot.slane %v576_v62, 2  ;;  %v1463_v52 = vld [vmem:[%s1122_s20 + $0x24] sm:$0x1]  ;;  %v1466_v62 = vld [vmem:[%s1122_s20 + $0x2c] sm:$0x1] }
  0x4e   : > { %v609_v31 = vsel %vm373_vm1, %v607_v36, %v608_v10  ;;  %v614_v0 = vrot.slane %v577_v24, 2  ;;  %v616_v32 = vrot.slane %v578_v30, 2  ;;  %v617_v1 = vrot.slane %v579_v3, 2  ;;  %v1474_v40 = vld [vmem:[%s1122_s20 + $0x3c] sm:$0x1] }
  0x4f   : > { %v612_v16 = vsel %vm373_vm1, %v610_v63, %v611_v11  ;;  %v619_v34 = vrot.slane %v580_v33, 2  ;;  %v620_v13 = vrot.slane %v581_v4, 2  ;;  %v630_v14 = vadd.f32 %v600_v53, %v1367_v23  ;;  %v1471_v4 = vld [vmem:[%s1122_s20 + $0x34] sm:$0x1]  ;;  %v1071_v5 = vld [vmem:[%s1588_s1 + $0x7] ss:$0 sm:$0xff] }
  0x50   : > { %v615_v44 = vsel %vm373_vm1, %v613_v12, %v614_v0  ;;  %v618_v45 = vsel %vm373_vm1, %v616_v32, %v617_v1  ;;  %v631_v48 = vadd.f32 %v603_v7, %v1374_v42  ;;  %v632_v21 = vadd.f32 %v606_v29, %v1376_v43  ;;  %v1486_v53 = vld [vmem:[%s1122_s20 + $0x44] sm:$0x1]  ;;  %v1489_v36 = vld [vmem:[%s1122_s20 + $0x4c] sm:$0x1] }
  0x51   : > { %v621_v23 = vsel %vm373_vm1, %v619_v34, %v620_v13  ;;  %v633_v18 = vadd.f32 %v609_v31, %v1385_v49  ;;  %v634_v57 = vadd.f32 %v612_v16, %v1388_v50  ;;  %v635_v58 = vadd.f32 %v615_v44, %v1391_v19 }
  0x52   : > { %v636_v42 = vadd.f32 %v618_v45, %v1396_v54  ;;  %v637_v43 = vadd.f32 %v621_v23, %v1399_v20  ;;  %v647_v25 = vunpack.c.l.bf16 %v1421_v55  ;;  %v648_v28 = vunpack.c.l.bf16 %v1425_v2  ;;  %v1457_v20 = vld [vmem:[%s1122_s20 + $0x14] sm:$0x1] }
  0x53   : > { %v649_v49 = vunpack.c.l.bf16 %v1430_v15  ;;  %v650_v50 = vunpack.c.l.bf16 %v1433_v17  ;;  %v651_v60 = vunpack.c.l.bf16 %v1006_v35  ;;  %v652_v38 = vunpack.c.l.bf16 %v1007_v37 }
  0x54   : > { %v653_v19 = vunpack.c.l.bf16 %v1008_v6  ;;  %v654_v46 = vunpack.c.l.bf16 %v1009_v59  ;;  %v660_v54 = vmul.f32 %v1070_v56, %v647_v25  ;;  %v661_v39 = vmul.f32 %v1070_v56, %v648_v28 }
  0x55   : > { %v662_v47 = vmul.f32 %v1070_v56, %v649_v49  ;;  %v663_v8 = vmul.f32 %v1070_v56, %v650_v50  ;;  %v664_v61 = vmul.f32 %v1070_v56, %v651_v60  ;;  %v665_v26 = vmul.f32 %v1070_v56, %v652_v38 }
  0x56   : > { %v666_v24 = vmul.f32 %v1070_v56, %v653_v19  ;;  %v667_v30 = vmul.f32 %v1070_v56, %v654_v46  ;;  %v668_v3 = vadd.f32 %v660_v54, %v630_v14  ;;  %v1468_v33 = vadd.f32 %v661_v39, %v631_v48 }
  0x57   : > { %v670_v41 = vadd.f32 %v662_v47, %v632_v21  ;;  %v1479_v27 = vadd.f32 %v663_v8, %v633_v18  ;;  %v1481_v22 = vadd.f32 %v664_v61, %v634_v57  ;;  %v1483_v9 = vadd.f32 %v665_v26, %v635_v58  ;;  %v1021_v61 = vld [vmem:[%s1122_s20 + $0x18] sm:$0xe] }
  0x58   : > { %v1491_v10 = vadd.f32 %v666_v24, %v636_v42  ;;  %v1493_v63 = vadd.f32 %v667_v30, %v637_v43  ;;  %v684_v7 = vunpack.c.l.bf16 %v1457_v20  ;;  %v685_v29 = vunpack.c.l.bf16 %v1460_v51 }
  0x59   : > { %v686_v11 = vunpack.c.l.bf16 %v1463_v52  ;;  %v687_v12 = vunpack.c.l.bf16 %v1466_v62  ;;  %v688_v55 = vunpack.c.l.bf16 %v1471_v4  ;;  %v689_v31 = vunpack.c.l.bf16 %v1474_v40 }
  0x5a   : > { %v690_v0 = vunpack.c.l.bf16 %v1486_v53  ;;  %v691_v32 = vunpack.c.l.bf16 %v1489_v36  ;;  %v697_v1 = vmul.f32 %v1071_v5, %v647_v25  ;;  %v698_v2 = vmul.f32 %v1071_v5, %v684_v7 }
  0x5b   : > { %v699_v16 = vmul.f32 %v1071_v5, %v648_v28  ;;  %v700_v34 = vmul.f32 %v1071_v5, %v685_v29  ;;  %v701_v13 = vmul.f32 %v1071_v5, %v649_v49  ;;  %v702_v14 = vmul.f32 %v1071_v5, %v686_v11 }
  0x5c   : > { %v703_v15 = vmul.f32 %v1071_v5, %v650_v50  ;;  %v704_v17 = vmul.f32 %v1071_v5, %v687_v12  ;;  %v705_v44 = vmul.f32 %v1071_v5, %v651_v60  ;;  %v706_v45 = vmul.f32 %v1071_v5, %v688_v55 }
  0x5d   : > { %v707_v48 = vmul.f32 %v1071_v5, %v652_v38  ;;  %v708_v21 = vmul.f32 %v1071_v5, %v689_v31  ;;  %v709_v35 = vmul.f32 %v1071_v5, %v653_v19  ;;  %v710_v37 = vmul.f32 %v1071_v5, %v690_v0 }
  0x5e   : > { %v711_v56 = vmul.f32 %v1071_v5, %v654_v46  ;;  %v712_v23 = vmul.f32 %v1071_v5, %v691_v32  ;;  %v729_v18 = vrot.slane %v697_v1, 1  ;;  %v730_v57 = vrot.slane %v698_v2, 1  ;;  %v1020_v46 = vld [vmem:[%s1122_s20 + $0x10] sm:$0xe]  ;;  %v1022_v1 = vld [vmem:[%s1122_s20 + $0x20] sm:$0xe] }
  0x5f   : > { %v732_v58 = vrot.slane %v699_v16, 1  ;;  %v733_v6 = vrot.slane %v700_v34, 1  ;;  %v735_v59 = vrot.slane %v701_v13, 1  ;;  %v736_v42 = vrot.slane %v702_v14, 1  ;;  %v1023_v2 = vld [vmem:[%s1122_s20 + $0x28] sm:$0xe] }
  0x60   : > { %v731_v43 = vsel %vm279_vm0, %v729_v18, %v730_v57  ;;  %v738_v25 = vrot.slane %v703_v15, 1  ;;  %v739_v28 = vrot.slane %v704_v17, 1  ;;  %v741_v49 = vrot.slane %v705_v44, 1  ;;  %v1024_v15 = vld [vmem:[%s1122_s20 + $0x30] sm:$0xe] }
  0x61   : > { %v734_v50 = vsel %vm279_vm0, %v732_v58, %v733_v6  ;;  %v737_v60 = vsel %vm279_vm0, %v735_v59, %v736_v42  ;;  %v742_v38 = vrot.slane %v706_v45, 1  ;;  %v744_v19 = vrot.slane %v707_v48, 1  ;;  %v1025_v17 = vld [vmem:[%s1122_s20 + $0x38] sm:$0xe]  ;;  %v1072_v44 = vld [vmem:[%s1588_s1 + $0x8] ss:$0 sm:$0xff] }
  0x62   : > { %v740_v54 = vsel %vm279_vm0, %v738_v25, %v739_v28  ;;  %v745_v39 = vrot.slane %v708_v21, 1  ;;  %v747_v47 = vrot.slane %v709_v35, 1  ;;  %v748_v8 = vrot.slane %v710_v37, 1  ;;  %v1026_v35 = vld [vmem:[%s1122_s20 + $0x40] sm:$0xe] }
  0x63   : > { %v743_v26 = vsel %vm279_vm0, %v741_v49, %v742_v38  ;;  %v750_v24 = vrot.slane %v711_v56, 1  ;;  %v751_v30 = vrot.slane %v712_v23, 1  ;;  %v1526_v5 = vadd.f32 %v731_v43, %v668_v3  ;;  %v1027_v37 = vld [vmem:[%s1122_s20 + $0x48] sm:$0xe] }
  0x64   : > { %v746_v16 = vsel %vm279_vm0, %v744_v19, %v745_v39  ;;  %v749_v34 = vsel %vm279_vm0, %v747_v47, %v748_v8  ;;  %v1533_v13 = vadd.f32 %v734_v50, %v1468_v33  ;;  %v763_v14 = vadd.f32 %v737_v60, %v670_v41 }
  0x65   : > { %v752_v45 = vsel %vm279_vm0, %v750_v24, %v751_v30  ;;  %v764_v3 = vadd.f32 %v740_v54, %v1479_v27  ;;  %v765_v48 = vadd.f32 %v743_v26, %v1481_v22  ;;  %v766_v21 = vadd.f32 %v746_v16, %v1483_v9 }
  0x66   : > { %v767_v33 = vadd.f32 %v749_v34, %v1491_v10  ;;  %v768_v41 = vadd.f32 %v752_v45, %v1493_v63  ;;  %v777_v56 = vunpack.c.l.bf16 %v1020_v46  ;;  %v778_v23 = vunpack.c.l.bf16 %v1021_v61  ;;  %v1073_v61 = vld [vmem:[%s1589_s2] ss:$0 sm:$0xff] }
  0x67   : > { %v779_v18 = vunpack.c.l.bf16 %v1022_v1  ;;  %v780_v57 = vunpack.c.l.bf16 %v1023_v2  ;;  %v781_v58 = vunpack.c.l.bf16 %v1024_v15  ;;  %v782_v6 = vunpack.c.l.bf16 %v1025_v17  ;;  %v1074_v17 = vld [vmem:[%s1590_s3] ss:$0 sm:$0xff] }
  0x68   : > { %v783_v59 = vunpack.c.l.bf16 %v1026_v35  ;;  %v784_v42 = vunpack.c.l.bf16 %v1027_v37  ;;  %v790_v43 = vmul.f32 %v1072_v44, %v777_v56  ;;  %v791_v27 = vmul.f32 %v1072_v44, %v684_v7 }
  0x69   : > { %v792_v22 = vmul.f32 %v1072_v44, %v778_v23  ;;  %v793_v9 = vmul.f32 %v1072_v44, %v685_v29  ;;  %v794_v25 = vmul.f32 %v1072_v44, %v779_v18  ;;  %v795_v10 = vmul.f32 %v1072_v44, %v686_v11 }
  0x6a   : > { %v796_v63 = vmul.f32 %v1072_v44, %v780_v57  ;;  %v797_v28 = vmul.f32 %v1072_v44, %v687_v12  ;;  %v798_v49 = vmul.f32 %v1072_v44, %v781_v58  ;;  %v799_v50 = vmul.f32 %v1072_v44, %v688_v55 }
  0x6b   : > { %v800_v60 = vmul.f32 %v1072_v44, %v782_v6  ;;  %v801_v20 = vmul.f32 %v1072_v44, %v689_v31  ;;  %v802_v7 = vmul.f32 %v1072_v44, %v783_v59  ;;  %v803_v51 = vmul.f32 %v1072_v44, %v690_v0 }
  0x6c   : > { %v804_v29 = vmul.f32 %v1072_v44, %v784_v42  ;;  %v805_v52 = vmul.f32 %v1072_v44, %v691_v32  ;;  %v822_v11 = vrot.slane %v790_v43, 2  ;;  %v823_v38 = vrot.slane %v791_v27, 2 }
  0x6d   : > { %v825_v62 = vrot.slane %v792_v22, 2  ;;  %v826_v12 = vrot.slane %v793_v9, 2  ;;  %v828_v19 = vrot.slane %v794_v25, 2  ;;  %v829_v46 = vrot.slane %v795_v10, 2 }
  0x6e   : > { %v824_v4 = vsel %vm373_vm1, %v822_v11, %v823_v38  ;;  %v831_v55 = vrot.slane %v796_v63, 2  ;;  %v832_v54 = vrot.slane %v797_v28, 2  ;;  %v834_v40 = vrot.slane %v798_v49, 2 }
  0x6f   : > { %v827_v31 = vsel %vm373_vm1, %v825_v62, %v826_v12  ;;  %v830_v53 = vsel %vm373_vm1, %v828_v19, %v829_v46  ;;  %v835_v0 = vrot.slane %v799_v50, 2  ;;  %v837_v39 = vrot.slane %v800_v60, 2 }
  0x70   : > { %v833_v36 = vsel %vm373_vm1, %v831_v55, %v832_v54  ;;  %v838_v32 = vrot.slane %v801_v20, 2  ;;  %v840_v47 = vrot.slane %v802_v7, 2  ;;  %v841_v8 = vrot.slane %v803_v51, 2 }
  0x71   : > { %v836_v26 = vsel %vm373_vm1, %v834_v40, %v835_v0  ;;  %v843_v24 = vrot.slane %v804_v29, 2  ;;  %v844_v30 = vrot.slane %v805_v52, 2  ;;  %v854_v1 = vadd.f32 %v824_v4, %v1526_v5 }
  0x72   : > { %v839_v2 = vsel %vm373_vm1, %v837_v39, %v838_v32  ;;  %v842_v16 = vsel %vm373_vm1, %v840_v47, %v841_v8  ;;  %v855_v34 = vadd.f32 %v827_v31, %v1533_v13  ;;  %v856_v15 = vadd.f32 %v830_v53, %v763_v14 }
  0x73   : > { %v845_v44 = vsel %vm373_vm1, %v843_v24, %v844_v30  ;;  %v857_v45 = vadd.f32 %v833_v36, %v764_v3  ;;  %v858_v35 = vadd.f32 %v836_v26, %v765_v48  ;;  %v859_v37 = vadd.f32 %v839_v2, %v766_v21 }
  0x74   : > { %v860_v56 = vadd.f32 %v842_v16, %v767_v33  ;;  %v861_v23 = vadd.f32 %v845_v44, %v768_v41  ;;  %v866_v5 = vmul.f32 %v1073_v61, %v854_v1  ;;  %v867_v18 = vmul.f32 %v1073_v61, %v855_v34 }
  0x75   : > { %v868_v57 = vmul.f32 %v1073_v61, %v856_v15  ;;  %v869_v58 = vmul.f32 %v1073_v61, %v857_v45  ;;  %v870_v6 = vmul.f32 %v1073_v61, %v858_v35  ;;  %v871_v59 = vmul.f32 %v1073_v61, %v859_v37 }
  0x76   : > { %v872_v13 = vmul.f32 %v1073_v61, %v860_v56  ;;  %v873_v14 = vmul.f32 %v1073_v61, %v861_v23  ;;  %v878_v42 = vadd.f32 %v1074_v17, %v866_v5  ;;  %v879_v43 = vadd.f32 %v1074_v17, %v867_v18 }
  0x77   : > { %v880_v27 = vadd.f32 %v1074_v17, %v868_v57  ;;  %v881_v22 = vadd.f32 %v1074_v17, %v869_v58  ;;  %v882_v9 = vadd.f32 %v1074_v17, %v870_v6  ;;  %v883_v25 = vadd.f32 %v1074_v17, %v871_v59 }
  0x78   : > { %v884_v3 = vadd.f32 %v1074_v17, %v872_v13  ;;  %v885_v48 = vadd.f32 %v1074_v17, %v873_v14  ;;  %v886_v21 = vmax.f32 %v878_v42, 0.0  ;;  %v887_v33 = vmax.f32 %v879_v43, 0.0 }
  0x79   : > { %v888_v41 = vmax.f32 %v880_v27, 0.0  ;;  %v889_v10 = vmax.f32 %v881_v22, 0.0  ;;  %v890_v63 = vmax.f32 %v882_v9, 0.0  ;;  %v891_v28 = vmax.f32 %v883_v25, 0.0 }
  0x7a   : > { %v892_v49 = vmax.f32 %v884_v3, 0.0  ;;  %v893_v50 = vmax.f32 %v885_v48, 0.0  ;;  %v1035_v60 = vpack.c.bf16 %v887_v33, %v886_v21 }
  0x7b   : > { %v1040_v20 = vpack.c.bf16 %v889_v10, %v888_v41  ;;  %v1045_v7 = vpack.c.bf16 %v891_v28, %v890_v63 }
  0x7c   : > { %1036 = vst [vmem:[%s197_s22] sm:$0xff] %v1035_v60   ;;  %v1050_v51 = vpack.c.bf16 %v893_v50, %v892_v49 }
  0x7d   : > { %1052 = vst [vmem:[%s197_s22 + $0x8] sm:$0xff] %v1040_v20  }
  0x7e   : > { %1053 = vst [vmem:[%s197_s22 + $0x10] sm:$0xff] %v1045_v7  }
  0x7f   : > { %1054 = vst [vmem:[%s197_s22 + $0x18] sm:$0xff] %v1050_v51  }
  0x80 PF: > { %s14_s15 = sadd.s32 1, %s1081_s15  }
  0x81   : > { %p11_p4 = scmp.ge.s32.totalorder %s14_s15, 4  }
  0x83   :  { %13 = sbr.rel (!%p11_p4) target bundleno = 1 (0x1), region = 76 }

// kernel: _lambda_.17
= control target key start
LH: loop header
LB: loop body
LE: loop exit
PB: predicated region body
PF: predicated region fallthrough
CT: control target
= control target key end

     0   :  { %s286_s1 = inlined_call_operand.vmem [shape: bf16[128,128], index: 1, kind: input, shape index: {}]   ;;  %s287_s2 = inlined_call_operand.vmem [shape: f32[1,128], index: 2, kind: input, shape index: {}]   ;;  %s288_s3 = inlined_call_operand.vmem [shape: f32[1,128], index: 3, kind: input, shape index: {}]   ;;  %s289_s0 = inlined_call_operand.vmem [shape: bf16[32,128], index: 0, kind: input, shape index: {}]   ;;  %s290_s4 = inlined_call_operand.vmem [shape: bf16[32,128], index: 4, kind: output, shape index: {}]  }
   0x1   :  { %v197_v0 = vld [vmem:[%s286_s1 + $0x38] sm:$0xff]  ;;  %v196_v1 = vld [vmem:[%s286_s1 + $0x30] sm:$0xff]  ;;  %v195_v2 = vld [vmem:[%s286_s1 + $0x28] sm:$0xff] }
   0x2   :  { %97 = vmatpush.bf16.msra.mxu0 %v197_v0  ;;  %209 = vmatpush.bf16.msra.mxu1 %v197_v0  ;;  %v194_v3 = vld [vmem:[%s286_s1 + $0x20] sm:$0xff]  ;;  %v193_v4 = vld [vmem:[%s286_s1 + $0x18] sm:$0xff]  ;;  %v192_v5 = vld [vmem:[%s286_s1 + $0x10] sm:$0xff] }
   0x3   :  { %v191_v6 = vld [vmem:[%s286_s1 + $0x8] sm:$0xff]  ;;  %v190_v7 = vld [vmem:[%s286_s1] sm:$0xff] }
   0x4   :  { %v188_v8 = vld [vmem:[%s289_s0] sm:$0xff]  ;;  %v189_v9 = vld [vmem:[%s289_s0 + $0x8] sm:$0xff] }
   0x5   :  { %v217_v12 = vld [vmem:[%s287_s2] ss:$0 sm:$0xff] }
   0x6   :  { %98 = vmatpush.bf16.msra.mxu0 %v196_v1  ;;  %210 = vmatpush.bf16.msra.mxu1 %v196_v1  ;;  %v218_v14 = vld [vmem:[%s288_s3] ss:$0 sm:$0xff] }
   0xa   :  { %99 = vmatpush.bf16.msra.mxu0 %v195_v2  ;;  %211 = vmatpush.bf16.msra.mxu1 %v195_v2 }
   0xe   :  { %100 = vmatpush.bf16.msra.mxu0 %v194_v3  ;;  %212 = vmatpush.bf16.msra.mxu1 %v194_v3 }
  0x12   :  { %101 = vmatpush.bf16.msra.mxu0 %v193_v4  ;;  %213 = vmatpush.bf16.msra.mxu1 %v193_v4 }
  0x16   :  { %102 = vmatpush.bf16.msra.mxu0 %v192_v5  ;;  %214 = vmatpush.bf16.msra.mxu1 %v192_v5 }
  0x1a   :  { %103 = vmatpush.bf16.msra.mxu0 %v191_v6  ;;  %215 = vmatpush.bf16.msra.mxu1 %v191_v6 }
  0x1e   :  { %104 = vmatpush.bf16.msra.mxu0 %v190_v7  ;;  %216 = vmatpush.bf16.msra.mxu1 %v190_v7 }
  0x21   :  { %105 = vmatmul.bf16.vlgmr.msra.gmra.mxu0 %v188_v8  ;;  %110 = vmatmul.bf16.vlgmr.msra.gmra.mxu1 %v189_v9 }
  0x9e   :  { %v106_v10 = vpop.f32.mrf.mxu0  ;;  %v111_v11 = vpop.f32.mrf.mxu1 }
  0x9f   :  { %v120_v13 = vmul.f32 %v217_v12, %v106_v10  ;;  %v122_v15 = vmul.f32 %v217_v12, %v111_v11 }
  0xa1   :  { %v128_v18 = vadd.f32 %v218_v14, %v120_v13  ;;  %v130_v19 = vadd.f32 %v218_v14, %v122_v15 }
  0xa3   :  { %v132_v24 = vmax.f32 %v128_v18, 0.0  ;;  %v134_v25 = vmax.f32 %v130_v19, 0.0 }
  0xa6   :  { %v108_v16 = vpop.f32.mrf.mxu0  ;;  %v113_v17 = vpop.f32.mrf.mxu1 }
  0xa7   :  { %v121_v20 = vmul.f32 %v217_v12, %v108_v16  ;;  %v123_v21 = vmul.f32 %v217_v12, %v113_v17 }
  0xa9   :  { %v129_v22 = vadd.f32 %v218_v14, %v121_v20  ;;  %v131_v23 = vadd.f32 %v218_v14, %v123_v21 }
  0xab   :  { %v133_v26 = vmax.f32 %v129_v22, 0.0  ;;  %v135_v27 = vmax.f32 %v131_v23, 0.0 }
  0xad   :  { %v201_v28 = vpack.c.bf16 %v133_v26, %v132_v24  ;;  %v206_v29 = vpack.c.bf16 %v135_v27, %v134_v25 }
  0xaf   :  { %202 = vst [vmem:[%s290_s4] sm:$0xff] %v201_v28  }
  0xb0   :  { %208 = vst [vmem:[%s290_s4 + $0x8] sm:$0xff] %v206_v29  }

// kernel: _lambda_.18
= control target key start
LH: loop header
LB: loop body
LE: loop exit
PB: predicated region body
PF: predicated region fallthrough
CT: control target
= control target key end

     0   :  { %s273_s1 = inlined_call_operand.vmem [shape: bf16[128,128], index: 1, kind: input, shape index: {}]   ;;  %s274_s2 = inlined_call_operand.vmem [shape: f32[1,128], index: 2, kind: input, shape index: {}]   ;;  %s275_s3 = inlined_call_operand.vmem [shape: f32[1,128], index: 3, kind: input, shape index: {}]   ;;  %s276_s0 = inlined_call_operand.vmem [shape: bf16[32,128], index: 0, kind: input, shape index: {}]   ;;  %s277_s4 = inlined_call_operand.vmem [shape: f32[32,128], index: 4, kind: output, shape index: {}]  }
   0x1   :  { %v189_v0 = vld [vmem:[%s273_s1 + $0x38] sm:$0xff]  ;;  %v188_v1 = vld [vmem:[%s273_s1 + $0x30] sm:$0xff]  ;;  %v187_v2 = vld [vmem:[%s273_s1 + $0x28] sm:$0xff] }
   0x2   :  { %97 = vmatpush.bf16.msra.mxu0 %v189_v0  ;;  %190 = vmatpush.bf16.msra.mxu1 %v189_v0  ;;  %v186_v3 = vld [vmem:[%s273_s1 + $0x20] sm:$0xff]  ;;  %v185_v4 = vld [vmem:[%s273_s1 + $0x18] sm:$0xff]  ;;  %v184_v5 = vld [vmem:[%s273_s1 + $0x10] sm:$0xff] }
   0x3   :  { %v183_v6 = vld [vmem:[%s273_s1 + $0x8] sm:$0xff]  ;;  %v182_v7 = vld [vmem:[%s273_s1] sm:$0xff] }
   0x4   :  { %v180_v8 = vld [vmem:[%s276_s0] sm:$0xff]  ;;  %v181_v9 = vld [vmem:[%s276_s0 + $0x8] sm:$0xff] }
   0x5   :  { %v198_v10 = vld [vmem:[%s274_s2] ss:$0 sm:$0xff] }
   0x6   :  { %98 = vmatpush.bf16.msra.mxu0 %v188_v1  ;;  %191 = vmatpush.bf16.msra.mxu1 %v188_v1  ;;  %v199_v11 = vld [vmem:[%s275_s3] ss:$0 sm:$0xff] }
   0xa   :  { %99 = vmatpush.bf16.msra.mxu0 %v187_v2  ;;  %192 = vmatpush.bf16.msra.mxu1 %v187_v2 }
   0xe   :  { %100 = vmatpush.bf16.msra.mxu0 %v186_v3  ;;  %193 = vmatpush.bf16.msra.mxu1 %v186_v3 }
  0x12   :  { %101 = vmatpush.bf16.msra.mxu0 %v185_v4  ;;  %194 = vmatpush.bf16.msra.mxu1 %v185_v4 }
  0x16   :  { %102 = vmatpush.bf16.msra.mxu0 %v184_v5  ;;  %195 = vmatpush.bf16.msra.mxu1 %v184_v5 }
  0x1a   :  { %103 = vmatpush.bf16.msra.mxu0 %v183_v6  ;;  %196 = vmatpush.bf16.msra.mxu1 %v183_v6 }
  0x1e   :  { %104 = vmatpush.bf16.msra.mxu0 %v182_v7  ;;  %197 = vmatpush.bf16.msra.mxu1 %v182_v7 }
  0x21   :  { %105 = vmatmul.bf16.vlgmr.msra.gmra.mxu0 %v180_v8  ;;  %110 = vmatmul.bf16.vlgmr.msra.gmra.mxu1 %v181_v9 }
  0x9e   :  { %v106_v12 = vpop.f32.mrf.mxu0  ;;  %v111_v13 = vpop.f32.mrf.mxu1 }
  0x9f   :  { %v120_v14 = vmul.f32 %v198_v10, %v106_v12  ;;  %v122_v15 = vmul.f32 %v198_v10, %v111_v13 }
  0xa1   :  { %v128_v16 = vadd.f32 %v199_v11, %v120_v14  ;;  %v130_v17 = vadd.f32 %v199_v11, %v122_v15 }
  0xa3   :  { %132 = vst [vmem:[%s277_s4] sm:$0xff] %v128_v16 }
  0xa4   :  { %134 = vst [vmem:[%s277_s4 + $0x10] sm:$0xff] %v130_v17 }
  0xa6   :  { %v108_v18 = vpop.f32.mrf.mxu0  ;;  %v113_v19 = vpop.f32.mrf.mxu1 }
  0xa7   :  { %v121_v20 = vmul.f32 %v198_v10, %v108_v18  ;;  %v123_v21 = vmul.f32 %v198_v10, %v113_v19 }
  0xa9   :  { %v129_v22 = vadd.f32 %v199_v11, %v121_v20  ;;  %v131_v23 = vadd.f32 %v199_v11, %v123_v21 }
  0xab   :  { %133 = vst [vmem:[%s277_s4 + $0x8] sm:$0xff] %v129_v22 }
  0xac   :  { %135 = vst [vmem:[%s277_s4 + $0x18] sm:$0xff] %v131_v23 }

// kernel: _lambda_.11
= control target key start
LH: loop header
LB: loop body
LE: loop exit
PB: predicated region body
PF: predicated region fallthrough
CT: control target
= control target key end

     0   :  { %s3190_s1 = inlined_call_operand.vmem [shape: bf16[1152,128], index: 1, kind: input, shape index: {}]   ;;  %s3191_s0 = inlined_call_operand.vmem [shape: bf16[128,1152], index: 0, kind: input, shape index: {}]   ;;  %s3192_s2 = inlined_call_operand.vmem [shape: f32[1,128], index: 2, kind: input, shape index: {}]   ;;  %s3193_s3 = inlined_call_operand.vmem [shape: f32[1,128], index: 3, kind: input, shape index: {}]   ;;  %s3194_s4 = inlined_call_operand.vmem [shape: bf16[128,128], index: 4, kind: output, shape index: {}]  }
   0x1   :  { %v2229_v0 = vld [vmem:[%s3190_s1 + $0x38] sm:$0xff]  ;;  %v2228_v1 = vld [vmem:[%s3190_s1 + $0x30] sm:$0xff]  ;;  %v2227_v2 = vld [vmem:[%s3190_s1 + $0x28] sm:$0xff] }
   0x2   :  { %2341 = vmatpush.bf16.msra.mxu1 %v2229_v0  ;;  %2342 = vmatpush.bf16.msra.mxu2 %v2229_v0  ;;  %v2226_v3 = vld [vmem:[%s3190_s1 + $0x20] sm:$0xff]  ;;  %v2225_v4 = vld [vmem:[%s3190_s1 + $0x18] sm:$0xff]  ;;  %v2224_v5 = vld [vmem:[%s3190_s1 + $0x10] sm:$0xff] }
   0x3   :  { %2343 = vmatpush.bf16.msra.mxu3 %v2229_v0  ;;  %1041 = vmatpush.bf16.msra.mxu0 %v2229_v0  ;;  %v2223_v6 = vld [vmem:[%s3190_s1 + $0x8] sm:$0xff]  ;;  %v2222_v7 = vld [vmem:[%s3190_s1] sm:$0xff]  ;;  %v1648_v8 = vld [vmem:[%s3191_s0 + $0x90] sm:$0xf] }
   0x4   :  { %v2172_v9 = vld [vmem:[%s3191_s0 + $0xb0] sm:$0xf0]  ;;  %v1720_v10 = vld [vmem:[%s3191_s0 + $0x120] sm:$0xf]  ;;  %v2190_v11 = vld [vmem:[%s3191_s0 + $0x140] sm:$0xf0] }
   0x5   :  { %v1792_v12 = vld [vmem:[%s3191_s0 + $0x1b0] sm:$0xf]  ;;  %v2208_v13 = vld [vmem:[%s3191_s0 + $0x1d0] sm:$0xf0]  ;;  %v1576_v14 = vld [vmem:[%s3191_s0] sm:$0xf]  ;;  %v1649_v18 = vor.u32 %v2172_v9, %v1648_v8  ;;  %v1721_v19 = vor.u32 %v2190_v11, %v1720_v10 }
   0x6   :  { %2344 = vmatpush.bf16.msra.mxu1 %v2228_v1  ;;  %2345 = vmatpush.bf16.msra.mxu2 %v2228_v1  ;;  %v2154_v15 = vld [vmem:[%s3191_s0 + $0x20] sm:$0xf0]  ;;  %v2245_v16 = vld [vmem:[%s3190_s1 + $0xb8] sm:$0xff]  ;;  %v1793_v20 = vor.u32 %v2208_v13, %v1792_v12  ;;  %v2244_v24 = vld [vmem:[%s3190_s1 + $0xb0] sm:$0xff] }
   0x7   :  { %2346 = vmatpush.bf16.msra.mxu3 %v2228_v1  ;;  %1042 = vmatpush.bf16.msra.mxu0 %v2228_v1  ;;  %v2237_v17 = vld [vmem:[%s3190_s1 + $0x78] sm:$0xff]  ;;  %v1577_v21 = vor.u32 %v2154_v15, %v1576_v14  ;;  %v2236_v25 = vld [vmem:[%s3190_s1 + $0x70] sm:$0xff]  ;;  %v2243_v28 = vld [vmem:[%s3190_s1 + $0xa8] sm:$0xff] }
   0x8   :  { %v2253_v22 = vld [vmem:[%s3190_s1 + $0xf8] sm:$0xff]  ;;  %v2252_v26 = vld [vmem:[%s3190_s1 + $0xf0] sm:$0xff]  ;;  %v2235_v29 = vld [vmem:[%s3190_s1 + $0x68] sm:$0xff] }
   0x9   :  { %v2261_v23 = vld [vmem:[%s3190_s1 + $0x138] sm:$0xff]  ;;  %v2260_v27 = vld [vmem:[%s3190_s1 + $0x130] sm:$0xff]  ;;  %v2251_v30 = vld [vmem:[%s3190_s1 + $0xe8] sm:$0xff] }
   0xa   :  { %2347 = vmatpush.bf16.msra.mxu1 %v2227_v2  ;;  %2348 = vmatpush.bf16.msra.mxu2 %v2227_v2  ;;  %v2259_v31 = vld [vmem:[%s3190_s1 + $0x128] sm:$0xff]  ;;  %v2242_v32 = vld [vmem:[%s3190_s1 + $0xa0] sm:$0xff]  ;;  %v1684_v36 = vld [vmem:[%s3191_s0 + $0xd8] sm:$0xf] }
   0xb   :  { %2349 = vmatpush.bf16.msra.mxu3 %v2227_v2  ;;  %1043 = vmatpush.bf16.msra.mxu0 %v2227_v2  ;;  %v2234_v33 = vld [vmem:[%s3190_s1 + $0x60] sm:$0xff]  ;;  %v2181_v37 = vld [vmem:[%s3191_s0 + $0xf8] sm:$0xf0]  ;;  %v1756_v38 = vld [vmem:[%s3191_s0 + $0x168] sm:$0xf] }
   0xc   :  { %v2250_v34 = vld [vmem:[%s3190_s1 + $0xe0] sm:$0xff]  ;;  %v2199_v39 = vld [vmem:[%s3191_s0 + $0x188] sm:$0xf0]  ;;  %v1828_v40 = vld [vmem:[%s3191_s0 + $0x1f8] sm:$0xf]  ;;  %v1685_v46 = vor.u32 %v2181_v37, %v1684_v36 }
   0xd   :  { %v2258_v35 = vld [vmem:[%s3190_s1 + $0x120] sm:$0xff]  ;;  %v2217_v41 = vld [vmem:[%s3191_s0 + $0x218] sm:$0xf0]  ;;  %v1612_v42 = vld [vmem:[%s3191_s0 + $0x48] sm:$0xf]  ;;  %v1757_v47 = vor.u32 %v2199_v39, %v1756_v38 }
   0xe   :  { %2350 = vmatpush.bf16.msra.mxu1 %v2226_v3  ;;  %2351 = vmatpush.bf16.msra.mxu2 %v2226_v3  ;;  %v2163_v43 = vld [vmem:[%s3191_s0 + $0x68] sm:$0xf0]  ;;  %v2241_v44 = vld [vmem:[%s3190_s1 + $0x98] sm:$0xff]  ;;  %v1829_v48 = vor.u32 %v2217_v41, %v1828_v40  ;;  %v2240_v52 = vld [vmem:[%s3190_s1 + $0x90] sm:$0xff] }
   0xf   :  { %2352 = vmatpush.bf16.msra.mxu3 %v2226_v3  ;;  %1044 = vmatpush.bf16.msra.mxu0 %v2226_v3  ;;  %v2233_v45 = vld [vmem:[%s3190_s1 + $0x58] sm:$0xff]  ;;  %v1613_v49 = vor.u32 %v2163_v43, %v1612_v42  ;;  %v2232_v53 = vld [vmem:[%s3190_s1 + $0x50] sm:$0xff]  ;;  %v2239_v56 = vld [vmem:[%s3190_s1 + $0x88] sm:$0xff] }
  0x10   :  { %v2249_v50 = vld [vmem:[%s3190_s1 + $0xd8] sm:$0xff]  ;;  %v2248_v54 = vld [vmem:[%s3190_s1 + $0xd0] sm:$0xff]  ;;  %v2231_v57 = vld [vmem:[%s3190_s1 + $0x48] sm:$0xff] }
  0x11   :  { %v2257_v51 = vld [vmem:[%s3190_s1 + $0x118] sm:$0xff]  ;;  %v2256_v55 = vld [vmem:[%s3190_s1 + $0x110] sm:$0xff]  ;;  %v2247_v58 = vld [vmem:[%s3190_s1 + $0xc8] sm:$0xff] }
  0x12   :  { %2353 = vmatpush.bf16.msra.mxu1 %v2225_v4  ;;  %2354 = vmatpush.bf16.msra.mxu2 %v2225_v4  ;;  %v2255_v59 = vld [vmem:[%s3190_s1 + $0x108] sm:$0xff]  ;;  %v2238_v60 = vld [vmem:[%s3190_s1 + $0x80] sm:$0xff]  ;;  %v2277_v2 = vld [vmem:[%s3190_s1 + $0x1b8] sm:$0xff] }
  0x13   :  { %2355 = vmatpush.bf16.msra.mxu3 %v2225_v4  ;;  %1045 = vmatpush.bf16.msra.mxu0 %v2225_v4  ;;  %v2230_v61 = vld [vmem:[%s3190_s1 + $0x40] sm:$0xff]  ;;  %v1578_v1 = vld [vmem:[%s3191_s0 + $0x24] sm:$0xf0]  ;;  %v2269_v3 = vld [vmem:[%s3190_s1 + $0x178] sm:$0xff] }
  0x14   :  { %v2150_v62 = vld [vmem:[%s3191_s0 + $0x4] sm:$0xf]  ;;  %v1584_v4 = vld [vmem:[%s3191_s0 + $0x8] sm:$0xf]  ;;  %v1592_v8 = vld [vmem:[%s3191_s0 + $0x10] sm:$0xf] }
  0x15   :  { %v2246_v63 = vld [vmem:[%s3190_s1 + $0xc0] sm:$0xff]  ;;  %v2156_v9 = vld [vmem:[%s3191_s0 + $0x30] sm:$0xf0]  ;;  %v2285_v10 = vld [vmem:[%s3190_s1 + $0x1f8] sm:$0xff]  ;;  %v1581_v12 = vor.u32 %v2150_v62, %v1578_v1 }
  0x16   :  { %2356 = vmatpush.bf16.msra.mxu1 %v2224_v5  ;;  %2357 = vmatpush.bf16.msra.mxu2 %v2224_v5  ;;  %v2254_v0 = vld [vmem:[%s3190_s1 + $0x100] sm:$0xff]  ;;  %v2293_v11 = vld [vmem:[%s3190_s1 + $0x238] sm:$0xff]  ;;  %v1593_v15 = vor.u32 %v2156_v9, %v1592_v8  ;;  %v2168_v40 = vld [vmem:[%s3191_s0 + $0x94] sm:$0xf] }
  0x17   :  { %2358 = vmatpush.bf16.msra.mxu3 %v2224_v5  ;;  %1046 = vmatpush.bf16.msra.mxu0 %v2224_v5  ;;  %v2155_v5 = vld [vmem:[%s3191_s0 + $0x28] sm:$0xf0]  ;;  %v2274_v36 = vld [vmem:[%s3190_s1 + $0x1a0] sm:$0xff]  ;;  %v1650_v41 = vld [vmem:[%s3191_s0 + $0xb4] sm:$0xf0] }
  0x18   :  { %v1585_v13 = vor.u32 %v2155_v5, %v1584_v4  ;;  %v2282_v37 = vld [vmem:[%s3190_s1 + $0x1e0] sm:$0xff]  ;;  %v1656_v42 = vld [vmem:[%s3191_s0 + $0x98] sm:$0xf]  ;;  %v2173_v43 = vld [vmem:[%s3191_s0 + $0xb8] sm:$0xf0] }
  0x19   :  { %v2266_v38 = vld [vmem:[%s3190_s1 + $0x160] sm:$0xff]  ;;  %v1700_v62 = vld [vmem:[%s3191_s0 + $0xe8] sm:$0xf]  ;;  %v2272_v4 = vld [vmem:[%s3190_s1 + $0x190] sm:$0xff] }
  0x1a   :  { %2359 = vmatpush.bf16.msra.mxu1 %v2223_v6  ;;  %2360 = vmatpush.bf16.msra.mxu2 %v2223_v6  ;;  %v2290_v39 = vld [vmem:[%s3190_s1 + $0x220] sm:$0xff]  ;;  %v2280_v5 = vld [vmem:[%s3190_s1 + $0x1d0] sm:$0xff]  ;;  %v1722_v9 = vld [vmem:[%s3191_s0 + $0x144] sm:$0xf0] }
  0x1b   :  { %2361 = vmatpush.bf16.msra.mxu3 %v2223_v6  ;;  %1047 = vmatpush.bf16.msra.mxu0 %v2223_v6  ;;  %v2151_v6 = vld [vmem:[%s3191_s0 + $0xc] sm:$0xf]  ;;  %v2186_v8 = vld [vmem:[%s3191_s0 + $0x124] sm:$0xf] }
  0x1e   :  { %2362 = vmatpush.bf16.msra.mxu1 %v2222_v7  ;;  %2363 = vmatpush.bf16.msra.mxu2 %v2222_v7 }
  0x1f   :  { %2364 = vmatpush.bf16.msra.mxu3 %v2222_v7  ;;  %1048 = vmatpush.bf16.msra.mxu0 %v2222_v7  ;;  %v1586_v7 = vld [vmem:[%s3191_s0 + $0x2c] sm:$0xf0] }
  0x20   :  { %v1589_v14 = vor.u32 %v2151_v6, %v1586_v7  ;;  %v2264_v6 = vld [vmem:[%s3190_s1 + $0x150] sm:$0xff] }
  0x21   :  { %1059 = vmatmul.bf16.vlgmr.msra.gmra.mxu1 %v1649_v18  ;;  %1069 = vmatmul.bf16.vlgmr.msra.gmra.mxu2 %v1721_v19  ;;  %v2284_v18 = vld [vmem:[%s3190_s1 + $0x1f0] sm:$0xff] }
  0x22   :  { %1139 = vmatpush.bf16.msrb.mxu2 %v2245_v16  ;;  %1090 = vmatpush.bf16.msrb.mxu1 %v2237_v17  ;;  %v2276_v16 = vld [vmem:[%s3190_s1 + $0x1b0] sm:$0xff] }
  0x23   :  { %1079 = vmatmul.bf16.vlgmr.msra.gmra.mxu3 %v1793_v20  ;;  %1049 = vmatmul.bf16.vlgmr.msra.gmra.mxu0 %v1577_v21  ;;  %v2268_v17 = vld [vmem:[%s3190_s1 + $0x170] sm:$0xff]  ;;  %v2275_v20 = vld [vmem:[%s3190_s1 + $0x1a8] sm:$0xff] }
  0x24   :  { %1188 = vmatpush.bf16.msrb.mxu3 %v2253_v22  ;;  %1237 = vmatpush.bf16.msrb.mxu0 %v2261_v23  ;;  %v2292_v19 = vld [vmem:[%s3190_s1 + $0x230] sm:$0xff]  ;;  %v2267_v21 = vld [vmem:[%s3190_s1 + $0x168] sm:$0xff] }
  0x25   :  { %v2283_v22 = vld [vmem:[%s3190_s1 + $0x1e8] sm:$0xff]  ;;  %v2288_v7 = vld [vmem:[%s3190_s1 + $0x210] sm:$0xff] }
  0x26   :  { %1140 = vmatpush.bf16.msrb.mxu2 %v2244_v24  ;;  %1091 = vmatpush.bf16.msrb.mxu1 %v2236_v25  ;;  %v2291_v23 = vld [vmem:[%s3190_s1 + $0x228] sm:$0xff]  ;;  %v1614_v25 = vld [vmem:[%s3191_s0 + $0x6c] sm:$0xf0] }
  0x27   :  { %v2159_v24 = vld [vmem:[%s3191_s0 + $0x4c] sm:$0xf] }
  0x28   :  { %1189 = vmatpush.bf16.msrb.mxu3 %v2252_v26  ;;  %1238 = vmatpush.bf16.msrb.mxu0 %v2260_v27  ;;  %v1620_v26 = vld [vmem:[%s3191_s0 + $0x50] sm:$0xf]  ;;  %v2164_v27 = vld [vmem:[%s3191_s0 + $0x70] sm:$0xf0] }
  0x2a   :  { %1141 = vmatpush.bf16.msrb.mxu2 %v2243_v28  ;;  %1092 = vmatpush.bf16.msrb.mxu1 %v2235_v29  ;;  %v2160_v28 = vld [vmem:[%s3191_s0 + $0x54] sm:$0xf]  ;;  %v1622_v29 = vld [vmem:[%s3191_s0 + $0x74] sm:$0xf0] }
  0x2c   :  { %1190 = vmatpush.bf16.msrb.mxu3 %v2251_v30  ;;  %1239 = vmatpush.bf16.msrb.mxu0 %v2259_v31  ;;  %v1628_v30 = vld [vmem:[%s3191_s0 + $0x58] sm:$0xf]  ;;  %v2165_v31 = vld [vmem:[%s3191_s0 + $0x78] sm:$0xf0] }
  0x2e   :  { %1142 = vmatpush.bf16.msrb.mxu2 %v2242_v32  ;;  %1093 = vmatpush.bf16.msrb.mxu1 %v2234_v33  ;;  %v1617_v32 = vor.u32 %v2159_v24, %v1614_v25  ;;  %v1621_v33 = vor.u32 %v2164_v27, %v1620_v26  ;;  %v2195_v24 = vld [vmem:[%s3191_s0 + $0x16c] sm:$0xf]  ;;  %v1758_v25 = vld [vmem:[%s3191_s0 + $0x18c] sm:$0xf0]  ;;  %v2200_v27 = vld [vmem:[%s3191_s0 + $0x190] sm:$0xf0] }
  0x2f   :  { %v1764_v26 = vld [vmem:[%s3191_s0 + $0x170] sm:$0xf] }
  0x30   :  { %1191 = vmatpush.bf16.msrb.mxu3 %v2250_v34  ;;  %1240 = vmatpush.bf16.msrb.mxu0 %v2258_v35  ;;  %v1625_v34 = vor.u32 %v2160_v28, %v1622_v29  ;;  %v1629_v35 = vor.u32 %v2165_v31, %v1628_v30  ;;  %v2196_v28 = vld [vmem:[%s3191_s0 + $0x174] sm:$0xf]  ;;  %v1766_v29 = vld [vmem:[%s3191_s0 + $0x194] sm:$0xf0]  ;;  %v2201_v31 = vld [vmem:[%s3191_s0 + $0x198] sm:$0xf0] }
  0x31   :  { %1064 = vmatmul.bf16.gmra.mxu1 %v1685_v46  ;;  %1074 = vmatmul.bf16.gmra.mxu2 %v1757_v47  ;;  %v1664_v46 = vld [vmem:[%s3191_s0 + $0xa0] sm:$0xf]  ;;  %v2174_v47 = vld [vmem:[%s3191_s0 + $0xc0] sm:$0xf0]  ;;  %v1772_v30 = vld [vmem:[%s3191_s0 + $0x178] sm:$0xf] }
  0x32   :  { %1143 = vmatpush.bf16.msrb.mxu2 %v2241_v44  ;;  %1094 = vmatpush.bf16.msrb.mxu1 %v2233_v45  ;;  %v2169_v44 = vld [vmem:[%s3191_s0 + $0x9c] sm:$0xf]  ;;  %v1658_v45 = vld [vmem:[%s3191_s0 + $0xbc] sm:$0xf0] }
  0x33   :  { %1084 = vmatmul.bf16.gmra.mxu3 %v1829_v48  ;;  %1054 = vmatmul.bf16.gmra.mxu0 %v1613_v49  ;;  %v1653_v48 = vor.u32 %v2168_v40, %v1650_v41  ;;  %v1657_v49 = vor.u32 %v2173_v43, %v1656_v42  ;;  %v2204_v40 = vld [vmem:[%s3191_s0 + $0x1b4] sm:$0xf]  ;;  %v1794_v41 = vld [vmem:[%s3191_s0 + $0x1d4] sm:$0xf0]  ;;  %v2209_v43 = vld [vmem:[%s3191_s0 + $0x1d8] sm:$0xf0] }
  0x34   :  { %1192 = vmatpush.bf16.msrb.mxu3 %v2249_v50  ;;  %1241 = vmatpush.bf16.msrb.mxu0 %v2257_v51  ;;  %v1661_v50 = vor.u32 %v2169_v44, %v1658_v45  ;;  %v1665_v51 = vor.u32 %v2174_v47, %v1664_v46  ;;  %v1800_v42 = vld [vmem:[%s3191_s0 + $0x1b8] sm:$0xf]  ;;  %v2205_v44 = vld [vmem:[%s3191_s0 + $0x1bc] sm:$0xf]  ;;  %v1802_v45 = vld [vmem:[%s3191_s0 + $0x1dc] sm:$0xf0] }
  0x35   :  { %v1808_v46 = vld [vmem:[%s3191_s0 + $0x1c0] sm:$0xf]  ;;  %v2210_v47 = vld [vmem:[%s3191_s0 + $0x1e0] sm:$0xf0] }
  0x36   :  { %1144 = vmatpush.bf16.msrb.mxu2 %v2240_v52  ;;  %1095 = vmatpush.bf16.msrb.mxu1 %v2232_v53  ;;  %v2273_v52 = vld [vmem:[%s3190_s1 + $0x198] sm:$0xff] }
  0x37   :  { %v2281_v53 = vld [vmem:[%s3190_s1 + $0x1d8] sm:$0xff] }
  0x38   :  { %1193 = vmatpush.bf16.msrb.mxu3 %v2248_v54  ;;  %1242 = vmatpush.bf16.msrb.mxu0 %v2256_v55  ;;  %v2265_v54 = vld [vmem:[%s3190_s1 + $0x158] sm:$0xff] }
  0x39   :  { %v2289_v55 = vld [vmem:[%s3190_s1 + $0x218] sm:$0xff] }
  0x3a   :  { %1145 = vmatpush.bf16.msrb.mxu2 %v2239_v56  ;;  %1096 = vmatpush.bf16.msrb.mxu1 %v2231_v57  ;;  %v2177_v56 = vld [vmem:[%s3191_s0 + $0xdc] sm:$0xf]  ;;  %v1686_v57 = vld [vmem:[%s3191_s0 + $0xfc] sm:$0xf0] }
  0x3c   :  { %1194 = vmatpush.bf16.msrb.mxu3 %v2247_v58  ;;  %1243 = vmatpush.bf16.msrb.mxu0 %v2255_v59  ;;  %v1692_v58 = vld [vmem:[%s3191_s0 + $0xe0] sm:$0xf]  ;;  %v2182_v59 = vld [vmem:[%s3191_s0 + $0x100] sm:$0xf0] }
  0x3d   :  { %v1693_v1 = vor.u32 %v2182_v59, %v1692_v58  ;;  %v2213_v58 = vld [vmem:[%s3191_s0 + $0x1fc] sm:$0xf]  ;;  %v1830_v59 = vld [vmem:[%s3191_s0 + $0x21c] sm:$0xf0] }
  0x3e   :  { %1146 = vmatpush.bf16.msrb.mxu2 %v2238_v60  ;;  %1097 = vmatpush.bf16.msrb.mxu1 %v2230_v61  ;;  %v2178_v60 = vld [vmem:[%s3191_s0 + $0xe4] sm:$0xf]  ;;  %v1694_v61 = vld [vmem:[%s3191_s0 + $0x104] sm:$0xf0] }
  0x40   :  { %1195 = vmatpush.bf16.msrb.mxu3 %v2246_v63  ;;  %1244 = vmatpush.bf16.msrb.mxu0 %v2254_v0  ;;  %v2183_v63 = vld [vmem:[%s3191_s0 + $0x108] sm:$0xf0]  ;;  %v1689_v0 = vor.u32 %v2177_v56, %v1686_v57 }
  0x41   :  { %1098 = vmatmul.bf16.vlgmr.msrb.gmra.mxu1 %v1581_v12  ;;  %1147 = vmatmul.bf16.vlgmr.msrb.gmra.mxu2 %v1585_v13  ;;  %v2187_v12 = vld [vmem:[%s3191_s0 + $0x12c] sm:$0xf]  ;;  %v1730_v13 = vld [vmem:[%s3191_s0 + $0x14c] sm:$0xf0] }
  0x42   :  { %1335 = vmatpush.bf16.msra.mxu2 %v2277_v2  ;;  %1286 = vmatpush.bf16.msra.mxu1 %v2269_v3  ;;  %v1697_v2 = vor.u32 %v2178_v60, %v1694_v61  ;;  %v1701_v3 = vor.u32 %v2183_v63, %v1700_v62  ;;  %v1836_v60 = vld [vmem:[%s3191_s0 + $0x200] sm:$0xf]  ;;  %v2218_v61 = vld [vmem:[%s3191_s0 + $0x220] sm:$0xf0]  ;;  %v1838_v63 = vld [vmem:[%s3191_s0 + $0x224] sm:$0xf0] }
  0x43   :  { %1196 = vmatmul.bf16.vlgmr.msrb.gmra.mxu3 %v1589_v14  ;;  %1245 = vmatmul.bf16.vlgmr.msrb.gmra.mxu0 %v1593_v15  ;;  %v1736_v14 = vld [vmem:[%s3191_s0 + $0x130] sm:$0xf]  ;;  %v2192_v15 = vld [vmem:[%s3191_s0 + $0x150] sm:$0xf0]  ;;  %v2214_v62 = vld [vmem:[%s3191_s0 + $0x204] sm:$0xf] }
  0x44   :  { %1384 = vmatpush.bf16.msra.mxu3 %v2285_v10  ;;  %1433 = vmatpush.bf16.msra.mxu0 %v2293_v11  ;;  %v1728_v10 = vld [vmem:[%s3191_s0 + $0x128] sm:$0xf]  ;;  %v2191_v11 = vld [vmem:[%s3191_s0 + $0x148] sm:$0xf0] }
  0x46   :  { %1336 = vmatpush.bf16.msra.mxu2 %v2276_v16  ;;  %1287 = vmatpush.bf16.msra.mxu1 %v2268_v17  ;;  %v1725_v16 = vor.u32 %v2186_v8, %v1722_v9  ;;  %v1729_v17 = vor.u32 %v2191_v11, %v1728_v10 }
  0x48   :  { %1385 = vmatpush.bf16.msra.mxu3 %v2284_v18  ;;  %1434 = vmatpush.bf16.msra.mxu0 %v2292_v19  ;;  %v1733_v18 = vor.u32 %v2187_v12, %v1730_v13  ;;  %v1737_v19 = vor.u32 %v2192_v15, %v1736_v14  ;;  %v2152_v14 = vld [vmem:[%s3191_s0 + $0x14] sm:$0xf]  ;;  %v1594_v15 = vld [vmem:[%s3191_s0 + $0x34] sm:$0xf0] }
  0x4a   :  { %1337 = vmatpush.bf16.msra.mxu2 %v2275_v20  ;;  %1288 = vmatpush.bf16.msra.mxu1 %v2267_v21  ;;  %v2271_v20 = vld [vmem:[%s3190_s1 + $0x188] sm:$0xff] }
  0x4b   :  { %v2279_v21 = vld [vmem:[%s3190_s1 + $0x1c8] sm:$0xff] }
  0x4c   :  { %1386 = vmatpush.bf16.msra.mxu3 %v2283_v22  ;;  %1435 = vmatpush.bf16.msra.mxu0 %v2291_v23  ;;  %v2263_v22 = vld [vmem:[%s3190_s1 + $0x148] sm:$0xff] }
  0x4d   :  { %v2287_v23 = vld [vmem:[%s3190_s1 + $0x208] sm:$0xff] }
  0x4e   :  { %1338 = vmatpush.bf16.msra.mxu2 %v2274_v36  ;;  %1289 = vmatpush.bf16.msra.mxu1 %v2266_v38  ;;  %v2270_v36 = vld [vmem:[%s3190_s1 + $0x180] sm:$0xff] }
  0x4f   :  { %v2262_v38 = vld [vmem:[%s3190_s1 + $0x140] sm:$0xff] }
  0x50   :  { %1387 = vmatpush.bf16.msra.mxu3 %v2282_v37  ;;  %1436 = vmatpush.bf16.msra.mxu0 %v2290_v39  ;;  %v2278_v37 = vld [vmem:[%s3190_s1 + $0x1c0] sm:$0xff] }
  0x51   :  { %1103 = vmatmul.bf16.gmra.mxu1 %v1617_v32  ;;  %1152 = vmatmul.bf16.gmra.mxu2 %v1621_v33  ;;  %v1761_v32 = vor.u32 %v2195_v24, %v1758_v25  ;;  %v1765_v33 = vor.u32 %v2200_v27, %v1764_v26  ;;  %v2286_v39 = vld [vmem:[%s3190_s1 + $0x200] sm:$0xff]  ;;  %v1597_v24 = vor.u32 %v2152_v14, %v1594_v15 }
  0x52   :  { %1339 = vmatpush.bf16.msra.mxu2 %v2273_v52  ;;  %1290 = vmatpush.bf16.msra.mxu1 %v2265_v54  ;;  %v1809_v52 = vor.u32 %v2210_v47, %v1808_v46  ;;  %v2167_v46 = vld [vmem:[%s3191_s0 + $0x88] sm:$0xf0]  ;;  %v2170_v14 = vld [vmem:[%s3191_s0 + $0xa4] sm:$0xf] }
  0x53   :  { %1201 = vmatmul.bf16.gmra.mxu3 %v1625_v34  ;;  %1250 = vmatmul.bf16.gmra.mxu0 %v1629_v35  ;;  %v1769_v34 = vor.u32 %v2196_v28, %v1766_v29  ;;  %v1773_v35 = vor.u32 %v2201_v31, %v1772_v30 }
  0x54   :  { %1388 = vmatpush.bf16.msra.mxu3 %v2281_v53  ;;  %1437 = vmatpush.bf16.msra.mxu0 %v2289_v55 }
  0x56   :  { %1340 = vmatpush.bf16.msra.mxu2 %v2272_v4  ;;  %1291 = vmatpush.bf16.msra.mxu1 %v2264_v6  ;;  %v1833_v4 = vor.u32 %v2213_v58, %v1830_v59 }
  0x58   :  { %1389 = vmatpush.bf16.msra.mxu3 %v2280_v5  ;;  %1438 = vmatpush.bf16.msra.mxu0 %v2288_v7  ;;  %v1837_v5 = vor.u32 %v2218_v61, %v1836_v60  ;;  %v1841_v7 = vor.u32 %v2214_v62, %v1838_v63 }
  0x5a   :  { %1341 = vmatpush.bf16.msra.mxu2 %v2271_v20  ;;  %1292 = vmatpush.bf16.msra.mxu1 %v2263_v22  ;;  %v1608_v20 = vld [vmem:[%s3191_s0 + $0x20] sm:$0xf] }
  0x5c   :  { %1390 = vmatpush.bf16.msra.mxu3 %v2279_v21  ;;  %1439 = vmatpush.bf16.msra.mxu0 %v2287_v23  ;;  %v2158_v21 = vld [vmem:[%s3191_s0 + $0x40] sm:$0xf0] }
  0x5d   :  { %v1609_v28 = vor.u32 %v2158_v21, %v1608_v20  ;;  %v2176_v20 = vld [vmem:[%s3191_s0 + $0xd0] sm:$0xf0] }
  0x5e   :  { %1342 = vmatpush.bf16.msra.mxu2 %v2270_v36  ;;  %1293 = vmatpush.bf16.msra.mxu1 %v2262_v38  ;;  %v2161_v38 = vld [vmem:[%s3191_s0 + $0x5c] sm:$0xf] }
  0x60   :  { %1391 = vmatpush.bf16.msra.mxu3 %v2278_v37  ;;  %1440 = vmatpush.bf16.msra.mxu0 %v2286_v39  ;;  %v1630_v39 = vld [vmem:[%s3191_s0 + $0x7c] sm:$0xf0] }
  0x61   :  { %1108 = vmatmul.bf16.gmra.mxu1 %v1653_v48  ;;  %1157 = vmatmul.bf16.gmra.mxu2 %v1657_v49  ;;  %v1797_v48 = vor.u32 %v2204_v40, %v1794_v41  ;;  %v1801_v49 = vor.u32 %v2209_v43, %v1800_v42  ;;  %v1636_v41 = vld [vmem:[%s3191_s0 + $0x60] sm:$0xf]  ;;  %v2166_v42 = vld [vmem:[%s3191_s0 + $0x80] sm:$0xf0] }
  0x62   :  { %v2162_v43 = vld [vmem:[%s3191_s0 + $0x64] sm:$0xf] }
  0x63   :  { %1206 = vmatmul.bf16.gmra.mxu3 %v1661_v50  ;;  %1255 = vmatmul.bf16.gmra.mxu0 %v1665_v51  ;;  %v1805_v51 = vor.u32 %v2205_v44, %v1802_v45  ;;  %v1638_v44 = vld [vmem:[%s3191_s0 + $0x84] sm:$0xf0] }
  0x64   :  { %v1644_v45 = vld [vmem:[%s3191_s0 + $0x68] sm:$0xf] }
  0x65   :  { %v1645_v58 = vor.u32 %v2167_v46, %v1644_v45  ;;  %v1708_v45 = vld [vmem:[%s3191_s0 + $0xf0] sm:$0xf]  ;;  %v2184_v46 = vld [vmem:[%s3191_s0 + $0x110] sm:$0xf0] }
  0x71   :  { %1113 = vmatmul.bf16.gmra.mxu1 %v1689_v0  ;;  %1162 = vmatmul.bf16.gmra.mxu2 %v1693_v1  ;;  %v1844_v0 = vld [vmem:[%s3191_s0 + $0x208] sm:$0xf]  ;;  %v2219_v1 = vld [vmem:[%s3191_s0 + $0x228] sm:$0xf0] }
  0x72   :  { %v1845_v8 = vor.u32 %v2219_v1, %v1844_v0 }
  0x73   :  { %1211 = vmatmul.bf16.gmra.mxu3 %v1697_v2  ;;  %1260 = vmatmul.bf16.gmra.mxu0 %v1701_v3 }
  0x81   :  { %1118 = vmatmul.bf16.gmra.mxu1 %v1725_v16  ;;  %1167 = vmatmul.bf16.gmra.mxu2 %v1729_v17  ;;  %v1600_v16 = vld [vmem:[%s3191_s0 + $0x18] sm:$0xf]  ;;  %v2157_v17 = vld [vmem:[%s3191_s0 + $0x38] sm:$0xf0] }
  0x82   :  { %v1601_v25 = vor.u32 %v2157_v17, %v1600_v16  ;;  %v1672_v16 = vld [vmem:[%s3191_s0 + $0xa8] sm:$0xf]  ;;  %v2175_v17 = vld [vmem:[%s3191_s0 + $0xc8] sm:$0xf0] }
  0x83   :  { %1216 = vmatmul.bf16.gmra.mxu3 %v1733_v18  ;;  %1265 = vmatmul.bf16.gmra.mxu0 %v1737_v19  ;;  %v2153_v18 = vld [vmem:[%s3191_s0 + $0x1c] sm:$0xf]  ;;  %v1602_v19 = vld [vmem:[%s3191_s0 + $0x3c] sm:$0xf0] }
  0x84   :  { %v1605_v27 = vor.u32 %v2153_v18, %v1602_v19  ;;  %v1674_v18 = vld [vmem:[%s3191_s0 + $0xcc] sm:$0xf0] }
  0x85   :  { %v1680_v19 = vld [vmem:[%s3191_s0 + $0xb0] sm:$0xf] }
  0x91   :  { %1123 = vmatmul.bf16.gmra.mxu1 %v1761_v32  ;;  %1172 = vmatmul.bf16.gmra.mxu2 %v1765_v33 }
  0x93   :  { %1221 = vmatmul.bf16.gmra.mxu3 %v1769_v34  ;;  %1270 = vmatmul.bf16.gmra.mxu0 %v1773_v35 }
  0x9e   :  { %v2824_v50 = vpop.f32.mrf.mxu1 }
  0xa0   :  { %v1050_v53 = vpop.f32.mrf.mxu0 }
  0xa1   :  { %1128 = vmatmul.bf16.gmra.mxu1 %v1797_v48  ;;  %1177 = vmatmul.bf16.gmra.mxu2 %v1801_v49 }
  0xa3   :  { %1226 = vmatmul.bf16.gmra.mxu3 %v1805_v51  ;;  %1275 = vmatmul.bf16.gmra.mxu0 %v1809_v52  ;;  %v1633_v51 = vor.u32 %v2161_v38, %v1630_v39  ;;  %v1637_v52 = vor.u32 %v2166_v42, %v1636_v41 }
  0xa4   :  { %v2826_v54 = vpop.f32.mrf.mxu2 }
  0xa6   :  { %v2828_v55 = vpop.f32.mrf.mxu3  ;;  %v2830_v56 = vpop.f32.mrf.mxu1 }
  0xa8   :  { %v1052_v57 = vpop.f32.mrf.mxu0 }
  0xac   :  { %v2856_v2 = vpop.f32.mrf.mxu2 }
  0xae   :  { %v2858_v3 = vpop.f32.mrf.mxu3  ;;  %v2860_v6 = vpop.f32.mrf.mxu1 }
  0xb0   :  { %v1055_v9 = vpop.f32.mrf.mxu0 }
  0xb1   :  { %1133 = vmatmul.bf16.gmra.mxu1 %v1833_v4  ;;  %1182 = vmatmul.bf16.gmra.mxu2 %v1837_v5 }
  0xb3   :  { %1231 = vmatmul.bf16.gmra.mxu3 %v1841_v7  ;;  %1280 = vmatmul.bf16.gmra.mxu0 %v1845_v8 }
  0xb4   :  { %v2862_v10 = vpop.f32.mrf.mxu2 }
  0xb6   :  { %v2864_v11 = vpop.f32.mrf.mxu3  ;;  %v2866_v12 = vpop.f32.mrf.mxu1 }
  0xb8   :  { %v1057_v13 = vpop.f32.mrf.mxu0 }
  0xbc   :  { %v2892_v22 = vpop.f32.mrf.mxu2 }
  0xbe   :  { %v2894_v23 = vpop.f32.mrf.mxu3  ;;  %v1099_v26 = vpop.f32.mrf.mxu1 }
  0xbf   :  { %v1100_v29 = vadd.f32 %v1099_v26, %v1050_v53 }
  0xc0   :  { %v1246_v30 = vpop.f32.mrf.mxu0 }
  0xc1   :  { %1294 = vmatmul.bf16.vlgmr.msra.gmra.mxu1 %v1597_v24  ;;  %1343 = vmatmul.bf16.vlgmr.msra.gmra.mxu2 %v1601_v25 }
  0xc3   :  { %1392 = vmatmul.bf16.vlgmr.msra.gmra.mxu3 %v1605_v27  ;;  %1441 = vmatmul.bf16.vlgmr.msra.gmra.mxu0 %v1609_v28  ;;  %v1673_v27 = vor.u32 %v2175_v17, %v1672_v16 }
  0xc4   :  { %v1148_v31 = vpop.f32.mrf.mxu2 }
  0xc5   :  { %v1149_v32 = vadd.f32 %v1148_v31, %v1100_v29 }
  0xc6   :  { %v1197_v33 = vpop.f32.mrf.mxu3  ;;  %v1101_v34 = vpop.f32.mrf.mxu1 }
  0xc7   :  { %v1198_v35 = vadd.f32 %v1197_v33, %v1149_v32  ;;  %v1102_v36 = vadd.f32 %v1101_v34, %v1052_v57  ;;  %v1641_v57 = vor.u32 %v2162_v43, %v1638_v44  ;;  %v2179_v43 = vld [vmem:[%s3191_s0 + $0xec] sm:$0xf] }
  0xc8   :  { %v1248_v37 = vpop.f32.mrf.mxu0 }
  0xc9   :  { %v2902_v40 = vadd.f32 %v1246_v30, %v1198_v35  ;;  %v1681_v30 = vor.u32 %v2176_v20, %v1680_v19  ;;  %v1744_v19 = vld [vmem:[%s3191_s0 + $0x138] sm:$0xf]  ;;  %v2193_v20 = vld [vmem:[%s3191_s0 + $0x158] sm:$0xf0] }
  0xcc   :  { %v1150_v47 = vpop.f32.mrf.mxu2 }
  0xcd   :  { %v1151_v48 = vadd.f32 %v1150_v47, %v1102_v36  ;;  %v1710_v47 = vld [vmem:[%s3191_s0 + $0x114] sm:$0xf0] }
  0xce   :  { %v1199_v49 = vpop.f32.mrf.mxu3  ;;  %v1104_v53 = vpop.f32.mrf.mxu1 }
  0xcf   :  { %v1200_v59 = vadd.f32 %v1199_v49, %v1151_v48  ;;  %v1105_v60 = vadd.f32 %v1104_v53, %v1055_v9  ;;  %v1666_v9 = vld [vmem:[%s3191_s0 + $0xc4] sm:$0xf0]  ;;  %v1716_v48 = vld [vmem:[%s3191_s0 + $0xf8] sm:$0xf]  ;;  %v2185_v49 = vld [vmem:[%s3191_s0 + $0x118] sm:$0xf0] }
  0xd0   :  { %v1251_v61 = vpop.f32.mrf.mxu0  ;;  %v1669_v26 = vor.u32 %v2170_v14, %v1666_v9 }
  0xd1   :  { %1299 = vmatmul.bf16.gmra.mxu1 %v1633_v51  ;;  %1348 = vmatmul.bf16.gmra.mxu2 %v1637_v52  ;;  %v2922_v62 = vadd.f32 %v1248_v37, %v1200_v59 }
  0xd3   :  { %1397 = vmatmul.bf16.gmra.mxu3 %v1641_v57  ;;  %1446 = vmatmul.bf16.gmra.mxu0 %v1645_v58  ;;  %v1709_v58 = vor.u32 %v2184_v46, %v1708_v45  ;;  %v2197_v46 = vld [vmem:[%s3191_s0 + $0x17c] sm:$0xf] }
  0xd4   :  { %v1153_v63 = vpop.f32.mrf.mxu2 }
  0xd5   :  { %v1154_v0 = vadd.f32 %v1153_v63, %v1105_v60 }
  0xd6   :  { %v1202_v1 = vpop.f32.mrf.mxu3  ;;  %v1106_v4 = vpop.f32.mrf.mxu1 }
  0xd7   :  { %v1203_v5 = vadd.f32 %v1202_v1, %v1154_v0  ;;  %v1107_v7 = vadd.f32 %v1106_v4, %v1057_v13  ;;  %v2171_v13 = vld [vmem:[%s3191_s0 + $0xac] sm:$0xf] }
  0xd8   :  { %v1253_v8 = vpop.f32.mrf.mxu0  ;;  %v1677_v29 = vor.u32 %v2171_v13, %v1674_v18  ;;  %v2188_v13 = vld [vmem:[%s3191_s0 + $0x134] sm:$0xf] }
  0xd9   :  { %v2930_v15 = vadd.f32 %v1251_v61, %v1203_v5  ;;  %v1717_v61 = vor.u32 %v2185_v49, %v1716_v48  ;;  %v2202_v48 = vld [vmem:[%s3191_s0 + $0x1a0] sm:$0xf0] }
  0xda   :  { %v2198_v49 = vld [vmem:[%s3191_s0 + $0x184] sm:$0xf] }
  0xdc   :  { %v1155_v21 = vpop.f32.mrf.mxu2 }
  0xdd   :  { %v1156_v24 = vadd.f32 %v1155_v21, %v1107_v7  ;;  %v1746_v21 = vld [vmem:[%s3191_s0 + $0x15c] sm:$0xf0] }
  0xde   :  { %v1204_v25 = vpop.f32.mrf.mxu3  ;;  %v1109_v28 = vpop.f32.mrf.mxu1 }
  0xdf   :  { %v1205_v31 = vadd.f32 %v1204_v25, %v1156_v24  ;;  %v1110_v32 = vadd.f32 %v1109_v28, %v2824_v50  ;;  %v1702_v50 = vld [vmem:[%s3191_s0 + $0x10c] sm:$0xf0]  ;;  %v1752_v24 = vld [vmem:[%s3191_s0 + $0x140] sm:$0xf]  ;;  %v2194_v25 = vld [vmem:[%s3191_s0 + $0x160] sm:$0xf0] }
  0xe0   :  { %v1256_v33 = vpop.f32.mrf.mxu0  ;;  %v1705_v57 = vor.u32 %v2179_v43, %v1702_v50 }
  0xe1   :  { %1304 = vmatmul.bf16.gmra.mxu1 %v1669_v26  ;;  %1353 = vmatmul.bf16.gmra.mxu2 %v1673_v27  ;;  %v2951_v34 = vadd.f32 %v1253_v8, %v1205_v31 }
  0xe3   :  { %1402 = vmatmul.bf16.gmra.mxu3 %v1677_v29  ;;  %1451 = vmatmul.bf16.gmra.mxu0 %v1681_v30  ;;  %v1745_v30 = vor.u32 %v2193_v20, %v1744_v19  ;;  %v2206_v20 = vld [vmem:[%s3191_s0 + $0x1c4] sm:$0xf] }
  0xe4   :  { %v1158_v35 = vpop.f32.mrf.mxu2 }
  0xe5   :  { %v1159_v36 = vadd.f32 %v1158_v35, %v1110_v32 }
  0xe6   :  { %v1207_v37 = vpop.f32.mrf.mxu3  ;;  %v1111_v38 = vpop.f32.mrf.mxu1 }
  0xe7   :  { %v1208_v39 = vadd.f32 %v1207_v37, %v1159_v36  ;;  %v1112_v41 = vadd.f32 %v1111_v38, %v2830_v56  ;;  %v2180_v56 = vld [vmem:[%s3191_s0 + $0xf4] sm:$0xf] }
  0xe8   :  { %v1258_v42 = vpop.f32.mrf.mxu0  ;;  %v1713_v60 = vor.u32 %v2180_v56, %v1710_v47  ;;  %v1774_v56 = vld [vmem:[%s3191_s0 + $0x19c] sm:$0xf0] }
  0xe9   :  { %v2960_v44 = vadd.f32 %v1256_v33, %v1208_v39  ;;  %v1753_v33 = vor.u32 %v2194_v25, %v1752_v24  ;;  %v2211_v24 = vld [vmem:[%s3191_s0 + $0x1e8] sm:$0xf0] }
  0xea   :  { %v2207_v25 = vld [vmem:[%s3191_s0 + $0x1cc] sm:$0xf] }
  0xec   :  { %v1160_v51 = vpop.f32.mrf.mxu2 }
  0xed   :  { %v1161_v52 = vadd.f32 %v1160_v51, %v1112_v41 }
  0xee   :  { %v1209_v53 = vpop.f32.mrf.mxu3  ;;  %v1114_v59 = vpop.f32.mrf.mxu1 }
  0xef   :  { %v1210_v63 = vadd.f32 %v1209_v53, %v1161_v52  ;;  %v1115_v0 = vadd.f32 %v1114_v59, %v2860_v6  ;;  %v1738_v6 = vld [vmem:[%s3191_s0 + $0x154] sm:$0xf0]  ;;  %v1782_v52 = vld [vmem:[%s3191_s0 + $0x1a4] sm:$0xf0] }
  0xf0   :  { %v1261_v1 = vpop.f32.mrf.mxu0  ;;  %v1741_v29 = vor.u32 %v2188_v13, %v1738_v6  ;;  %v1788_v53 = vld [vmem:[%s3191_s0 + $0x188] sm:$0xf] }
  0xf1   :  { %1309 = vmatmul.bf16.gmra.mxu1 %v1705_v57  ;;  %1358 = vmatmul.bf16.gmra.mxu2 %v1709_v58  ;;  %v2981_v4 = vadd.f32 %v1258_v42, %v1210_v63  ;;  %v2203_v57 = vld [vmem:[%s3191_s0 + $0x1a8] sm:$0xf0] }
  0xf3   :  { %1407 = vmatmul.bf16.gmra.mxu3 %v1713_v60  ;;  %1456 = vmatmul.bf16.gmra.mxu0 %v1717_v61  ;;  %v1777_v61 = vor.u32 %v2197_v46, %v1774_v56 }
  0xf4   :  { %v1163_v5 = vpop.f32.mrf.mxu2 }
  0xf5   :  { %v1164_v7 = vadd.f32 %v1163_v5, %v1115_v0 }
  0xf6   :  { %v1212_v8 = vpop.f32.mrf.mxu3  ;;  %v1116_v14 = vpop.f32.mrf.mxu1 }
  0xf7   :  { %v1213_v9 = vadd.f32 %v1212_v8, %v1164_v7  ;;  %v1117_v16 = vadd.f32 %v1116_v14, %v2866_v12  ;;  %v2189_v12 = vld [vmem:[%s3191_s0 + $0x13c] sm:$0xf] }
  0xf8   :  { %v1263_v17 = vpop.f32.mrf.mxu0  ;;  %v1749_v32 = vor.u32 %v2189_v12, %v1746_v21  ;;  %v1810_v12 = vld [vmem:[%s3191_s0 + $0x1e4] sm:$0xf0] }
  0xf9   :  { %v2990_v18 = vadd.f32 %v1261_v1, %v1213_v9  ;;  %v1785_v1 = vor.u32 %v2198_v49, %v1782_v52  ;;  %v2215_v49 = vld [vmem:[%s3191_s0 + $0x20c] sm:$0xf] }
  0xfc   :  { %v1165_v26 = vpop.f32.mrf.mxu2 }
  0xfd   :  { %v1166_v27 = vadd.f32 %v1165_v26, %v1117_v16 }
  0xfe   :  { %v1214_v28 = vpop.f32.mrf.mxu3  ;;  %v1119_v31 = vpop.f32.mrf.mxu1 }
  0xff   :  { %v1215_v35 = vadd.f32 %v1214_v28, %v1166_v27  ;;  %v1120_v38 = vadd.f32 %v1119_v31, %v2826_v54  ;;  %v1780_v54 = vld [vmem:[%s3191_s0 + $0x180] sm:$0xf]  ;;  %v1818_v27 = vld [vmem:[%s3191_s0 + $0x1ec] sm:$0xf0] }
 0x100   :  { %v1266_v36 = vpop.f32.mrf.mxu0  ;;  %v1781_v63 = vor.u32 %v2202_v48, %v1780_v54  ;;  %v1824_v28 = vld [vmem:[%s3191_s0 + $0x1d0] sm:$0xf] }
 0x101   :  { %1314 = vmatmul.bf16.gmra.mxu1 %v1741_v29  ;;  %1363 = vmatmul.bf16.gmra.mxu2 %v1745_v30  ;;  %v3010_v37 = vadd.f32 %v1263_v17, %v1215_v35  ;;  %v2212_v29 = vld [vmem:[%s3191_s0 + $0x1f0] sm:$0xf0] }
 0x103   :  { %1412 = vmatmul.bf16.gmra.mxu3 %v1749_v32  ;;  %1461 = vmatmul.bf16.gmra.mxu0 %v1753_v33  ;;  %v1813_v33 = vor.u32 %v2206_v20, %v1810_v12 }
 0x104   :  { %v1168_v39 = vpop.f32.mrf.mxu2 }
 0x105   :  { %v1169_v41 = vadd.f32 %v1168_v39, %v1120_v38  ;;  %v1821_v38 = vor.u32 %v2207_v25, %v1818_v27 }
 0x106   :  { %v1217_v42 = vpop.f32.mrf.mxu3  ;;  %v1121_v43 = vpop.f32.mrf.mxu1 }
 0x107   :  { %v1218_v50 = vadd.f32 %v1217_v42, %v1169_v41  ;;  %v1122_v51 = vadd.f32 %v1121_v43, %v2856_v2  ;;  %v1789_v2 = vor.u32 %v2203_v57, %v1788_v53  ;;  %v2220_v53 = vld [vmem:[%s3191_s0 + $0x230] sm:$0xf0] }
 0x108   :  { %v1268_v45 = vpop.f32.mrf.mxu0  ;;  %v2216_v57 = vld [vmem:[%s3191_s0 + $0x214] sm:$0xf] }
 0x109   :  { %v3019_v47 = vadd.f32 %v1266_v36, %v1218_v50 }
 0x10c   :  { %v1170_v58 = vpop.f32.mrf.mxu2 }
 0x10d   :  { %v1171_v59 = vadd.f32 %v1170_v58, %v1122_v51  ;;  %v1846_v51 = vld [vmem:[%s3191_s0 + $0x22c] sm:$0xf0] }
 0x10e   :  { %v1219_v60 = vpop.f32.mrf.mxu3  ;;  %v1124_v0 = vpop.f32.mrf.mxu1 }
 0x10f   :  { %v1220_v5 = vadd.f32 %v1219_v60, %v1171_v59  ;;  %v1125_v14 = vadd.f32 %v1124_v0, %v2862_v10  ;;  %v1816_v10 = vld [vmem:[%s3191_s0 + $0x1c8] sm:$0xf]  ;;  %v1854_v59 = vld [vmem:[%s3191_s0 + $0x234] sm:$0xf0] }
 0x110   :  { %v1271_v7 = vpop.f32.mrf.mxu0  ;;  %v1817_v35 = vor.u32 %v2211_v24, %v1816_v10  ;;  %v1860_v60 = vld [vmem:[%s3191_s0 + $0x218] sm:$0xf] }
 0x111   :  { %1319 = vmatmul.bf16.gmra.mxu1 %v1777_v61  ;;  %1368 = vmatmul.bf16.gmra.mxu2 %v1781_v63  ;;  %v3040_v8 = vadd.f32 %v1268_v45, %v1220_v5  ;;  %v2221_v61 = vld [vmem:[%s3191_s0 + $0x238] sm:$0xf0] }
 0x113   :  { %1417 = vmatmul.bf16.gmra.mxu3 %v1785_v1  ;;  %1466 = vmatmul.bf16.gmra.mxu0 %v1789_v2  ;;  %v1849_v2 = vor.u32 %v2215_v49, %v1846_v51 }
 0x114   :  { %v1173_v9 = vpop.f32.mrf.mxu2 }
 0x115   :  { %v1174_v16 = vadd.f32 %v1173_v9, %v1125_v14  ;;  %v1857_v14 = vor.u32 %v2216_v57, %v1854_v59 }
 0x116   :  { %v1222_v17 = vpop.f32.mrf.mxu3  ;;  %v1126_v13 = vpop.f32.mrf.mxu1 }
 0x117   :  { %v1223_v6 = vadd.f32 %v1222_v17, %v1174_v16  ;;  %v1127_v26 = vadd.f32 %v1126_v13, %v2892_v22  ;;  %v1825_v22 = vor.u32 %v2212_v29, %v1824_v28 }
 0x118   :  { %v1273_v19 = vpop.f32.mrf.mxu0 }
 0x119   :  { %v3049_v21 = vadd.f32 %v1271_v7, %v1223_v6 }
 0x11c   :  { %v1175_v30 = vpop.f32.mrf.mxu2 }
 0x11d   :  { %v1176_v31 = vadd.f32 %v1175_v30, %v1127_v26 }
 0x11e   :  { %v1224_v32 = vpop.f32.mrf.mxu3  ;;  %v1129_v36 = vpop.f32.mrf.mxu1 }
 0x11f   :  { %v1225_v39 = vadd.f32 %v1224_v32, %v1176_v31  ;;  %v1130_v43 = vadd.f32 %v1129_v36, %v2828_v55  ;;  %v1852_v55 = vld [vmem:[%s3191_s0 + $0x210] sm:$0xf] }
 0x120   :  { %v1276_v41 = vpop.f32.mrf.mxu0  ;;  %v1853_v5 = vor.u32 %v2220_v53, %v1852_v55 }
 0x121   :  { %1324 = vmatmul.bf16.gmra.mxu1 %v1813_v33  ;;  %1373 = vmatmul.bf16.gmra.mxu2 %v1817_v35  ;;  %v3070_v42 = vadd.f32 %v1273_v19, %v1225_v39 }
 0x123   :  { %1422 = vmatmul.bf16.gmra.mxu3 %v1821_v38  ;;  %1471 = vmatmul.bf16.gmra.mxu0 %v1825_v22 }
 0x124   :  { %v1178_v50 = vpop.f32.mrf.mxu2 }
 0x125   :  { %v1179_v45 = vadd.f32 %v1178_v50, %v1130_v43 }
 0x126   :  { %v1227_v46 = vpop.f32.mrf.mxu3  ;;  %v1131_v56 = vpop.f32.mrf.mxu1 }
 0x127   :  { %v1228_v54 = vadd.f32 %v1227_v46, %v1179_v45  ;;  %v1132_v58 = vadd.f32 %v1131_v56, %v2858_v3  ;;  %v1861_v3 = vor.u32 %v2221_v61, %v1860_v60 }
 0x128   :  { %v1278_v48 = vpop.f32.mrf.mxu0 }
 0x129   :  { %v3079_v52 = vadd.f32 %v1276_v41, %v1228_v54 }
 0x12c   :  { %v1180_v63 = vpop.f32.mrf.mxu2 }
 0x12d   :  { %v1181_v0 = vadd.f32 %v1180_v63, %v1132_v58 }
 0x12e   :  { %v1229_v1 = vpop.f32.mrf.mxu3  ;;  %v1134_v7 = vpop.f32.mrf.mxu1 }
 0x12f   :  { %v1230_v9 = vadd.f32 %v1229_v1, %v1181_v0  ;;  %v1135_v13 = vadd.f32 %v1134_v7, %v2864_v11 }
 0x130   :  { %v1281_v16 = vpop.f32.mrf.mxu0 }
 0x131   :  { %1329 = vmatmul.bf16.gmra.mxu1 %v1849_v2  ;;  %1378 = vmatmul.bf16.gmra.mxu2 %v1853_v5  ;;  %v3100_v17 = vadd.f32 %v1278_v48, %v1230_v9  ;;  %v3119_v48 = vld [vmem:[%s3193_s3] ss:$0 sm:$0xff] }
 0x133   :  { %1427 = vmatmul.bf16.gmra.mxu3 %v1857_v14  ;;  %1476 = vmatmul.bf16.gmra.mxu0 %v1861_v3 }
 0x134   :  { %v1183_v6 = vpop.f32.mrf.mxu2 }
 0x135   :  { %v1184_v19 = vadd.f32 %v1183_v6, %v1135_v13 }
 0x136   :  { %v1232_v20 = vpop.f32.mrf.mxu3  ;;  %v1136_v12 = vpop.f32.mrf.mxu1 }
 0x137   :  { %v1233_v10 = vadd.f32 %v1232_v20, %v1184_v19  ;;  %v1137_v26 = vadd.f32 %v1136_v12, %v2894_v23  ;;  %v3112_v23 = vld [vmem:[%s3192_s2] ss:$0 sm:$0xff] }
 0x138   :  { %v1283_v24 = vpop.f32.mrf.mxu0 }
 0x139   :  { %v3103_v25 = vadd.f32 %v1281_v16, %v1233_v10 }
 0x13c   :  { %v1185_v27 = vpop.f32.mrf.mxu2 }
 0x13d   :  { %v1186_v28 = vadd.f32 %v1185_v27, %v1137_v26 }
 0x13e   :  { %v1234_v29 = vpop.f32.mrf.mxu3  ;;  %v1295_v30 = vpop.f32.mrf.mxu1 }
 0x13f   :  { %v1235_v31 = vadd.f32 %v1234_v29, %v1186_v28  ;;  %v1296_v11 = vadd.f32 %v1295_v30, %v2902_v40 }
 0x140   :  { %v1442_v32 = vpop.f32.mrf.mxu0 }
 0x141   :  { %v3106_v33 = vadd.f32 %v1283_v24, %v1235_v31 }
 0x144   :  { %v1344_v35 = vpop.f32.mrf.mxu2 }
 0x145   :  { %v1345_v36 = vadd.f32 %v1344_v35, %v1296_v11 }
 0x146   :  { %v1393_v38 = vpop.f32.mrf.mxu3  ;;  %v1297_v22 = vpop.f32.mrf.mxu1 }
 0x147   :  { %v1394_v39 = vadd.f32 %v1393_v38, %v1345_v36  ;;  %v1298_v50 = vadd.f32 %v1297_v22, %v2922_v62 }
 0x148   :  { %v1444_v41 = vpop.f32.mrf.mxu0 }
 0x149   :  { %v1443_v43 = vadd.f32 %v1442_v32, %v1394_v39 }
 0x14b   :  { %v1486_v40 = vmul.f32 %v3112_v23, %v1443_v43 }
 0x14c   :  { %v1346_v45 = vpop.f32.mrf.mxu2 }
 0x14d   :  { %v1347_v46 = vadd.f32 %v1346_v45, %v1298_v50  ;;  %v1506_v53 = vadd.f32 %v3119_v48, %v1486_v40 }
 0x14e   :  { %v1395_v56 = vpop.f32.mrf.mxu3  ;;  %v1300_v54 = vpop.f32.mrf.mxu1 }
 0x14f   :  { %v1396_v49 = vadd.f32 %v1395_v56, %v1347_v46  ;;  %v1301_v62 = vadd.f32 %v1300_v54, %v2930_v15  ;;  %v1522_v0 = vmax.f32 %v1506_v53, 0.0 }
 0x150   :  { %v1447_v51 = vpop.f32.mrf.mxu0 }
 0x151   :  { %v1445_v55 = vadd.f32 %v1444_v41, %v1396_v49 }
 0x153   :  { %v1487_v57 = vmul.f32 %v3112_v23, %v1445_v55 }
 0x154   :  { %v1349_v58 = vpop.f32.mrf.mxu2 }
 0x155   :  { %v1507_v59 = vadd.f32 %v3119_v48, %v1487_v57  ;;  %v1350_v60 = vadd.f32 %v1349_v58, %v1301_v62 }
 0x156   :  { %v1398_v61 = vpop.f32.mrf.mxu3  ;;  %v1302_v63 = vpop.f32.mrf.mxu1 }
 0x157   :  { %v1523_v1 = vmax.f32 %v1507_v59, 0.0  ;;  %v1399_v2 = vadd.f32 %v1398_v61, %v1350_v60  ;;  %v1303_v3 = vadd.f32 %v1302_v63, %v2951_v34 }
 0x158   :  { %v1449_v5 = vpop.f32.mrf.mxu0 }
 0x159   :  { %v2297_v7 = vpack.c.bf16 %v1523_v1, %v1522_v0  ;;  %v1448_v14 = vadd.f32 %v1447_v51, %v1399_v2 }
 0x15b   :  { %2298 = vst [vmem:[%s3194_s4] sm:$0xff] %v2297_v7   ;;  %v1488_v6 = vmul.f32 %v3112_v23, %v1448_v14 }
 0x15c   :  { %v1351_v9 = vpop.f32.mrf.mxu2 }
 0x15d   :  { %v1352_v15 = vadd.f32 %v1351_v9, %v1303_v3  ;;  %v1508_v10 = vadd.f32 %v3119_v48, %v1488_v6 }
 0x15e   :  { %v1400_v16 = vpop.f32.mrf.mxu3  ;;  %v1305_v13 = vpop.f32.mrf.mxu1 }
 0x15f   :  { %v1401_v19 = vadd.f32 %v1400_v16, %v1352_v15  ;;  %v1306_v26 = vadd.f32 %v1305_v13, %v2960_v44  ;;  %v1524_v31 = vmax.f32 %v1508_v10, 0.0 }
 0x160   :  { %v1452_v20 = vpop.f32.mrf.mxu0 }
 0x161   :  { %v1450_v12 = vadd.f32 %v1449_v5, %v1401_v19 }
 0x163   :  { %v1489_v24 = vmul.f32 %v3112_v23, %v1450_v12 }
 0x164   :  { %v1354_v27 = vpop.f32.mrf.mxu2 }
 0x165   :  { %v1509_v28 = vadd.f32 %v3119_v48, %v1489_v24  ;;  %v1355_v29 = vadd.f32 %v1354_v27, %v1306_v26 }
 0x166   :  { %v1403_v34 = vpop.f32.mrf.mxu3  ;;  %v1307_v30 = vpop.f32.mrf.mxu1 }
 0x167   :  { %v1525_v32 = vmax.f32 %v1509_v28, 0.0  ;;  %v1404_v11 = vadd.f32 %v1403_v34, %v1355_v29  ;;  %v1308_v22 = vadd.f32 %v1307_v30, %v2981_v4 }
 0x168   :  { %v1454_v35 = vpop.f32.mrf.mxu0 }
 0x169   :  { %v2302_v36 = vpack.c.bf16 %v1525_v32, %v1524_v31  ;;  %v1453_v38 = vadd.f32 %v1452_v20, %v1404_v11 }
 0x16b   :  { %2334 = vst [vmem:[%s3194_s4 + $0x8] sm:$0xff] %v2302_v36   ;;  %v1490_v50 = vmul.f32 %v3112_v23, %v1453_v38 }
 0x16c   :  { %v1356_v39 = vpop.f32.mrf.mxu2 }
 0x16d   :  { %v1357_v44 = vadd.f32 %v1356_v39, %v1308_v22  ;;  %v1510_v54 = vadd.f32 %v3119_v48, %v1490_v50 }
 0x16e   :  { %v1405_v41 = vpop.f32.mrf.mxu3  ;;  %v1310_v43 = vpop.f32.mrf.mxu1 }
 0x16f   :  { %v1406_v45 = vadd.f32 %v1405_v41, %v1357_v44  ;;  %v1311_v49 = vadd.f32 %v1310_v43, %v2990_v18  ;;  %v1526_v62 = vmax.f32 %v1510_v54, 0.0 }
 0x170   :  { %v1457_v46 = vpop.f32.mrf.mxu0 }
 0x171   :  { %v1455_v56 = vadd.f32 %v1454_v35, %v1406_v45 }
 0x173   :  { %v1491_v40 = vmul.f32 %v3112_v23, %v1455_v56 }
 0x174   :  { %v1359_v51 = vpop.f32.mrf.mxu2 }
 0x175   :  { %v1511_v55 = vadd.f32 %v3119_v48, %v1491_v40  ;;  %v1360_v53 = vadd.f32 %v1359_v51, %v1311_v49 }
 0x176   :  { %v1408_v4 = vpop.f32.mrf.mxu3  ;;  %v1312_v57 = vpop.f32.mrf.mxu1 }
 0x177   :  { %v1527_v58 = vmax.f32 %v1511_v55, 0.0  ;;  %v1409_v59 = vadd.f32 %v1408_v4, %v1360_v53  ;;  %v1313_v0 = vadd.f32 %v1312_v57, %v3010_v37 }
 0x178   :  { %v1459_v60 = vpop.f32.mrf.mxu0 }
 0x179   :  { %v2307_v61 = vpack.c.bf16 %v1527_v58, %v1526_v62  ;;  %v1458_v63 = vadd.f32 %v1457_v46, %v1409_v59 }
 0x17b   :  { %2335 = vst [vmem:[%s3194_s4 + $0x10] sm:$0xff] %v2307_v61   ;;  %v1492_v7 = vmul.f32 %v3112_v23, %v1458_v63 }
 0x17c   :  { %v1361_v1 = vpop.f32.mrf.mxu2 }
 0x17d   :  { %v1362_v18 = vadd.f32 %v1361_v1, %v1313_v0  ;;  %v1512_v15 = vadd.f32 %v3119_v48, %v1492_v7 }
 0x17e   :  { %v1410_v2 = vpop.f32.mrf.mxu3  ;;  %v1315_v5 = vpop.f32.mrf.mxu1 }
 0x17f   :  { %v1411_v14 = vadd.f32 %v1410_v2, %v1362_v18  ;;  %v1316_v13 = vadd.f32 %v1315_v5, %v3019_v47  ;;  %v1528_v10 = vmax.f32 %v1512_v15, 0.0 }
 0x180   :  { %v1462_v3 = vpop.f32.mrf.mxu0 }
 0x181   :  { %v1460_v9 = vadd.f32 %v1459_v60, %v1411_v14 }
 0x183   :  { %v1493_v16 = vmul.f32 %v3112_v23, %v1460_v9 }
 0x184   :  { %v1364_v6 = vpop.f32.mrf.mxu2 }
 0x185   :  { %v1513_v19 = vadd.f32 %v3119_v48, %v1493_v16  ;;  %v1365_v20 = vadd.f32 %v1364_v6, %v1316_v13 }
 0x186   :  { %v1413_v37 = vpop.f32.mrf.mxu3  ;;  %v1317_v12 = vpop.f32.mrf.mxu1 }
 0x187   :  { %v1529_v24 = vmax.f32 %v1513_v19, 0.0  ;;  %v1414_v26 = vadd.f32 %v1413_v37, %v1365_v20  ;;  %v1318_v34 = vadd.f32 %v1317_v12, %v3040_v8 }
 0x188   :  { %v1464_v27 = vpop.f32.mrf.mxu0 }
 0x189   :  { %v2312_v28 = vpack.c.bf16 %v1529_v24, %v1528_v10  ;;  %v1463_v29 = vadd.f32 %v1462_v3, %v1414_v26 }
 0x18b   :  { %2336 = vst [vmem:[%s3194_s4 + $0x18] sm:$0xff] %v2312_v28   ;;  %v1494_v11 = vmul.f32 %v3112_v23, %v1463_v29 }
 0x18c   :  { %v1366_v30 = vpop.f32.mrf.mxu2 }
 0x18d   :  { %v1367_v47 = vadd.f32 %v1366_v30, %v1318_v34  ;;  %v1514_v22 = vadd.f32 %v3119_v48, %v1494_v11 }
 0x18e   :  { %v1415_v31 = vpop.f32.mrf.mxu3  ;;  %v1320_v32 = vpop.f32.mrf.mxu1 }
 0x18f   :  { %v1416_v35 = vadd.f32 %v1415_v31, %v1367_v47  ;;  %v1321_v44 = vadd.f32 %v1320_v32, %v3049_v21  ;;  %v1530_v46 = vmax.f32 %v1514_v22, 0.0 }
 0x190   :  { %v1467_v36 = vpop.f32.mrf.mxu0 }
 0x191   :  { %v1465_v38 = vadd.f32 %v1464_v27, %v1416_v35 }
 0x193   :  { %v1495_v39 = vmul.f32 %v3112_v23, %v1465_v38 }
 0x194   :  { %v1369_v41 = vpop.f32.mrf.mxu2 }
 0x195   :  { %v1515_v43 = vadd.f32 %v3119_v48, %v1495_v39  ;;  %v1370_v50 = vadd.f32 %v1369_v41, %v1321_v44 }
 0x196   :  { %v1418_v8 = vpop.f32.mrf.mxu3  ;;  %v1322_v45 = vpop.f32.mrf.mxu1 }
 0x197   :  { %v1531_v56 = vmax.f32 %v1515_v43, 0.0  ;;  %v1419_v54 = vadd.f32 %v1418_v8, %v1370_v50  ;;  %v1323_v55 = vadd.f32 %v1322_v45, %v3070_v42 }
 0x198   :  { %v1469_v40 = vpop.f32.mrf.mxu0 }
 0x199   :  { %v2317_v49 = vpack.c.bf16 %v1531_v56, %v1530_v46  ;;  %v1468_v51 = vadd.f32 %v1467_v36, %v1419_v54 }
 0x19b   :  { %2337 = vst [vmem:[%s3194_s4 + $0x20] sm:$0xff] %v2317_v49   ;;  %v1496_v62 = vmul.f32 %v3112_v23, %v1468_v51 }
 0x19c   :  { %v1371_v53 = vpop.f32.mrf.mxu2 }
 0x19d   :  { %v1372_v21 = vadd.f32 %v1371_v53, %v1323_v55  ;;  %v1516_v61 = vadd.f32 %v3119_v48, %v1496_v62 }
 0x19e   :  { %v1420_v4 = vpop.f32.mrf.mxu3  ;;  %v1325_v57 = vpop.f32.mrf.mxu1 }
 0x19f   :  { %v1421_v58 = vadd.f32 %v1420_v4, %v1372_v21  ;;  %v1326_v0 = vadd.f32 %v1325_v57, %v3079_v52  ;;  %v1532_v7 = vmax.f32 %v1516_v61, 0.0 }
 0x1a0   :  { %v1472_v60 = vpop.f32.mrf.mxu0 }
 0x1a1   :  { %v1470_v59 = vadd.f32 %v1469_v40, %v1421_v58 }
 0x1a3   :  { %v1497_v63 = vmul.f32 %v3112_v23, %v1470_v59 }
 0x1a4   :  { %v1374_v1 = vpop.f32.mrf.mxu2 }
 0x1a5   :  { %v1517_v18 = vadd.f32 %v3119_v48, %v1497_v63  ;;  %v1375_v2 = vadd.f32 %v1374_v1, %v1326_v0 }
 0x1a6   :  { %v1423_v42 = vpop.f32.mrf.mxu3  ;;  %v1327_v5 = vpop.f32.mrf.mxu1 }
 0x1a7   :  { %v1533_v14 = vmax.f32 %v1517_v18, 0.0  ;;  %v1424_v3 = vadd.f32 %v1423_v42, %v1375_v2  ;;  %v1328_v16 = vadd.f32 %v1327_v5, %v3100_v17 }
 0x1a8   :  { %v1474_v13 = vpop.f32.mrf.mxu0 }
 0x1a9   :  { %v2322_v9 = vpack.c.bf16 %v1533_v14, %v1532_v7  ;;  %v1473_v15 = vadd.f32 %v1472_v60, %v1424_v3 }
 0x1ab   :  { %2338 = vst [vmem:[%s3194_s4 + $0x28] sm:$0xff] %v2322_v9   ;;  %v1498_v37 = vmul.f32 %v3112_v23, %v1473_v15 }
 0x1ac   :  { %v1376_v6 = vpop.f32.mrf.mxu2 }
 0x1ad   :  { %v1377_v52 = vadd.f32 %v1376_v6, %v1328_v16  ;;  %v1518_v24 = vadd.f32 %v3119_v48, %v1498_v37 }
 0x1ae   :  { %v1425_v19 = vpop.f32.mrf.mxu3  ;;  %v1330_v20 = vpop.f32.mrf.mxu1 }
 0x1af   :  { %v1426_v12 = vadd.f32 %v1425_v19, %v1377_v52  ;;  %v1331_v27 = vadd.f32 %v1330_v20, %v3103_v25  ;;  %v1534_v47 = vmax.f32 %v1518_v24, 0.0 }
 0x1b0   :  { %v1477_v30 = vpop.f32.mrf.mxu0 }
 0x1b1   :  { %v1475_v10 = vadd.f32 %v1474_v13, %v1426_v12 }
 0x1b3   :  { %v1499_v26 = vmul.f32 %v3112_v23, %v1475_v10 }
 0x1b4   :  { %v1379_v28 = vpop.f32.mrf.mxu2 }
 0x1b5   :  { %v1519_v29 = vadd.f32 %v3119_v48, %v1499_v26  ;;  %v1380_v34 = vadd.f32 %v1379_v28, %v1331_v27 }
 0x1b6   :  { %v1428_v17 = vpop.f32.mrf.mxu3  ;;  %v1332_v11 = vpop.f32.mrf.mxu1 }
 0x1b7   :  { %v1535_v31 = vmax.f32 %v1519_v29, 0.0  ;;  %v1429_v32 = vadd.f32 %v1428_v17, %v1380_v34  ;;  %v1333_v38 = vadd.f32 %v1332_v11, %v3106_v33 }
 0x1b8   :  { %v1479_v43 = vpop.f32.mrf.mxu0 }
 0x1b9   :  { %v2327_v35 = vpack.c.bf16 %v1535_v31, %v1534_v47  ;;  %v1478_v36 = vadd.f32 %v1477_v30, %v1429_v32 }
 0x1bb   :  { %2339 = vst [vmem:[%s3194_s4 + $0x30] sm:$0xff] %v2327_v35   ;;  %v1500_v44 = vmul.f32 %v3112_v23, %v1478_v36 }
 0x1bc   :  { %v1381_v22 = vpop.f32.mrf.mxu2 }
 0x1bd   :  { %v1382_v25 = vadd.f32 %v1381_v22, %v1333_v38  ;;  %v1520_v8 = vadd.f32 %v3119_v48, %v1500_v44 }
 0x1be   :  { %v1430_v39 = vpop.f32.mrf.mxu3 }
 0x1bf   :  { %v1431_v41 = vadd.f32 %v1430_v39, %v1382_v25  ;;  %v1536_v56 = vmax.f32 %v1520_v8, 0.0 }
 0x1c1   :  { %v1480_v50 = vadd.f32 %v1479_v43, %v1431_v41 }
 0x1c3   :  { %v1501_v45 = vmul.f32 %v3112_v23, %v1480_v50 }
 0x1c5   :  { %v1521_v46 = vadd.f32 %v3119_v48, %v1501_v45 }
 0x1c7   :  { %v1537_v54 = vmax.f32 %v1521_v46, 0.0 }
 0x1c9   :  { %v2332_v40 = vpack.c.bf16 %v1537_v54, %v1536_v56 }
 0x1cb   :  { %2340 = vst [vmem:[%s3194_s4 + $0x38] sm:$0xff] %v2332_v40  }

// kernel: _lambda_.19
= control target key start
LH: loop header
LB: loop body
LE: loop exit
PB: predicated region body
PF: predicated region fallthrough
CT: control target
= control target key end

     0   :  { %6 = vsyncpa [#allocation3], 0  ;;  %s411_s0 = inlined_call_operand.vmem [shape: f32[2,16,128], index: 0, kind: input, shape index: {}]   ;;  %s412_s1 = inlined_call_operand.hbm [shape: f32[2,1,128], index: 1, kind: output, shape index: {}]  }
   0x1   :  { %8 = vsyncpa [#allocation3 + $0x1], 0  ;;  %s326_s6 = smov 0   ;;  %s328_s7 = smov 0  }
   0x2   :  { %s330_s8 = smov 0   ;;  %s332_s9 = smov 0  }
   0x3 LB: > { %s347_s10 = sadd.s32 4294967295, %s313_s9   ;;  %s200_s11 = sadd.s32 4294967294, %s313_s9   ;;  %s313_s9 = sphi %s332_s9, %s418_s9   ;;  %s309_s8 = sphi %s330_s8, %s417_s8   ;;  %s305_s7 = sphi %s328_s7, %s416_s7   ;;  %s301_s6 = sphi %s326_s6, %s415_s6  }
   0x4   : > { %s351_s12 = sadd.s32 1, %s313_s9   ;;  %s47_s13 = sadd.s32 1, %s309_s8 }
   0x5   : > { %s44_s14 = ssub.s32 %s313_s9, %s351_s12  ;;  %p57_p0 = scmp.ne.s32.totalorder %s309_s8, %s305_s7 }
   0x6   : > { %p45_p1 = scmp.eq.s32.totalorder %s44_s14, 0  ;;  %p58_p2 = scmp.eq.s32.totalorder %s347_s10, 1 }
   0x7   : > { %p63_p3 = scmp.ne.s32.totalorder %s305_s7, %s301_s6  ;;  %p64_p4 = scmp.eq.s32.totalorder %s200_s11, 1 }
   0x8   : > { %s362_s15 = scalar_select %p45_p1, %s309_s8, %s47_s13  }
   0x9   : > { %p364_p5 = por %p58_p2, %p57_p0  ;;  %p368_p6 = por %p64_p4, %p63_p3 }
   0xa   : > { %p203_p7 = scmp.ge.s32.totalorder %s313_s9, 1  ;;  %p90_p8 = scmp.lt.s32.totalorder %s313_s9, 3 }
   0xc   : > { %p91_p9 = pnand %p203_p7, %p90_p8 }
   0xd   : > { %p109_p10 = scmp.lt.s32.totalorder (!%p91_p9), %s347_s10, 1  ;;  %s107_s23 = sand.u32 (!%p91_p9), 1, %s305_s7  }
   0xe   : > { %94 = sbr.rel (%p91_p9) target bundleno = 43 (0x2b), region = 24  ;;  %s141_s26 = scalar_lea.hbm (!%p91_p9), %s412_s1, %s347_s10 }
   0xf   : > { %s108_s27 = scalar_lea.vmem (!%p91_p9), [#allocation2], %s107_s23  ;;  %s145_s29 = sshll.u32 (!%p91_p9), %s141_s26, 4  ;;  %s146_s29 = int_to_ptr.hbm [resolvable:$true] %s145_s29 }
  0x10   : > { %s143_s28 = sshll.u32 (!%p91_p9), %s108_s27, 4  ;;  %s133_s30 = scalar_lea.sflag (!%p91_p9), [#allocation3], %s107_s23  ;;  %s144_s28 = int_to_ptr.vmem [resolvable:$true] %s143_s28 }
  0x11   : > { %s265_s2 = sshra.s32 (!%p91_p9), %s146_s29, 4  ;;  %s266_s2 = int_to_ptr.hbm [resolvable:$true] %s265_s2 }
  0x12   : > { %s267_s3 = scalar_lea.hbm (!%p91_p9), %s266_s2, 1  ;;  %p272_p0 = scmp.lt.s32.totalorder (!%p91_p9), %s266_s2, %s412_s1 }
  0x13   : > { %v315_v0 = vmov 16.0   ;;  %s110_s18 = scalar_select %p109_p10, %s347_s10, 1 }
  0x14   : > { %249 = vrcp.f32 %v315_v0  ;;  %p268_p11 = scmp.ne.s32.totalorder %s266_s2, %s267_s3  ;;  %s271_s10 = scalar_lea.hbm %s412_s1, 2 }
  0x15   : > { %s208_s19 = sshll.u32 %s110_s18, 4  ;;  %p273_p1 = scmp.lt.s32.totalorder %s271_s10, %s267_s3 }
  0x16   : > { %s113_s22 = scalar_lea.vmem %s411_s0, %s208_s19  ;;  %p269_p12 = pnand %p268_p11, %p364_p5 }
  0x17   : > { %v114_v1 = vld [vmem:[%s113_s22] sm:$0xff]  ;;  %v115_v2 = vld [vmem:[%s113_s22 + $0x8] sm:$0xff]  ;;  %p274_p2 = por %p273_p1, %p272_p0 }
  0x18   : > { %v116_v4 = vadd.f32 %v115_v2, %v114_v1  ;;  %p270_p13 = pneg %p269_p12 }
  0x1a   : > { %v250_v3 = vpop.eup %249  ;;  %v117_v6 = vrot.slane %v116_v4, 4  ;;  %p275_p3 = pnand %p274_p2, %p270_p13 }
  0x1b   : > { %v124_v5 = vmul.f32 16.0, %v250_v3  ;;  %vm128_vm0 = vweird.f32 %v250_v3 }
  0x1c   : > { %v118_v8 = vadd.f32 %v117_v6, %v116_v4 }
  0x1d   : > { %v125_v7 = vsub.f32 1.0, %v124_v5 }
  0x1e   : > { %v119_v10 = vrot.slane %v118_v8, 2 }
  0x1f   : > { %v126_v9 = vmul.f32 %v250_v3, %v125_v7 }
  0x20   : > { %v120_v12 = vadd.f32 %v119_v10, %v118_v8 }
  0x21   : > { %v127_v11 = vadd.f32 %v250_v3, %v126_v9 }
  0x22   : > { %v121_v13 = vrot.slane %v120_v12, 1 }
  0x23   : > { %v129_v14 = vsel %vm128_vm0, %v250_v3, %v127_v11 }
  0x24   : > { %v122_v15 = vadd.f32 %v121_v13, %v120_v12 }
  0x26   : > { %v130_v16 = vmul.f32 %v129_v14, %v122_v15 }
  0x28   : > { %131 = vst [vmem:[%s108_s27] sm:$0x1] %v130_v16 }
  0x29   : > { %278 = shalt.err (!%p275_p3)
}
  0x2a   : > { %209 = dma.vmem_to_hbm [thread:$0]  (%p364_p5), %s144_s28, 16, %s146_s29, %s133_s30  }
  0x2b PF: > { %p215_p4 = scmp.ge.s32.totalorder %s313_s9, 2  ;;  %s157_s14 = sand.u32 1, %s301_s6  }
  0x2c   : > { %s158_s18 = scalar_lea.sflag [#allocation3], %s157_s14 }
  0x2d   : > { %p212_p7 = pnand %p215_p4, %p368_p6 }
  0x2f   : > { %p213_p8 = pneg %p212_p7 }
  0x31   : > { %296 = dma.done.wait (%p213_p8), %s158_s18, 16  }
  0x32   : > { %298 = vsyncadd (%p213_p8), %s158_s18, 4294967280  ;;  %p11_p9 = scmp.ge.s32.totalorder %s351_s12, 4   ;;  %s415_s6 = smov %s305_s7 }
  0x33   : > { %s416_s7 = smov %s309_s8  ;;  %s417_s8 = smov %s362_s15 }
  0x34   : > { %s418_s9 = smov %s351_s12  ;;  %13 = sbr.rel (!%p11_p9) target bundleno = 3 (0x3), region = 59 }
  0x39   :  { %163 = vsyncpa [#allocation3], 1 }
  0x3a   :  { %165 = vsyncpa [#allocation3 + $0x1], 1 }

</bundles_post_ra>
